<compile_context>
chip_gen: v7x
topology: tpu7x:2x2x1
jax: 0.10.0
libtpu: 0.0.40
codegen_flags: <defaults>
</compile_context>

<pallas_src>
import functools
from typing import NamedTuple, Optional

import jax
import jax.numpy as jnp
from jax.experimental import pallas as pl
from jax.experimental.pallas import tpu as pltpu


# ----------------------------------------------------------------------------
# tiling helpers
# ----------------------------------------------------------------------------
def _round_up(x, m):
    return ((x + m - 1) // m) * m


def _choose_tile_k(K):
    """Prefer a single K step (no accumulate loop) when the padded K is small."""
    Kp = _round_up(K, 128)
    if Kp <= 2048:
        return Kp, Kp                      # single K step
    best_tk, best_kp = 512, _round_up(K, 512)
    for tk in (1024, 2048):
        kp = _round_up(K, tk)
        if kp <= best_kp:
            best_tk, best_kp = tk, kp
    return best_tk, best_kp


def _choose_tile_n(N):
    tn = min(256, _round_up(N, 128))
    return tn, _round_up(N, tn)


def _choose_tile_m(M):
    tm = min(256, _round_up(M, 8))
    return tm, _round_up(M, tm)


# ----------------------------------------------------------------------------
# Pallas kernels
# ----------------------------------------------------------------------------
def _matmul_bias_single_kernel(x_ref, w_ref, b_ref, o_ref, *, apply_relu):
    """Whole contraction dim in one block: relu?(x @ W + b)."""
    out = jnp.dot(x_ref[...], w_ref[...], preferred_element_type=jnp.float32)
    out = out + b_ref[...]                         # (1, tn) broadcasts
    if apply_relu:
        out = jnp.maximum(out, 0.0)
    o_ref[...] = out.astype(o_ref.dtype)


def _matmul_bias_acc_kernel(x_ref, w_ref, b_ref, o_ref, acc_ref, *, apply_relu):
    """Tiled K with f32 VMEM accumulator (used only when K is large)."""
    @pl.when(pl.program_id(2) == 0)
    def _():
        acc_ref[...] = jnp.zeros_like(acc_ref)

    acc_ref[...] += jnp.dot(x_ref[...], w_ref[...],
                            preferred_element_type=jnp.float32)

    @pl.when(pl.program_id(2) == pl.num_programs(2) - 1)
    def _():
        out = acc_ref[...] + b_ref[...]
        if apply_relu:
            out = jnp.maximum(out, 0.0)
        o_ref[...] = out.astype(o_ref.dtype)


def _head_kernel(x_ref, w1_ref, b1_ref, w2_ref, b2_ref, o_ref):
    """Fused head: relu(x @ W1 + b1) @ W2 + b2 in one kernel."""
    h = jnp.dot(x_ref[...], w1_ref[...], preferred_element_type=jnp.float32)
    h = jnp.maximum(h + b1_ref[...], 0.0)
    o = jnp.dot(h, w2_ref[...], preferred_element_type=jnp.float32)
    o_ref[...] = (o + b2_ref[...]).astype(o_ref.dtype)


# ----------------------------------------------------------------------------
# specs + padded parameter preparation (done once at build time)
# ----------------------------------------------------------------------------
class DenseSpec(NamedTuple):
    K: int
    N: int
    Kp: int
    Np: int
    tk: int
    tn: int
    relu: bool


class ConvSpec(NamedTuple):
    kh: int
    kw: int
    stride: int
    dense: DenseSpec


class HeadSpec(NamedTuple):
    K: int
    H: int
    N: int
    Kp: int
    Hp: int
    Np: int


_HEAD_VMEM_WEIGHT_BUDGET = 24 * 1024 * 1024   # bytes, conservative


def _make_dense(w_mat, b, relu):
    """w_mat: (K, N) in matmul orientation; pre-pad once to lane-aligned tiles."""
    K, N = w_mat.shape
    tk, Kp = _choose_tile_k(K)
    tn, Np = _choose_tile_n(N)
    w_pad = jnp.zeros((Kp, Np), jnp.float32).at[:K, :N].set(
        w_mat.astype(jnp.float32))
    b_pad = jnp.zeros((1, Np), jnp.float32).at[0, :N].set(
        b.astype(jnp.float32))
    spec = DenseSpec(K=K, N=N, Kp=Kp, Np=Np, tk=tk, tn=tn, relu=relu)
    return spec, {"w": w_pad, "b": b_pad}


def _make_head(w1_mat, b1, w2_mat, b2) -> Optional[tuple]:
    """w1_mat: (K, H), w2_mat: (H, N). Returns None if too big for VMEM."""
    K, H = w1_mat.shape
    H2, N = w2_mat.shape
    assert H == H2
    Kp, Hp, Np = _round_up(K, 128), _round_up(H, 128), _round_up(N, 128)
    weight_bytes = 4 * (Kp * Hp + Hp * Np + Hp + Np)
    if weight_bytes > _HEAD_VMEM_WEIGHT_BUDGET:
        return None
    w1p = jnp.zeros((Kp, Hp), jnp.float32).at[:K, :H].set(w1_mat.astype(jnp.float32))
    b1p = jnp.zeros((1, Hp), jnp.float32).at[0, :H].set(b1.astype(jnp.float32))
    w2p = jnp.zeros((Hp, Np), jnp.float32).at[:H, :N].set(w2_mat.astype(jnp.float32))
    b2p = jnp.zeros((1, Np), jnp.float32).at[0, :N].set(b2.astype(jnp.float32))
    spec = HeadSpec(K=K, H=H, N=N, Kp=Kp, Hp=Hp, Np=Np)
    return spec, {"w1": w1p, "b1": b1p, "w2": w2p, "b2": b2p}


# ----------------------------------------------------------------------------
# wrappers around pallas_call
# ----------------------------------------------------------------------------
def matmul_bias(x, arrays, spec: DenseSpec):
    """relu?(x @ W + b) with a tiled, pipelined Pallas kernel. x: (M, K)."""
    M, K = x.shape
    assert K == spec.K, (K, spec.K)
    tm, Mp = _choose_tile_m(M)
    tk, tn, Kp, Np = spec.tk, spec.tn, spec.Kp, spec.Np

    x_pad = x
    if Mp != M or Kp != K:
        x_pad = jnp.pad(x, ((0, Mp - M), (0, Kp - K)))

    cost = pl.CostEstimate(
        flops=2 * Mp * Np * Kp, transcendentals=0,
        bytes_accessed=4 * (Mp * Kp + Kp * Np + Mp * Np))
    cparams = pltpu.CompilerParams(
        dimension_semantics=("parallel", "parallel") if Kp == tk
        else ("parallel", "parallel", "arbitrary"),
        vmem_limit_bytes=32 * 1024 * 1024)

    if Kp == tk:
        # Single K step: no accumulator scratch, no init/finalize phases.
        grid = (Mp // tm, Np // tn)
        out = pl.pallas_call(
            functools.partial(_matmul_bias_single_kernel, apply_relu=spec.relu),
            out_shape=jax.ShapeDtypeStruct((Mp, Np), jnp.float32),
            grid_spec=pltpu.PrefetchScalarGridSpec(
                num_scalar_prefetch=0,
                grid=grid,
                in_specs=[
                    pl.BlockSpec((tm, Kp), lambda i, j: (i, 0)),
                    pl.BlockSpec((Kp, tn), lambda i, j: (0, j)),
                    pl.BlockSpec((1, tn), lambda i, j: (0, j)),
                ],
                out_specs=pl.BlockSpec((tm, tn), lambda i, j: (i, j)),
            ),
            compiler_params=cparams,
            cost_estimate=cost,
        )(x_pad, arrays["w"], arrays["b"])
    else:
        grid = (Mp // tm, Np // tn, Kp // tk)
        out = pl.pallas_call(
            functools.partial(_matmul_bias_acc_kernel, apply_relu=spec.relu),
            out_shape=jax.ShapeDtypeStruct((Mp, Np), jnp.float32),
            grid_spec=pltpu.PrefetchScalarGridSpec(
                num_scalar_prefetch=0,
                grid=grid,
                in_specs=[
                    pl.BlockSpec((tm, tk), lambda i, j, k: (i, k)),
                    pl.BlockSpec((tk, tn), lambda i, j, k: (k, j)),
                    pl.BlockSpec((1, tn), lambda i, j, k: (0, j)),
                ],
                out_specs=pl.BlockSpec((tm, tn), lambda i, j, k: (i, j)),
                scratch_shapes=[pltpu.VMEM((tm, tn), jnp.float32)],
            ),
            compiler_params=cparams,
            cost_estimate=cost,
        )(x_pad, arrays["w"], arrays["b"])

    if Mp != M or Np != spec.N:
        out = out[:M, :spec.N]
    return out


def head_forward(x, arrays, spec: HeadSpec):
    """Fused relu(x @ W1 + b1) @ W2 + b2. x: (M, K)."""
    M, K = x.shape
    assert K == spec.K, (K, spec.K)
    tm, Mp = _choose_tile_m(M)
    x_pad = x
    if Mp != M or spec.Kp != K:
        x_pad = jnp.pad(x, ((0, Mp - M), (0, spec.Kp - K)))

    out = pl.pallas_call(
        _head_kernel,
        out_shape=jax.ShapeDtypeStruct((Mp, spec.Np), jnp.float32),
        grid_spec=pltpu.PrefetchScalarGridSpec(
            num_scalar_prefetch=0,
            grid=(Mp // tm,),
            in_specs=[
                pl.BlockSpec((tm, spec.Kp), lambda i: (i, 0)),
                pl.BlockSpec((spec.Kp, spec.Hp), lambda i: (0, 0)),
                pl.BlockSpec((1, spec.Hp), lambda i: (0, 0)),
                pl.BlockSpec((spec.Hp, spec.Np), lambda i: (0, 0)),
                pl.BlockSpec((1, spec.Np), lambda i: (0, 0)),
            ],
            out_specs=pl.BlockSpec((tm, spec.Np), lambda i: (i, 0)),
        ),
        compiler_params=pltpu.CompilerParams(
            dimension_semantics=("parallel",),
            vmem_limit_bytes=32 * 1024 * 1024),
        cost_estimate=pl.CostEstimate(
            flops=2 * Mp * (spec.Kp * spec.Hp + spec.Hp * spec.Np),
            transcendentals=0,
            bytes_accessed=4 * (Mp * spec.Kp + spec.Kp * spec.Hp
                                + spec.Hp * spec.Np + Mp * spec.Np)),
    )(x_pad, arrays["w1"], arrays["b1"], arrays["w2"], arrays["b2"])

    if Mp != M or spec.Np != spec.N:
        out = out[:M, :spec.N]
    return out


# ----------------------------------------------------------------------------
# NHWC im2col glue (strided slices; channels stay on the lane axis).
# ----------------------------------------------------------------------------
# TODO(synk): fuse im2col into the matmul kernel (in-kernel strided pl.ds
# reads over (kh, kw) taps) to avoid the KH*KW HBM duplication of the input.
def _im2col_nhwc(x, kh, kw, stride):
    """(N,H,W,C) -> (N*OH*OW, KH*KW*C) with (kh, kw, c) feature ordering."""
    N, H, W, C = x.shape
    OH = (H - kh) // stride + 1
    OW = (W - kw) // stride + 1
    taps = []
    for i in range(kh):
        for j in range(kw):
            taps.append(jax.lax.slice(
                x, (0, i, j, 0),
                (N, i + stride * (OH - 1) + 1, j + stride * (OW - 1) + 1, C),
                (1, stride, stride, 1)))                 # (N, OH, OW, C)
    patches = jnp.concatenate(taps, axis=-1)             # (N, OH, OW, KH*KW*C)
    return patches.reshape(N * OH * OW, kh * kw * C), OH, OW


def conv2d(x_nhwc, arrays, spec: ConvSpec):
    N = x_nhwc.shape[0]
    patches, OH, OW = _im2col_nhwc(x_nhwc, spec.kh, spec.kw, spec.stride)
    out = matmul_bias(patches, arrays, spec.dense)       # (N*OH*OW, OC)
    return out.reshape(N, OH, OW, spec.dense.N)          # stays NHWC


# ----------------------------------------------------------------------------
# parameter init (PyTorch-default-style uniform fan-in bounds) + preparation
# ----------------------------------------------------------------------------
def conv2d_size_out(size, kernel_size, stride):
    return (size - (kernel_size - 1) - 1) // stride + 1


def init_conv(key, oc, ic, k):
    bound = 1.0 / float(ic * k * k) ** 0.5
    kw_, kb_ = jax.random.split(key)
    w = jax.random.uniform(kw_, (oc, ic, k, k), jnp.float32, -bound, bound)
    b = jax.random.uniform(kb_, (oc,), jnp.float32, -bound, bound)
    return w, b


def init_linear(key, out_f, in_f):
    bound = 1.0 / float(in_f) ** 0.5
    kw_, kb_ = jax.random.split(key)
    w = jax.random.uniform(kw_, (out_f, in_f), jnp.float32, -bound, bound)
    b = jax.random.uniform(kb_, (out_f,), jnp.float32, -bound, bound)
    return w, b


def build_model(key, input_size, output_size,
                hidden_size_list=((32, 8, 3), (64, 6, 2), (1, 4, 1))):
    """Returns (raw torch-layout params, static specs, prepared padded arrays)."""
    w_sp, h_sp, c = input_size[0], input_size[1], input_size[2]
    keys = jax.random.split(key, len(hidden_size_list) + 2)

    raw = {"convs": []}
    specs = {"convs": []}
    arrays = {"convs": []}

    in_c = c
    for i, (oc, k, s) in enumerate(hidden_size_list):
        w, b = init_conv(keys[i], oc, in_c, k)
        raw["convs"].append((w, b, s))
        # (OC, IC, KH, KW) -> (KH*KW*IC, OC), matching NHWC im2col ordering.
        w_mat = jnp.transpose(w, (2, 3, 1, 0)).reshape(k * k * in_c, oc)
        dspec, darr = _make_dense(w_mat, b, relu=True)   # every conv -> ReLU
        specs["convs"].append(ConvSpec(kh=k, kw=k, stride=s, dense=dspec))
        arrays["convs"].append(darr)
        w_sp = conv2d_size_out(w_sp, k, s)
        h_sp = conv2d_size_out(h_sp, k, s)
        in_c = oc

    lin_in = w_sp * h_sp * hidden_size_list[-1][0]
    assert lin_in > 0 and lin_in // 4 > 0

    w1, b1 = init_linear(keys[-2], lin_in // 4, lin_in)
    w2, b2 = init_linear(keys[-1], output_size, lin_in // 4)
    raw["fc1"], raw["fc2"] = (w1, b1), (w2, b2)

    # fc1's input columns are the NCHW flatten (c, sp0, sp1) in PyTorch; we
    # flatten NHWC (sp0, sp1, c), so permute weight columns once at build time.
    w1_chw = w1.reshape(lin_in // 4, in_c, w_sp, h_sp)
    w1_hwc = jnp.transpose(w1_chw, (0, 2, 3, 1)).reshape(lin_in // 4, lin_in)

    head = _make_head(w1_hwc.T, b1, w2.T, b2)
    if head is not None:
        specs["head_fused"] = True
        specs["head"], arrays["head"] = head
    else:
        specs["head_fused"] = False
        specs["fc1"], arrays["fc1"] = _make_dense(w1_hwc.T, b1, relu=True)
        specs["fc2"], arrays["fc2"] = _make_dense(w2.T, b2, relu=False)
    return raw, specs, arrays


# ----------------------------------------------------------------------------
# DQN_CNN (dueling=False, is_noisy=False) forward — NHWC end-to-end.
# ----------------------------------------------------------------------------
def dqn_cnn_forward(arrays, x_nwhc, *, specs):
    # PyTorch does x.permute(0,3,1,2) -> NCHW; with NHWC kernels we use x
    # as-is (channels already last), and weights were pre-permuted to match.
    x = x_nwhc
    for darr, cspec in zip(arrays["convs"], specs["convs"]):
        x = conv2d(x, darr, cspec)                     # conv + fused ReLU
    x = x.reshape(x.shape[0], -1)                      # NHWC flatten (fc1 permuted)
    if specs["head_fused"]:
        return head_forward(x, arrays["head"], specs["head"])   # fc1+ReLU+fc2
    x = matmul_bias(x, arrays["fc1"], specs["fc1"])    # Linear + ReLU
    return matmul_bias(x, arrays["fc2"], specs["fc2"])  # Linear


# ----------------------------------------------------------------------------
# Pure-JAX reference (uses the raw PyTorch-layout params; validates that the
# NHWC / pre-permuted-weight pipeline matches the original module exactly).
# ----------------------------------------------------------------------------
def dqn_cnn_reference(raw, x_nwhc):
    x = jnp.transpose(x_nwhc, (0, 3, 1, 2))
    for (w, b, s) in raw["convs"]:
        x = jax.lax.conv_general_dilated(
            x, w, window_strides=(s, s), padding="VALID",
            dimension_numbers=("NCHW", "OIHW", "NCHW"))
        x = jnp.maximum(x + b[None, :, None, None], 0.0)
    x = x.reshape(x.shape[0], -1)
    w1, b1 = raw["fc1"]
    x = jnp.maximum(x @ w1.T + b1, 0.0)
    w2, b2 = raw["fc2"]
    return x @ w2.T + b2


if __name__ == "__main__":
    # 64x64 is the smallest "nice" spatial size that survives kernels
    # (8,s3),(6,s2),(4,s1): 64 -> 19 -> 7 -> 4, linear_input = 16.
    batch = 2
    input_size = (64, 64, 4)       # (W, H, C) as in the PyTorch module
    output_size = 8

    key = jax.random.PRNGKey(0)
    k_params, k_x = jax.random.split(key)
    raw, specs, arrays = build_model(k_params, input_size, output_size)

    x = jax.random.normal(
        k_x, (batch, input_size[0], input_size[1], input_size[2]),
        dtype=jnp.float32)

    fwd = jax.jit(functools.partial(dqn_cnn_forward, specs=specs))
    out = jax.block_until_ready(fwd(arrays, x))
    ref = jax.block_until_ready(dqn_cnn_reference(raw, x))

    assert out.shape == (batch, output_size), out.shape
    assert jnp.allclose(out, ref, atol=1e-4, rtol=1e-4), (out, ref)
    print("KERNEL_OK")
</pallas_src>

<mosaic_0001>
module attributes {stable_mosaic.version = 11 : i64} {
  func.func @_matmul_bias_single_kernel(%arg0: i32, %arg1: i32, %arg2: memref<256x256xf32, #tpu.memory_space<vmem>>, %arg3: memref<256x128xf32, #tpu.memory_space<vmem>>, %arg4: memref<1x128xf32, #tpu.memory_space<vmem>>, %arg5: memref<256x128xf32, #tpu.memory_space<vmem>>) attributes {dimension_semantics = [#tpu.dimension_semantics<parallel>, #tpu.dimension_semantics<parallel>], iteration_bounds = array<i64: 3, 1>, scalar_prefetch = 0 : i64, scratch_operands = 0 : i64, tpu.core_type = #tpu.core_type<tc>, window_params = [{transform_indices = @transform_0, window_bounds = array<i64: 256, 256>}, {transform_indices = @transform_1, window_bounds = array<i64: 256, 128>}, {transform_indices = @transform_2, window_bounds = array<i64: 1, 128>}, {transform_indices = @transform_3, window_bounds = array<i64: 256, 128>}]} {
    %c0 = arith.constant 0 : index
    %c0_0 = arith.constant 0 : index
    %0 = vector.load %arg2[%c0, %c0_0] : memref<256x256xf32, #tpu.memory_space<vmem>>, vector<256x256xf32>
    %c0_1 = arith.constant 0 : index
    %c0_2 = arith.constant 0 : index
    %1 = vector.load %arg3[%c0_1, %c0_2] : memref<256x128xf32, #tpu.memory_space<vmem>>, vector<256x128xf32>
    %cst = arith.constant dense<0.000000e+00> : vector<256x128xf32>
    %2 = tpu.matmul %0, %1, %cst {dimension_numbers = #tpu.dot_dimension_numbers<[1], [0], [0], [1], [0, 0, 1, 1], [], []>} : vector<256x256xf32>, vector<256x128xf32>, vector<256x128xf32> -> vector<256x128xf32>
    %c0_3 = arith.constant 0 : index
    %c0_4 = arith.constant 0 : index
    %3 = vector.load %arg4[%c0_3, %c0_4] : memref<1x128xf32, #tpu.memory_space<vmem>>, vector<1x128xf32>
    %4 = vector.broadcast %3 : vector<1x128xf32> to vector<256x128xf32>
    %5 = arith.addf %2, %4 : vector<256x128xf32>
    %cst_5 = arith.constant 0.000000e+00 : f32
    %6 = vector.broadcast %cst_5 : f32 to vector<256x128xf32>
    %7 = arith.maximumf %5, %6 : vector<256x128xf32>
    %c0_6 = arith.constant 0 : index
    %c0_7 = arith.constant 0 : index
    %8 = vector.load %arg5[%c0_6, %c0_7] : memref<256x128xf32, #tpu.memory_space<vmem>>, vector<256x128xf32>
    tpu.vector_store %arg5[%c0_6, %c0_7], %7 {strides = array<i32>} : memref<256x128xf32, #tpu.memory_space<vmem>>, vector<256x128xf32>,
    return
  }
  func.func @transform_0(%arg0: i32, %arg1: i32) -> (i32, i32) {
    %c0_i32 = arith.constant 0 : i32
    %c0_i32_0 = arith.constant 0 : i32
    return %arg0, %c0_i32 : i32, i32
  }
  func.func @transform_1(%arg0: i32, %arg1: i32) -> (i32, i32) {
    %c0_i32 = arith.constant 0 : i32
    %c0_i32_0 = arith.constant 0 : i32
    return %c0_i32, %arg1 : i32, i32
  }
  func.func @transform_2(%arg0: i32, %arg1: i32) -> (i32, i32) {
    %c0_i32 = arith.constant 0 : i32
    %c0_i32_0 = arith.constant 0 : i32
    return %c0_i32, %arg1 : i32, i32
  }
  func.func @transform_3(%arg0: i32, %arg1: i32) -> (i32, i32) {
    %c0_i32 = arith.constant 0 : i32
    return %arg0, %arg1 : i32, i32
  }
}

module attributes {stable_mosaic.version = 11 : i64} {
  func.func @_matmul_bias_single_kernel(%arg0: i32, %arg1: i32, %arg2: memref<104x1152xf32, #tpu.memory_space<vmem>>, %arg3: memref<1152x128xf32, #tpu.memory_space<vmem>>, %arg4: memref<1x128xf32, #tpu.memory_space<vmem>>, %arg5: memref<104x128xf32, #tpu.memory_space<vmem>>) attributes {dimension_semantics = [#tpu.dimension_semantics<parallel>, #tpu.dimension_semantics<parallel>], iteration_bounds = array<i64: 1, 1>, scalar_prefetch = 0 : i64, scratch_operands = 0 : i64, tpu.core_type = #tpu.core_type<tc>, window_params = [{transform_indices = @transform_0, window_bounds = array<i64: 104, 1152>}, {transform_indices = @transform_1, window_bounds = array<i64: 1152, 128>}, {transform_indices = @transform_2, window_bounds = array<i64: 1, 128>}, {transform_indices = @transform_3, window_bounds = array<i64: 104, 128>}]} {
    %c0 = arith.constant 0 : index
    %c0_0 = arith.constant 0 : index
    %0 = vector.load %arg2[%c0, %c0_0] : memref<104x1152xf32, #tpu.memory_space<vmem>>, vector<104x1152xf32>
    %c0_1 = arith.constant 0 : index
    %c0_2 = arith.constant 0 : index
    %1 = vector.load %arg3[%c0_1, %c0_2] : memref<1152x128xf32, #tpu.memory_space<vmem>>, vector<1152x128xf32>
    %cst = arith.constant dense<0.000000e+00> : vector<104x128xf32>
    %2 = tpu.matmul %0, %1, %cst {dimension_numbers = #tpu.dot_dimension_numbers<[1], [0], [0], [1], [0, 0, 1, 1], [], []>} : vector<104x1152xf32>, vector<1152x128xf32>, vector<104x128xf32> -> vector<104x128xf32>
    %c0_3 = arith.constant 0 : index
    %c0_4 = arith.constant 0 : index
    %3 = vector.load %arg4[%c0_3, %c0_4] : memref<1x128xf32, #tpu.memory_space<vmem>>, vector<1x128xf32>
    %4 = vector.broadcast %3 : vector<1x128xf32> to vector<104x128xf32>
    %5 = arith.addf %2, %4 : vector<104x128xf32>
    %cst_5 = arith.constant 0.000000e+00 : f32
    %6 = vector.broadcast %cst_5 : f32 to vector<104x128xf32>
    %7 = arith.maximumf %5, %6 : vector<104x128xf32>
    %c0_6 = arith.constant 0 : index
    %c0_7 = arith.constant 0 : index
    %8 = vector.load %arg5[%c0_6, %c0_7] : memref<104x128xf32, #tpu.memory_space<vmem>>, vector<104x128xf32>
    tpu.vector_store %arg5[%c0_6, %c0_7], %7 {strides = array<i32>} : memref<104x128xf32, #tpu.memory_space<vmem>>, vector<104x128xf32>,
    return
  }
  func.func @transform_0(%arg0: i32, %arg1: i32) -> (i32, i32) {
    %c0_i32 = arith.constant 0 : i32
    %c0_i32_0 = arith.constant 0 : i32
    return %arg0, %c0_i32 : i32, i32
  }
  func.func @transform_1(%arg0: i32, %arg1: i32) -> (i32, i32) {
    %c0_i32 = arith.constant 0 : i32
    %c0_i32_0 = arith.constant 0 : i32
    return %c0_i32, %arg1 : i32, i32
  }
  func.func @transform_2(%arg0: i32, %arg1: i32) -> (i32, i32) {
    %c0_i32 = arith.constant 0 : i32
    %c0_i32_0 = arith.constant 0 : i32
    return %c0_i32, %arg1 : i32, i32
  }
  func.func @transform_3(%arg0: i32, %arg1: i32) -> (i32, i32) {
    %c0_i32 = arith.constant 0 : i32
    return %arg0, %arg1 : i32, i32
  }
}

module attributes {stable_mosaic.version = 11 : i64} {
  func.func @_matmul_bias_single_kernel(%arg0: i32, %arg1: i32, %arg2: memref<32x1024xf32, #tpu.memory_space<vmem>>, %arg3: memref<1024x128xf32, #tpu.memory_space<vmem>>, %arg4: memref<1x128xf32, #tpu.memory_space<vmem>>, %arg5: memref<32x128xf32, #tpu.memory_space<vmem>>) attributes {dimension_semantics = [#tpu.dimension_semantics<parallel>, #tpu.dimension_semantics<parallel>], iteration_bounds = array<i64: 1, 1>, scalar_prefetch = 0 : i64, scratch_operands = 0 : i64, tpu.core_type = #tpu.core_type<tc>, window_params = [{transform_indices = @transform_0, window_bounds = array<i64: 32, 1024>}, {transform_indices = @transform_1, window_bounds = array<i64: 1024, 128>}, {transform_indices = @transform_2, window_bounds = array<i64: 1, 128>}, {transform_indices = @transform_3, window_bounds = array<i64: 32, 128>}]} {
    %c0 = arith.constant 0 : index
    %c0_0 = arith.constant 0 : index
    %0 = vector.load %arg2[%c0, %c0_0] : memref<32x1024xf32, #tpu.memory_space<vmem>>, vector<32x1024xf32>
    %c0_1 = arith.constant 0 : index
    %c0_2 = arith.constant 0 : index
    %1 = vector.load %arg3[%c0_1, %c0_2] : memref<1024x128xf32, #tpu.memory_space<vmem>>, vector<1024x128xf32>
    %cst = arith.constant dense<0.000000e+00> : vector<32x128xf32>
    %2 = tpu.matmul %0, %1, %cst {dimension_numbers = #tpu.dot_dimension_numbers<[1], [0], [0], [1], [0, 0, 1, 1], [], []>} : vector<32x1024xf32>, vector<1024x128xf32>, vector<32x128xf32> -> vector<32x128xf32>
    %c0_3 = arith.constant 0 : index
    %c0_4 = arith.constant 0 : index
    %3 = vector.load %arg4[%c0_3, %c0_4] : memref<1x128xf32, #tpu.memory_space<vmem>>, vector<1x128xf32>
    %4 = vector.broadcast %3 : vector<1x128xf32> to vector<32x128xf32>
    %5 = arith.addf %2, %4 : vector<32x128xf32>
    %cst_5 = arith.constant 0.000000e+00 : f32
    %6 = vector.broadcast %cst_5 : f32 to vector<32x128xf32>
    %7 = arith.maximumf %5, %6 : vector<32x128xf32>
    %c0_6 = arith.constant 0 : index
    %c0_7 = arith.constant 0 : index
    %8 = vector.load %arg5[%c0_6, %c0_7] : memref<32x128xf32, #tpu.memory_space<vmem>>, vector<32x128xf32>
    tpu.vector_store %arg5[%c0_6, %c0_7], %7 {strides = array<i32>} : memref<32x128xf32, #tpu.memory_space<vmem>>, vector<32x128xf32>,
    return
  }
  func.func @transform_0(%arg0: i32, %arg1: i32) -> (i32, i32) {
    %c0_i32 = arith.constant 0 : i32
    %c0_i32_0 = arith.constant 0 : i32
    return %arg0, %c0_i32 : i32, i32
  }
  func.func @transform_1(%arg0: i32, %arg1: i32) -> (i32, i32) {
    %c0_i32 = arith.constant 0 : i32
    %c0_i32_0 = arith.constant 0 : i32
    return %c0_i32, %arg1 : i32, i32
  }
  func.func @transform_2(%arg0: i32, %arg1: i32) -> (i32, i32) {
    %c0_i32 = arith.constant 0 : i32
    %c0_i32_0 = arith.constant 0 : i32
    return %c0_i32, %arg1 : i32, i32
  }
  func.func @transform_3(%arg0: i32, %arg1: i32) -> (i32, i32) {
    %c0_i32 = arith.constant 0 : i32
    return %arg0, %arg1 : i32, i32
  }
}

module attributes {stable_mosaic.version = 11 : i64} {
  func.func @_head_kernel(%arg0: i32, %arg1: memref<8x128xf32, #tpu.memory_space<vmem>>, %arg2: memref<128x128xf32, #tpu.memory_space<vmem>>, %arg3: memref<1x128xf32, #tpu.memory_space<vmem>>, %arg4: memref<128x128xf32, #tpu.memory_space<vmem>>, %arg5: memref<1x128xf32, #tpu.memory_space<vmem>>, %arg6: memref<8x128xf32, #tpu.memory_space<vmem>>) attributes {dimension_semantics = [#tpu.dimension_semantics<parallel>], iteration_bounds = array<i64: 1>, scalar_prefetch = 0 : i64, scratch_operands = 0 : i64, tpu.core_type = #tpu.core_type<tc>, window_params = [{transform_indices = @transform_0, window_bounds = array<i64: 8, 128>}, {pipeline_mode = #tpu.pipeline_mode<synchronous>, transform_indices = @transform_1, window_bounds = array<i64: 128, 128>}, {pipeline_mode = #tpu.pipeline_mode<synchronous>, transform_indices = @transform_2, window_bounds = array<i64: 1, 128>}, {pipeline_mode = #tpu.pipeline_mode<synchronous>, transform_indices = @transform_3, window_bounds = array<i64: 128, 128>}, {pipeline_mode = #tpu.pipeline_mode<synchronous>, transform_indices = @transform_4, window_bounds = array<i64: 1, 128>}, {transform_indices = @transform_5, window_bounds = array<i64: 8, 128>}]} {
    %c0 = arith.constant 0 : index
    %c0_0 = arith.constant 0 : index
    %0 = vector.load %arg1[%c0, %c0_0] : memref<8x128xf32, #tpu.memory_space<vmem>>, vector<8x128xf32>
    %c0_1 = arith.constant 0 : index
    %c0_2 = arith.constant 0 : index
    %1 = vector.load %arg2[%c0_1, %c0_2] : memref<128x128xf32, #tpu.memory_space<vmem>>, vector<128x128xf32>
    %cst = arith.constant dense<0.000000e+00> : vector<8x128xf32>
    %2 = tpu.matmul %0, %1, %cst {dimension_numbers = #tpu.dot_dimension_numbers<[1], [0], [0], [1], [0, 0, 1, 1], [], []>} : vector<8x128xf32>, vector<128x128xf32>, vector<8x128xf32> -> vector<8x128xf32>
    %c0_3 = arith.constant 0 : index
    %c0_4 = arith.constant 0 : index
    %3 = vector.load %arg3[%c0_3, %c0_4] : memref<1x128xf32, #tpu.memory_space<vmem>>, vector<1x128xf32>
    %4 = vector.broadcast %3 : vector<1x128xf32> to vector<8x128xf32>
    %5 = arith.addf %2, %4 : vector<8x128xf32>
    %cst_5 = arith.constant 0.000000e+00 : f32
    %6 = vector.broadcast %cst_5 : f32 to vector<8x128xf32>
    %7 = arith.maximumf %5, %6 : vector<8x128xf32>
    %c0_6 = arith.constant 0 : index
    %c0_7 = arith.constant 0 : index
    %8 = vector.load %arg4[%c0_6, %c0_7] : memref<128x128xf32, #tpu.memory_space<vmem>>, vector<128x128xf32>
    %cst_8 = arith.constant dense<0.000000e+00> : vector<8x128xf32>
    %9 = tpu.matmul %7, %8, %cst_8 {dimension_numbers = #tpu.dot_dimension_numbers<[1], [0], [0], [1], [0, 0, 1, 1], [], []>} : vector<8x128xf32>, vector<128x128xf32>, vector<8x128xf32> -> vector<8x128xf32>
    %c0_9 = arith.constant 0 : index
    %c0_10 = arith.constant 0 : index
    %10 = vector.load %arg5[%c0_9, %c0_10] : memref<1x128xf32, #tpu.memory_space<vmem>>, vector<1x128xf32>
    %11 = vector.broadcast %10 : vector<1x128xf32> to vector<8x128xf32>
    %12 = arith.addf %9, %11 : vector<8x128xf32>
    %c0_11 = arith.constant 0 : index
    %c0_12 = arith.constant 0 : index
    %13 = vector.load %arg6[%c0_11, %c0_12] : memref<8x128xf32, #tpu.memory_space<vmem>>, vector<8x128xf32>
    tpu.vector_store %arg6[%c0_11, %c0_12], %12 {strides = array<i32>} : memref<8x128xf32, #tpu.memory_space<vmem>>, vector<8x128xf32>,
    return
  }
  func.func @transform_0(%arg0: i32) -> (i32, i32) {
    %c0_i32 = arith.constant 0 : i32
    %c0_i32_0 = arith.constant 0 : i32
    return %arg0, %c0_i32 : i32, i32
  }
  func.func @transform_1(%arg0: i32) -> (i32, i32) {
    %c0_i32 = arith.constant 0 : i32
    %c0_i32_0 = arith.constant 0 : i32
    %c0_i32_1 = arith.constant 0 : i32
    return %c0_i32, %c0_i32_0 : i32, i32
  }
  func.func @transform_2(%arg0: i32) -> (i32, i32) {
    %c0_i32 = arith.constant 0 : i32
    %c0_i32_0 = arith.constant 0 : i32
    %c0_i32_1 = arith.constant 0 : i32
    return %c0_i32, %c0_i32_0 : i32, i32
  }
  func.func @transform_3(%arg0: i32) -> (i32, i32) {
    %c0_i32 = arith.constant 0 : i32
    %c0_i32_0 = arith.constant 0 : i32
    %c0_i32_1 = arith.constant 0 : i32
    return %c0_i32, %c0_i32_0 : i32, i32
  }
  func.func @transform_4(%arg0: i32) -> (i32, i32) {
    %c0_i32 = arith.constant 0 : i32
    %c0_i32_0 = arith.constant 0 : i32
    %c0_i32_1 = arith.constant 0 : i32
    return %c0_i32, %c0_i32_0 : i32, i32
  }
  func.func @transform_5(%arg0: i32) -> (i32, i32) {
    %c0_i32 = arith.constant 0 : i32
    %c0_i32_0 = arith.constant 0 : i32
    return %arg0, %c0_i32 : i32, i32
  }
}

</mosaic_0001>

<bundles_post_ra>
// kernel: dqn_cnn_forward.4
= control target key start
LH: loop header
LB: loop body
LE: loop exit
PB: predicated region body
PF: predicated region fallthrough
CT: control target
= control target key end

     0   :  { %s888_s12 = smov 0   ;;  %s890_s13 = smov 0   ;;  %s1190_s0 = inlined_call_operand.vmem [shape: f32[768,256], index: 0, kind: input, shape index: {}]   ;;  %s1191_s1 = inlined_call_operand.vmem [shape: f32[256,128], index: 1, kind: input, shape index: {}]   ;;  %s1192_s2 = inlined_call_operand.vmem [shape: f32[1,128], index: 2, kind: input, shape index: {}]   ;;  %s1193_s3 = inlined_call_operand.vmem [shape: f32[768,128], index: 3, kind: output, shape index: {}]  }
   0x1   :  { %s892_s14 = smov 0  }
   0x2 LB: > { %s25_s15 = sadd.s32 1, %s861_s13  ;;  %p728_p0 = scmp.ge.s32.totalorder %s865_s14, 1  ;;  %s865_s14 = sphi %s892_s14, %s13_s14   ;;  %s861_s13 = sphi %s890_s13, %s1195_s13   ;;  %s857_s12 = sphi %s888_s12, %s1194_s12  }
   0x3   : > { %p27_p1 = scmp.ge.s32.totalorder %s25_s15, 3  ;;  %p170_p2 = scmp.lt.s32.totalorder %s865_s14, 4 }
   0x5   : > { %s1197_s15 = smov (%p27_p1, %s25_s15), 0  ;;  %p171_p3 = pnand %p728_p0, %p170_p2 }
   0x6   : > { %v292_v0 = vld [vmem:[%s1191_s1] sm:$0xff] (!%p171_p3)  ;;  %v293_v1 = vld [vmem:[%s1191_s1 + $0x8] sm:$0xff] (!%p171_p3)  ;;  %v294_v2 = vld [vmem:[%s1191_s1 + $0x10] sm:$0xff] (!%p171_p3)  ;;  %s729_s22 = sshll.u32 (!%p171_p3), %s857_s12, 5  ;;  %v867_v3 = vmov (!%p171_p3), 0.0|0.0  }
   0x7   : > { %174 = sbr.rel (%p171_p3) target bundleno = 349 (0x15d), region = 32  ;;  %738 = vmatprep.subr.bf16.mxu0 (!%p171_p3), %v867_v3  ;;  %786 = vmatprep.subr.bf16.mxu1 (!%p171_p3), %v867_v3  ;;  %v739_v4 = vpack.c.bf16 (!%p171_p3), %v293_v1, %v292_v0  ;;  %v295_v5 = vld [vmem:[%s1191_s1 + $0x18] sm:$0xff] (!%p171_p3)  ;;  %p206_p4 = scmp.lt.s32.totalorder (!%p171_p3), %s729_s22, 95  ;;  %v296_v7 = vld [vmem:[%s1191_s1 + $0x20] sm:$0xff] (!%p171_p3)  ;;  %v297_v8 = vld [vmem:[%s1191_s1 + $0x28] sm:$0xff] (!%p171_p3) }
   0x8   : > { %v742_v6 = vpack.c.bf16 (!%p171_p3), %v295_v5, %v294_v2  ;;  %v745_v9 = vpack.c.bf16 (!%p171_p3), %v297_v8, %v296_v7  ;;  %v298_v10 = vld [vmem:[%s1191_s1 + $0x30] sm:$0xff] (!%p171_p3)  ;;  %v299_v11 = vld [vmem:[%s1191_s1 + $0x38] sm:$0xff] (!%p171_p3)  ;;  %v300_v15 = vld [vmem:[%s1191_s1 + $0x40] sm:$0xff] (!%p171_p3) }
   0x9   : > { %740 = vmatpush1.bf16.msra.mxu0 (!%p171_p3), %v739_v4  ;;  %802 = vmatpush1.bf16.msra.mxu1 (!%p171_p3), %v739_v4  ;;  %v748_v13 = vpack.c.bf16 (!%p171_p3), %v299_v11, %v298_v10  ;;  %v301_v16 = vld [vmem:[%s1191_s1 + $0x48] sm:$0xff] (!%p171_p3)  ;;  %v302_v18 = vld [vmem:[%s1191_s1 + $0x50] sm:$0xff] (!%p171_p3)  ;;  %v303_v19 = vld [vmem:[%s1191_s1 + $0x58] sm:$0xff] (!%p171_p3) }
   0xa   : > { %741 = vmatprep.subr.bf16.mxu0 (!%p171_p3), %v867_v3  ;;  %787 = vmatprep.subr.bf16.mxu1 (!%p171_p3), %v867_v3  ;;  %v751_v17 = vpack.c.bf16 (!%p171_p3), %v301_v16, %v300_v15  ;;  %v754_v20 = vpack.c.bf16 (!%p171_p3), %v303_v19, %v302_v18  ;;  %v304_v21 = vld [vmem:[%s1191_s1 + $0x60] sm:$0xff] (!%p171_p3)  ;;  %v305_v22 = vld [vmem:[%s1191_s1 + $0x68] sm:$0xff] (!%p171_p3)  ;;  %v306_v24 = vld [vmem:[%s1191_s1 + $0x70] sm:$0xff] (!%p171_p3) }
   0xb   : > { %v757_v23 = vpack.c.bf16 (!%p171_p3), %v305_v22, %v304_v21  ;;  %v307_v25 = vld [vmem:[%s1191_s1 + $0x78] sm:$0xff] (!%p171_p3)  ;;  %v308_v27 = vld [vmem:[%s1191_s1 + $0x80] sm:$0xff] (!%p171_p3)  ;;  %v309_v28 = vld [vmem:[%s1191_s1 + $0x88] sm:$0xff] (!%p171_p3) }
   0xc   : > { %v760_v26 = vpack.c.bf16 (!%p171_p3), %v307_v25, %v306_v24  ;;  %v763_v29 = vpack.c.bf16 (!%p171_p3), %v309_v28, %v308_v27  ;;  %v310_v30 = vld [vmem:[%s1191_s1 + $0x90] sm:$0xff] (!%p171_p3)  ;;  %v311_v31 = vld [vmem:[%s1191_s1 + $0x98] sm:$0xff] (!%p171_p3)  ;;  %v312_v33 = vld [vmem:[%s1191_s1 + $0xa0] sm:$0xff] (!%p171_p3) }
   0xd   : > { %743 = vmatpush1.bf16.msra.mxu0 (!%p171_p3), %v742_v6  ;;  %803 = vmatpush1.bf16.msra.mxu1 (!%p171_p3), %v742_v6  ;;  %v766_v32 = vpack.c.bf16 (!%p171_p3), %v311_v31, %v310_v30  ;;  %v313_v34 = vld [vmem:[%s1191_s1 + $0xa8] sm:$0xff] (!%p171_p3)  ;;  %v314_v36 = vld [vmem:[%s1191_s1 + $0xb0] sm:$0xff] (!%p171_p3)  ;;  %v315_v37 = vld [vmem:[%s1191_s1 + $0xb8] sm:$0xff] (!%p171_p3) }
   0xe   : > { %s1199_s22 = smov (!%p206_p4, %s729_s22), 95  ;;  %744 = vmatprep.subr.bf16.mxu0 %v867_v3  ;;  %788 = vmatprep.subr.bf16.mxu1 %v867_v3  ;;  %v769_v35 = vpack.c.bf16 %v313_v34, %v312_v33  ;;  %v772_v38 = vpack.c.bf16 %v315_v37, %v314_v36  ;;  %v316_v39 = vld [vmem:[%s1191_s1 + $0xc0] sm:$0xff]  ;;  %v317_v40 = vld [vmem:[%s1191_s1 + $0xc8] sm:$0xff]  ;;  %v318_v42 = vld [vmem:[%s1191_s1 + $0xd0] sm:$0xff] }
   0xf   : > { %s737_s29 = sshll.u32 %s1199_s22, 4  ;;  %v775_v41 = vpack.c.bf16 %v317_v40, %v316_v39  ;;  %v319_v43 = vld [vmem:[%s1191_s1 + $0xd8] sm:$0xff]  ;;  %v320_v45 = vld [vmem:[%s1191_s1 + $0xe0] sm:$0xff]  ;;  %v321_v46 = vld [vmem:[%s1191_s1 + $0xe8] sm:$0xff]  ;;  %s733_s19 = sshll.u32 %s1199_s22, 3 }
  0x10   : > { %s934_s5 = scalar_lea.vmem %s1190_s0, %s737_s29  ;;  %v778_v44 = vpack.c.bf16 %v319_v43, %v318_v42  ;;  %v781_v47 = vpack.c.bf16 %v321_v46, %v320_v45  ;;  %v322_v48 = vld [vmem:[%s1191_s1 + $0xf0] sm:$0xff]  ;;  %v323_v49 = vld [vmem:[%s1191_s1 + $0xf8] sm:$0xff] }
  0x11   : > { %v229_v12 = vld [vmem:[%s934_s5 + $0x8] sm:$0xff]  ;;  %746 = vmatpush1.bf16.msra.mxu0 %v745_v9  ;;  %804 = vmatpush1.bf16.msra.mxu1 %v745_v9  ;;  %v784_v50 = vpack.c.bf16 %v323_v49, %v322_v48  ;;  %v228_v51 = vld [vmem:[%s934_s5] sm:$0xff]  ;;  %v231_v53 = vld [vmem:[%s934_s5 + $0x18] sm:$0xff] }
  0x12   : > { %v261_v14 = vld [vmem:[%s934_s5 + $0x108] sm:$0xff]  ;;  %747 = vmatprep.subr.bf16.mxu0 %v867_v3  ;;  %789 = vmatprep.subr.bf16.mxu1 %v867_v3  ;;  %v260_v52 = vld [vmem:[%s934_s5 + $0x100] sm:$0xff]  ;;  %v263_v54 = vld [vmem:[%s934_s5 + $0x118] sm:$0xff] }
  0x13   : > { %395 = vmatprep.mubr.f32.mxu0 %v229_v12  ;;  %475 = vmatprep.mubr.f32.mxu1 %v261_v14  ;;  %v230_v55 = vld [vmem:[%s934_s5 + $0x10] sm:$0xff]  ;;  %v233_v57 = vld [vmem:[%s934_s5 + $0x28] sm:$0xff]  ;;  %v232_v59 = vld [vmem:[%s934_s5 + $0x20] sm:$0xff] }
  0x14   : > { %v262_v56 = vld [vmem:[%s934_s5 + $0x110] sm:$0xff]  ;;  %v265_v58 = vld [vmem:[%s934_s5 + $0x128] sm:$0xff]  ;;  %v264_v60 = vld [vmem:[%s934_s5 + $0x120] sm:$0xff] }
  0x15   : > { %749 = vmatpush1.bf16.msra.mxu0 %v748_v13  ;;  %805 = vmatpush1.bf16.msra.mxu1 %v748_v13  ;;  %v235_v61 = vld [vmem:[%s934_s5 + $0x38] sm:$0xff]  ;;  %v234_v63 = vld [vmem:[%s934_s5 + $0x30] sm:$0xff]  ;;  %v237_v1 = vld [vmem:[%s934_s5 + $0x48] sm:$0xff] }
  0x16   : > { %750 = vmatprep.subr.bf16.mxu0 %v867_v3  ;;  %790 = vmatprep.subr.bf16.mxu1 %v867_v3  ;;  %v267_v62 = vld [vmem:[%s934_s5 + $0x138] sm:$0xff]  ;;  %v266_v0 = vld [vmem:[%s934_s5 + $0x130] sm:$0xff]  ;;  %v269_v2 = vld [vmem:[%s934_s5 + $0x148] sm:$0xff] }
  0x17   : > { %v268_v4 = vld [vmem:[%s934_s5 + $0x140] sm:$0xff]  ;;  %v239_v5 = vld [vmem:[%s934_s5 + $0x58] sm:$0xff]  ;;  %v238_v7 = vld [vmem:[%s934_s5 + $0x50] sm:$0xff] }
  0x18   : > { %v271_v6 = vld [vmem:[%s934_s5 + $0x158] sm:$0xff]  ;;  %v270_v8 = vld [vmem:[%s934_s5 + $0x150] sm:$0xff]  ;;  %v241_v9 = vld [vmem:[%s934_s5 + $0x68] sm:$0xff] }
  0x19   : > { %752 = vmatpush1.bf16.msra.mxu0 %v751_v17  ;;  %806 = vmatpush1.bf16.msra.mxu1 %v751_v17  ;;  %v273_v10 = vld [vmem:[%s934_s5 + $0x168] sm:$0xff]  ;;  %v240_v11 = vld [vmem:[%s934_s5 + $0x60] sm:$0xff]  ;;  %v243_v13 = vld [vmem:[%s934_s5 + $0x78] sm:$0xff] }
  0x1a   : > { %753 = vmatprep.subr.bf16.mxu0 %v867_v3  ;;  %791 = vmatprep.subr.bf16.mxu1 %v867_v3  ;;  %v272_v12 = vld [vmem:[%s934_s5 + $0x160] sm:$0xff]  ;;  %v275_v14 = vld [vmem:[%s934_s5 + $0x178] sm:$0xff]  ;;  %v242_v15 = vld [vmem:[%s934_s5 + $0x70] sm:$0xff] }
  0x1b   : > { %v274_v16 = vld [vmem:[%s934_s5 + $0x170] sm:$0xff]  ;;  %v245_v17 = vld [vmem:[%s934_s5 + $0x88] sm:$0xff]  ;;  %v244_v19 = vld [vmem:[%s934_s5 + $0x80] sm:$0xff] }
  0x1c   : > { %v277_v18 = vld [vmem:[%s934_s5 + $0x188] sm:$0xff]  ;;  %v247_v21 = vld [vmem:[%s934_s5 + $0x98] sm:$0xff]  ;;  %v278_v24 = vld [vmem:[%s934_s5 + $0x190] sm:$0xff] }
  0x1d   : > { %755 = vmatpush1.bf16.msra.mxu0 %v754_v20  ;;  %807 = vmatpush1.bf16.msra.mxu1 %v754_v20  ;;  %v276_v20 = vld [vmem:[%s934_s5 + $0x180] sm:$0xff]  ;;  %v279_v22 = vld [vmem:[%s934_s5 + $0x198] sm:$0xff]  ;;  %v249_v25 = vld [vmem:[%s934_s5 + $0xa8] sm:$0xff] }
  0x1e   : > { %756 = vmatprep.subr.bf16.mxu0 %v867_v3  ;;  %792 = vmatprep.subr.bf16.mxu1 %v867_v3  ;;  %v248_v27 = vld [vmem:[%s934_s5 + $0xa0] sm:$0xff]  ;;  %v283_v30 = vld [vmem:[%s934_s5 + $0x1b8] sm:$0xff]  ;;  %v250_v31 = vld [vmem:[%s934_s5 + $0xb0] sm:$0xff] }
  0x1f   : > { %v280_v28 = vld [vmem:[%s934_s5 + $0x1a0] sm:$0xff]  ;;  %v253_v33 = vld [vmem:[%s934_s5 + $0xc8] sm:$0xff]  ;;  %v255_v37 = vld [vmem:[%s934_s5 + $0xd8] sm:$0xff] }
  0x20   : > { %v285_v34 = vld [vmem:[%s934_s5 + $0x1c8] sm:$0xff]  ;;  %v284_v36 = vld [vmem:[%s934_s5 + $0x1c0] sm:$0xff]  ;;  %v254_v39 = vld [vmem:[%s934_s5 + $0xd0] sm:$0xff] }
  0x21   : > { %758 = vmatpush1.bf16.msra.mxu0 %v757_v23  ;;  %808 = vmatpush1.bf16.msra.mxu1 %v757_v23  ;;  %v246_v23 = vld [vmem:[%s934_s5 + $0x90] sm:$0xff]  ;;  %v289_v42 = vld [vmem:[%s934_s5 + $0x1e8] sm:$0xff]  ;;  %v256_v43 = vld [vmem:[%s934_s5 + $0xe0] sm:$0xff] }
  0x22   : > { %759 = vmatprep.subr.bf16.mxu0 %v867_v3  ;;  %793 = vmatprep.subr.bf16.mxu1 %v867_v3  ;;  %v286_v40 = vld [vmem:[%s934_s5 + $0x1d0] sm:$0xff]  ;;  %v259_v45 = vld [vmem:[%s934_s5 + $0xf8] sm:$0xff]  ;;  %v1109_v49 = vld [vmem:[%s1192_s2] ss:$0 sm:$0xff] }
  0x23   : > { %v291_v46 = vld [vmem:[%s934_s5 + $0x1f8] sm:$0xff]  ;;  %v290_v48 = vld [vmem:[%s934_s5 + $0x1f0] sm:$0xff] }
  0x25   : > { %761 = vmatpush1.bf16.msra.mxu0 %v760_v26  ;;  %809 = vmatpush1.bf16.msra.mxu1 %v760_v26  ;;  %v281_v26 = vld [vmem:[%s934_s5 + $0x1a8] sm:$0xff] }
  0x26   : > { %762 = vmatprep.subr.bf16.mxu0 %v867_v3  ;;  %794 = vmatprep.subr.bf16.mxu1 %v867_v3 }
  0x29   : > { %764 = vmatpush1.bf16.msra.mxu0 %v763_v29  ;;  %810 = vmatpush1.bf16.msra.mxu1 %v763_v29  ;;  %v251_v29 = vld [vmem:[%s934_s5 + $0xb8] sm:$0xff] }
  0x2a   : > { %765 = vmatprep.subr.bf16.mxu0 %v867_v3  ;;  %795 = vmatprep.subr.bf16.mxu1 %v867_v3 }
  0x2d   : > { %767 = vmatpush1.bf16.msra.mxu0 %v766_v32  ;;  %811 = vmatpush1.bf16.msra.mxu1 %v766_v32  ;;  %v282_v32 = vld [vmem:[%s934_s5 + $0x1b0] sm:$0xff] }
  0x2e   : > { %768 = vmatprep.subr.bf16.mxu0 %v867_v3  ;;  %796 = vmatprep.subr.bf16.mxu1 %v867_v3 }
  0x31   : > { %770 = vmatpush1.bf16.msra.mxu0 %v769_v35  ;;  %812 = vmatpush1.bf16.msra.mxu1 %v769_v35  ;;  %v252_v35 = vld [vmem:[%s934_s5 + $0xc0] sm:$0xff] }
  0x32   : > { %771 = vmatprep.subr.bf16.mxu0 %v867_v3  ;;  %797 = vmatprep.subr.bf16.mxu1 %v867_v3 }
  0x35   : > { %773 = vmatpush1.bf16.msra.mxu0 %v772_v38  ;;  %813 = vmatpush1.bf16.msra.mxu1 %v772_v38  ;;  %v287_v38 = vld [vmem:[%s934_s5 + $0x1d8] sm:$0xff] }
  0x36   : > { %774 = vmatprep.subr.bf16.mxu0 %v867_v3  ;;  %798 = vmatprep.subr.bf16.mxu1 %v867_v3 }
  0x39   : > { %776 = vmatpush1.bf16.msra.mxu0 %v775_v41  ;;  %814 = vmatpush1.bf16.msra.mxu1 %v775_v41  ;;  %v257_v41 = vld [vmem:[%s934_s5 + $0xe8] sm:$0xff] }
  0x3a   : > { %777 = vmatprep.subr.bf16.mxu0 %v867_v3  ;;  %799 = vmatprep.subr.bf16.mxu1 %v867_v3 }
  0x3d   : > { %779 = vmatpush1.bf16.msra.mxu0 %v778_v44  ;;  %815 = vmatpush1.bf16.msra.mxu1 %v778_v44  ;;  %v288_v44 = vld [vmem:[%s934_s5 + $0x1e0] sm:$0xff] }
  0x3e   : > { %780 = vmatprep.subr.bf16.mxu0 %v867_v3  ;;  %800 = vmatprep.subr.bf16.mxu1 %v867_v3 }
  0x41   : > { %782 = vmatpush1.bf16.msra.mxu0 %v781_v47  ;;  %816 = vmatpush1.bf16.msra.mxu1 %v781_v47  ;;  %v258_v47 = vld [vmem:[%s934_s5 + $0xf0] sm:$0xff] }
  0x42   : > { %783 = vmatprep.subr.bf16.mxu0 %v867_v3  ;;  %801 = vmatprep.subr.bf16.mxu1 %v867_v3  ;;  %v236_v3 = vld [vmem:[%s934_s5 + $0x40] sm:$0xff]  ;;  %s1117_s5 = scalar_lea.vmem %s1193_s3, %s733_s19 }
  0x45   : > { %785 = vmatpush1.bf16.msra.mxu0 %v784_v50  ;;  %817 = vmatpush1.bf16.msra.mxu1 %v784_v50 }
  0x48   : > { %396 = vmatmul.mubr.f32.vlgmr.msra.gmra.mrb[0].mxu0 %v228_v51  ;;  %476 = vmatmul.mubr.f32.vlgmr.msra.gmra.mrb[0].mxu1 %v260_v52 }
  0x49   : > { %400 = vmatprep.mubr.f32.mxu0 %v231_v53  ;;  %480 = vmatprep.mubr.f32.mxu1 %v263_v54 }
  0x4c   : > { %401 = vmatmul.mubr.f32.gmra.mrb[2].mxu0 %v230_v55  ;;  %481 = vmatmul.mubr.f32.gmra.mrb[2].mxu1 %v262_v56 }
  0x4d   : > { %405 = vmatprep.mubr.f32.mxu0 %v233_v57  ;;  %485 = vmatprep.mubr.f32.mxu1 %v265_v58 }
  0x50   : > { %406 = vmatmul.mubr.f32.gmra.mrb[4].mxu0 %v232_v59  ;;  %486 = vmatmul.mubr.f32.gmra.mrb[4].mxu1 %v264_v60 }
  0x51   : > { %410 = vmatprep.mubr.f32.mxu0 %v235_v61  ;;  %490 = vmatprep.mubr.f32.mxu1 %v267_v62 }
  0x54   : > { %411 = vmatmul.mubr.f32.gmra.mrb[6].mxu0 %v234_v63  ;;  %491 = vmatmul.mubr.f32.gmra.mrb[6].mxu1 %v266_v0 }
  0x55   : > { %415 = vmatprep.mubr.f32.mxu0 %v237_v1  ;;  %495 = vmatprep.mubr.f32.mxu1 %v269_v2 }
  0x58   : > { %416 = vmatmul.mubr.f32.gmra.mrb[8].mxu0 %v236_v3  ;;  %496 = vmatmul.mubr.f32.gmra.mrb[8].mxu1 %v268_v4 }
  0x59   : > { %420 = vmatprep.mubr.f32.mxu0 %v239_v5  ;;  %500 = vmatprep.mubr.f32.mxu1 %v271_v6 }
  0x5c   : > { %421 = vmatmul.mubr.f32.gmra.mrb[10].mxu0 %v238_v7  ;;  %501 = vmatmul.mubr.f32.gmra.mrb[10].mxu1 %v270_v8 }
  0x5d   : > { %425 = vmatprep.mubr.f32.mxu0 %v241_v9  ;;  %505 = vmatprep.mubr.f32.mxu1 %v273_v10 }
  0x60   : > { %426 = vmatmul.mubr.f32.gmra.mrb[12].mxu0 %v240_v11  ;;  %506 = vmatmul.mubr.f32.gmra.mrb[12].mxu1 %v272_v12 }
  0x61   : > { %430 = vmatprep.mubr.f32.mxu0 %v243_v13  ;;  %510 = vmatprep.mubr.f32.mxu1 %v275_v14 }
  0x64   : > { %431 = vmatmul.mubr.f32.gmra.mrb[14].mxu0 %v242_v15  ;;  %511 = vmatmul.mubr.f32.gmra.mrb[14].mxu1 %v274_v16 }
  0x65   : > { %435 = vmatprep.mubr.f32.mxu0 %v245_v17  ;;  %515 = vmatprep.mubr.f32.mxu1 %v277_v18 }
  0x68   : > { %436 = vmatmul.mubr.f32.gmra.mrb[16].mxu0 %v244_v19  ;;  %516 = vmatmul.mubr.f32.gmra.mrb[16].mxu1 %v276_v20 }
  0x69   : > { %440 = vmatprep.mubr.f32.mxu0 %v247_v21  ;;  %520 = vmatprep.mubr.f32.mxu1 %v279_v22 }
  0x6c   : > { %441 = vmatmul.mubr.f32.gmra.mrb[18].mxu0 %v246_v23  ;;  %521 = vmatmul.mubr.f32.gmra.mrb[18].mxu1 %v278_v24 }
  0x6d   : > { %445 = vmatprep.mubr.f32.mxu0 %v249_v25  ;;  %525 = vmatprep.mubr.f32.mxu1 %v281_v26 }
  0x70   : > { %446 = vmatmul.mubr.f32.gmra.mrb[20].mxu0 %v248_v27  ;;  %526 = vmatmul.mubr.f32.gmra.mrb[20].mxu1 %v280_v28 }
  0x71   : > { %450 = vmatprep.mubr.f32.mxu0 %v251_v29  ;;  %530 = vmatprep.mubr.f32.mxu1 %v283_v30 }
  0x74   : > { %451 = vmatmul.mubr.f32.gmra.mrb[22].mxu0 %v250_v31  ;;  %531 = vmatmul.mubr.f32.gmra.mrb[22].mxu1 %v282_v32 }
  0x75   : > { %455 = vmatprep.mubr.f32.mxu0 %v253_v33  ;;  %535 = vmatprep.mubr.f32.mxu1 %v285_v34 }
  0x78   : > { %456 = vmatmul.mubr.f32.gmra.mrb[24].mxu0 %v252_v35  ;;  %536 = vmatmul.mubr.f32.gmra.mrb[24].mxu1 %v284_v36 }
  0x79   : > { %460 = vmatprep.mubr.f32.mxu0 %v255_v37  ;;  %540 = vmatprep.mubr.f32.mxu1 %v287_v38 }
  0x7c   : > { %461 = vmatmul.mubr.f32.gmra.mrb[26].mxu0 %v254_v39  ;;  %541 = vmatmul.mubr.f32.gmra.mrb[26].mxu1 %v286_v40 }
  0x7d   : > { %465 = vmatprep.mubr.f32.mxu0 %v257_v41  ;;  %545 = vmatprep.mubr.f32.mxu1 %v289_v42 }
  0x80   : > { %466 = vmatmul.mubr.f32.gmra.mrb[28].mxu0 %v256_v43  ;;  %546 = vmatmul.mubr.f32.gmra.mrb[28].mxu1 %v288_v44 }
  0x81   : > { %470 = vmatprep.mubr.f32.mxu0 %v259_v45  ;;  %550 = vmatprep.mubr.f32.mxu1 %v291_v46 }
  0x84   : > { %471 = vmatmul.mubr.f32.gmra.mrb[30].mxu0 %v258_v47  ;;  %551 = vmatmul.mubr.f32.gmra.mrb[30].mxu1 %v290_v48 }
 0x11b   : > { %v397_v50 = vpop.f32.mrb[0].mxu0  ;;  %v477_v51 = vpop.f32.mrb[0].mxu1 }
 0x11c   : > { %v398_v52 = vadd.f32 %v1109_v49, %v397_v50  ;;  %v478_v53 = vadd.f32 %v1109_v49, %v477_v51  ;;  %v399_v54 = vpop.f32.mrb[1].mxu0  ;;  %v479_v55 = vpop.f32.mrb[1].mxu1 }
 0x11e   : > { %v556_v56 = vmax.f32 %v398_v52, 0.0  ;;  %v572_v57 = vmax.f32 %v478_v53, 0.0 }
 0x11f   : > { %v402_v58 = vpop.f32.mrb[2].mxu0  ;;  %v482_v59 = vpop.f32.mrb[2].mxu1 }
 0x120   : > { %588 = vst [vmem:[%s1117_s5] sm:$0xff] %v556_v56  ;;  %604 = vst [vmem:[%s1117_s5 + $0x80] sm:$0xff] %v572_v57  ;;  %v403_v60 = vadd.f32 %v1109_v49, %v402_v58  ;;  %v483_v61 = vadd.f32 %v1109_v49, %v482_v59  ;;  %v404_v62 = vpop.f32.mrb[3].mxu0  ;;  %v484_v63 = vpop.f32.mrb[3].mxu1 }
 0x122   : > { %v557_v0 = vmax.f32 %v403_v60, 0.0  ;;  %v573_v1 = vmax.f32 %v483_v61, 0.0 }
 0x123   : > { %v407_v2 = vpop.f32.mrb[4].mxu0  ;;  %v487_v3 = vpop.f32.mrb[4].mxu1 }
 0x124   : > { %589 = vst [vmem:[%s1117_s5 + $0x8] sm:$0xff] %v557_v0  ;;  %605 = vst [vmem:[%s1117_s5 + $0x88] sm:$0xff] %v573_v1  ;;  %v408_v4 = vadd.f32 %v1109_v49, %v407_v2  ;;  %v488_v5 = vadd.f32 %v1109_v49, %v487_v3  ;;  %v409_v6 = vpop.f32.mrb[5].mxu0  ;;  %v489_v7 = vpop.f32.mrb[5].mxu1 }
 0x126   : > { %v558_v8 = vmax.f32 %v408_v4, 0.0  ;;  %v574_v9 = vmax.f32 %v488_v5, 0.0 }
 0x127   : > { %v412_v10 = vpop.f32.mrb[6].mxu0  ;;  %v492_v11 = vpop.f32.mrb[6].mxu1 }
 0x128   : > { %590 = vst [vmem:[%s1117_s5 + $0x10] sm:$0xff] %v558_v8  ;;  %606 = vst [vmem:[%s1117_s5 + $0x90] sm:$0xff] %v574_v9  ;;  %v413_v12 = vadd.f32 %v1109_v49, %v412_v10  ;;  %v493_v13 = vadd.f32 %v1109_v49, %v492_v11  ;;  %v414_v14 = vpop.f32.mrb[7].mxu0  ;;  %v494_v15 = vpop.f32.mrb[7].mxu1 }
 0x12a   : > { %v559_v16 = vmax.f32 %v413_v12, 0.0  ;;  %v575_v17 = vmax.f32 %v493_v13, 0.0 }
 0x12b   : > { %v417_v18 = vpop.f32.mrb[8].mxu0  ;;  %v497_v19 = vpop.f32.mrb[8].mxu1 }
 0x12c   : > { %591 = vst [vmem:[%s1117_s5 + $0x18] sm:$0xff] %v559_v16  ;;  %607 = vst [vmem:[%s1117_s5 + $0x98] sm:$0xff] %v575_v17  ;;  %v418_v20 = vadd.f32 %v1109_v49, %v417_v18  ;;  %v498_v21 = vadd.f32 %v1109_v49, %v497_v19  ;;  %v419_v22 = vpop.f32.mrb[9].mxu0  ;;  %v499_v23 = vpop.f32.mrb[9].mxu1 }
 0x12e   : > { %v560_v24 = vmax.f32 %v418_v20, 0.0  ;;  %v576_v25 = vmax.f32 %v498_v21, 0.0 }
 0x12f   : > { %v422_v26 = vpop.f32.mrb[10].mxu0  ;;  %v502_v27 = vpop.f32.mrb[10].mxu1 }
 0x130   : > { %592 = vst [vmem:[%s1117_s5 + $0x20] sm:$0xff] %v560_v24  ;;  %608 = vst [vmem:[%s1117_s5 + $0xa0] sm:$0xff] %v576_v25  ;;  %v423_v28 = vadd.f32 %v1109_v49, %v422_v26  ;;  %v503_v29 = vadd.f32 %v1109_v49, %v502_v27  ;;  %v424_v30 = vpop.f32.mrb[11].mxu0  ;;  %v504_v31 = vpop.f32.mrb[11].mxu1 }
 0x132   : > { %v561_v32 = vmax.f32 %v423_v28, 0.0  ;;  %v577_v33 = vmax.f32 %v503_v29, 0.0 }
 0x133   : > { %v427_v34 = vpop.f32.mrb[12].mxu0  ;;  %v507_v35 = vpop.f32.mrb[12].mxu1 }
 0x134   : > { %593 = vst [vmem:[%s1117_s5 + $0x28] sm:$0xff] %v561_v32  ;;  %609 = vst [vmem:[%s1117_s5 + $0xa8] sm:$0xff] %v577_v33  ;;  %v428_v36 = vadd.f32 %v1109_v49, %v427_v34  ;;  %v508_v37 = vadd.f32 %v1109_v49, %v507_v35  ;;  %v429_v38 = vpop.f32.mrb[13].mxu0  ;;  %v509_v39 = vpop.f32.mrb[13].mxu1 }
 0x136   : > { %v562_v40 = vmax.f32 %v428_v36, 0.0  ;;  %v578_v41 = vmax.f32 %v508_v37, 0.0 }
 0x137   : > { %v432_v42 = vpop.f32.mrb[14].mxu0  ;;  %v512_v43 = vpop.f32.mrb[14].mxu1 }
 0x138   : > { %594 = vst [vmem:[%s1117_s5 + $0x30] sm:$0xff] %v562_v40  ;;  %610 = vst [vmem:[%s1117_s5 + $0xb0] sm:$0xff] %v578_v41  ;;  %v433_v44 = vadd.f32 %v1109_v49, %v432_v42  ;;  %v513_v45 = vadd.f32 %v1109_v49, %v512_v43  ;;  %v434_v46 = vpop.f32.mrb[15].mxu0  ;;  %v514_v47 = vpop.f32.mrb[15].mxu1 }
 0x13a   : > { %v563_v48 = vmax.f32 %v433_v44, 0.0  ;;  %v579_v50 = vmax.f32 %v513_v45, 0.0 }
 0x13b   : > { %v437_v51 = vpop.f32.mrb[16].mxu0  ;;  %v517_v52 = vpop.f32.mrb[16].mxu1 }
 0x13c   : > { %595 = vst [vmem:[%s1117_s5 + $0x38] sm:$0xff] %v563_v48  ;;  %611 = vst [vmem:[%s1117_s5 + $0xb8] sm:$0xff] %v579_v50  ;;  %v438_v53 = vadd.f32 %v1109_v49, %v437_v51  ;;  %v518_v54 = vadd.f32 %v1109_v49, %v517_v52  ;;  %v439_v55 = vpop.f32.mrb[17].mxu0  ;;  %v519_v56 = vpop.f32.mrb[17].mxu1 }
 0x13e   : > { %v564_v57 = vmax.f32 %v438_v53, 0.0  ;;  %v580_v58 = vmax.f32 %v518_v54, 0.0 }
 0x13f   : > { %v442_v59 = vpop.f32.mrb[18].mxu0  ;;  %v522_v60 = vpop.f32.mrb[18].mxu1 }
 0x140   : > { %596 = vst [vmem:[%s1117_s5 + $0x40] sm:$0xff] %v564_v57  ;;  %612 = vst [vmem:[%s1117_s5 + $0xc0] sm:$0xff] %v580_v58  ;;  %v443_v61 = vadd.f32 %v1109_v49, %v442_v59  ;;  %v523_v62 = vadd.f32 %v1109_v49, %v522_v60  ;;  %v444_v63 = vpop.f32.mrb[19].mxu0  ;;  %v524_v0 = vpop.f32.mrb[19].mxu1 }
 0x142   : > { %v565_v1 = vmax.f32 %v443_v61, 0.0  ;;  %v581_v2 = vmax.f32 %v523_v62, 0.0 }
 0x143   : > { %v447_v3 = vpop.f32.mrb[20].mxu0  ;;  %v527_v4 = vpop.f32.mrb[20].mxu1 }
 0x144   : > { %597 = vst [vmem:[%s1117_s5 + $0x48] sm:$0xff] %v565_v1  ;;  %613 = vst [vmem:[%s1117_s5 + $0xc8] sm:$0xff] %v581_v2  ;;  %v448_v5 = vadd.f32 %v1109_v49, %v447_v3  ;;  %v528_v6 = vadd.f32 %v1109_v49, %v527_v4  ;;  %v449_v7 = vpop.f32.mrb[21].mxu0  ;;  %v529_v8 = vpop.f32.mrb[21].mxu1 }
 0x146   : > { %v566_v9 = vmax.f32 %v448_v5, 0.0  ;;  %v582_v10 = vmax.f32 %v528_v6, 0.0 }
 0x147   : > { %v452_v11 = vpop.f32.mrb[22].mxu0  ;;  %v532_v12 = vpop.f32.mrb[22].mxu1 }
 0x148   : > { %598 = vst [vmem:[%s1117_s5 + $0x50] sm:$0xff] %v566_v9  ;;  %614 = vst [vmem:[%s1117_s5 + $0xd0] sm:$0xff] %v582_v10  ;;  %v453_v13 = vadd.f32 %v1109_v49, %v452_v11  ;;  %v533_v14 = vadd.f32 %v1109_v49, %v532_v12  ;;  %v454_v15 = vpop.f32.mrb[23].mxu0  ;;  %v534_v16 = vpop.f32.mrb[23].mxu1 }
 0x14a   : > { %v567_v17 = vmax.f32 %v453_v13, 0.0  ;;  %v583_v18 = vmax.f32 %v533_v14, 0.0 }
 0x14b   : > { %v457_v19 = vpop.f32.mrb[24].mxu0  ;;  %v537_v20 = vpop.f32.mrb[24].mxu1 }
 0x14c   : > { %599 = vst [vmem:[%s1117_s5 + $0x58] sm:$0xff] %v567_v17  ;;  %615 = vst [vmem:[%s1117_s5 + $0xd8] sm:$0xff] %v583_v18  ;;  %v458_v21 = vadd.f32 %v1109_v49, %v457_v19  ;;  %v538_v22 = vadd.f32 %v1109_v49, %v537_v20  ;;  %v459_v23 = vpop.f32.mrb[25].mxu0  ;;  %v539_v24 = vpop.f32.mrb[25].mxu1 }
 0x14e   : > { %v568_v25 = vmax.f32 %v458_v21, 0.0  ;;  %v584_v26 = vmax.f32 %v538_v22, 0.0 }
 0x14f   : > { %v462_v27 = vpop.f32.mrb[26].mxu0  ;;  %v542_v28 = vpop.f32.mrb[26].mxu1 }
 0x150   : > { %600 = vst [vmem:[%s1117_s5 + $0x60] sm:$0xff] %v568_v25  ;;  %616 = vst [vmem:[%s1117_s5 + $0xe0] sm:$0xff] %v584_v26  ;;  %v463_v29 = vadd.f32 %v1109_v49, %v462_v27  ;;  %v543_v30 = vadd.f32 %v1109_v49, %v542_v28  ;;  %v464_v31 = vpop.f32.mrb[27].mxu0  ;;  %v544_v32 = vpop.f32.mrb[27].mxu1 }
 0x152   : > { %v569_v33 = vmax.f32 %v463_v29, 0.0  ;;  %v585_v34 = vmax.f32 %v543_v30, 0.0 }
 0x153   : > { %v467_v35 = vpop.f32.mrb[28].mxu0  ;;  %v547_v36 = vpop.f32.mrb[28].mxu1 }
 0x154   : > { %601 = vst [vmem:[%s1117_s5 + $0x68] sm:$0xff] %v569_v33  ;;  %617 = vst [vmem:[%s1117_s5 + $0xe8] sm:$0xff] %v585_v34  ;;  %v468_v37 = vadd.f32 %v1109_v49, %v467_v35  ;;  %v548_v38 = vadd.f32 %v1109_v49, %v547_v36  ;;  %v469_v39 = vpop.f32.mrb[29].mxu0  ;;  %v549_v40 = vpop.f32.mrb[29].mxu1 }
 0x156   : > { %v570_v41 = vmax.f32 %v468_v37, 0.0  ;;  %v586_v42 = vmax.f32 %v548_v38, 0.0 }
 0x157   : > { %v472_v43 = vpop.f32.mrb[30].mxu0  ;;  %v552_v44 = vpop.f32.mrb[30].mxu1 }
 0x158   : > { %602 = vst [vmem:[%s1117_s5 + $0x70] sm:$0xff] %v570_v41  ;;  %618 = vst [vmem:[%s1117_s5 + $0xf0] sm:$0xff] %v586_v42  ;;  %v473_v45 = vadd.f32 %v1109_v49, %v472_v43  ;;  %v553_v46 = vadd.f32 %v1109_v49, %v552_v44  ;;  %v474_v47 = vpop.f32.mrb[31].mxu0  ;;  %v554_v48 = vpop.f32.mrb[31].mxu1 }
 0x15a   : > { %v571_v50 = vmax.f32 %v473_v45, 0.0  ;;  %v587_v51 = vmax.f32 %v553_v46, 0.0 }
 0x15c   : > { %603 = vst [vmem:[%s1117_s5 + $0x78] sm:$0xff] %v571_v50  ;;  %619 = vst [vmem:[%s1117_s5 + $0xf8] sm:$0xff] %v587_v51 }
 0x15d PF: > { %s13_s14 = sadd.s32 1, %s865_s14   ;;  %s1194_s12 = smov %s861_s13 }
 0x15e   : > { %p10_p5 = scmp.ge.s32.totalorder %s13_s14, 5   ;;  %s1195_s13 = smov %s1197_s15 }
 0x160   :  { %12 = sbr.rel (!%p10_p5) target bundleno = 2 (0x2), region = 68 }

// kernel: dqn_cnn_forward.5
= control target key start
LH: loop header
LB: loop body
LE: loop exit
PB: predicated region body
PF: predicated region fallthrough
CT: control target
= control target key end

     0   :  { %vm1519_vm0 = vmmov 0   ;;  %s2470_s1 = inlined_call_operand.vmem [shape: f32[1152,128], index: 1, kind: input, shape index: {}]   ;;  %s2471_s0 = inlined_call_operand.vmem [shape: f32[104,1152], index: 0, kind: input, shape index: {}]   ;;  %s2472_s2 = inlined_call_operand.vmem [shape: f32[1,128], index: 2, kind: input, shape index: {}]   ;;  %s2473_s3 = inlined_call_operand.vmem [shape: f32[104,128], index: 3, kind: output, shape index: {}]  }
   0x1   :  { %v147_v0 = vld [vmem:[%s2470_s1 + $0x80] sm:$0xff]  ;;  %v148_v1 = vld [vmem:[%s2470_s1 + $0x88] sm:$0xff]  ;;  %v149_v11 = vld [vmem:[%s2470_s1 + $0x90] sm:$0xff] }
   0x2   :  { %v179_v2 = vld [vmem:[%s2470_s1 + $0x180] sm:$0xff]  ;;  %v1347_v3 = vpack.c.bf16 %v148_v1, %v147_v0  ;;  %v180_v4 = vld [vmem:[%s2470_s1 + $0x188] sm:$0xff]  ;;  %v150_v13 = vld [vmem:[%s2470_s1 + $0x98] sm:$0xff] }
   0x3   :  { %v131_v5 = vld [vmem:[%s2470_s1] sm:$0xff]  ;;  %v132_v6 = vld [vmem:[%s2470_s1 + $0x8] sm:$0xff]  ;;  %v1379_v7 = vpack.c.bf16 %v180_v4, %v179_v2  ;;  %v181_v14 = vld [vmem:[%s2470_s1 + $0x190] sm:$0xff]  ;;  %v1351_v16 = vpack.c.bf16 %v150_v13, %v149_v11 }
   0x4   :  { %v1349_v8 = vpack.c.bf16 %v132_v6, %v131_v5  ;;  %v163_v9 = vld [vmem:[%s2470_s1 + $0x100] sm:$0xff]  ;;  %v164_v10 = vld [vmem:[%s2470_s1 + $0x108] sm:$0xff]  ;;  %1348 = vmatprep.subr.bf16.mxu0 %v1347_v3  ;;  %v182_v15 = vld [vmem:[%s2470_s1 + $0x198] sm:$0xff] }
   0x5   :  { %v1381_v12 = vpack.c.bf16 %v164_v10, %v163_v9  ;;  %1380 = vmatprep.subr.bf16.mxu1 %v1379_v7  ;;  %v1383_v17 = vpack.c.bf16 %v182_v15, %v181_v14  ;;  %v133_v18 = vld [vmem:[%s2470_s1 + $0x10] sm:$0xff]  ;;  %v134_v19 = vld [vmem:[%s2470_s1 + $0x18] sm:$0xff]  ;;  %v151_v23 = vld [vmem:[%s2470_s1 + $0xa0] sm:$0xff] }
   0x6   :  { %1350 = vmatpush3.bf16.msra.mxu0 %v1349_v8  ;;  %v165_v20 = vld [vmem:[%s2470_s1 + $0x110] sm:$0xff]  ;;  %v1353_v21 = vpack.c.bf16 %v134_v19, %v133_v18  ;;  %v166_v22 = vld [vmem:[%s2470_s1 + $0x118] sm:$0xff]  ;;  %v152_v24 = vld [vmem:[%s2470_s1 + $0xa8] sm:$0xff] }
   0x7   :  { %1382 = vmatpush3.bf16.msra.mxu1 %v1381_v12  ;;  %1352 = vmatprep.subr.bf16.mxu0 %v1351_v16  ;;  %v1385_v25 = vpack.c.bf16 %v166_v22, %v165_v20  ;;  %v1355_v26 = vpack.c.bf16 %v152_v24, %v151_v23  ;;  %v183_v27 = vld [vmem:[%s2470_s1 + $0x1a0] sm:$0xff]  ;;  %v184_v28 = vld [vmem:[%s2470_s1 + $0x1a8] sm:$0xff]  ;;  %v153_v35 = vld [vmem:[%s2470_s1 + $0xb0] sm:$0xff] }
   0x8   :  { %1384 = vmatprep.subr.bf16.mxu1 %v1383_v17  ;;  %v135_v29 = vld [vmem:[%s2470_s1 + $0x20] sm:$0xff]  ;;  %v1387_v30 = vpack.c.bf16 %v184_v28, %v183_v27  ;;  %v136_v31 = vld [vmem:[%s2470_s1 + $0x28] sm:$0xff]  ;;  %v154_v36 = vld [vmem:[%s2470_s1 + $0xb8] sm:$0xff] }
   0x9   :  { %v167_v32 = vld [vmem:[%s2470_s1 + $0x120] sm:$0xff]  ;;  %v168_v33 = vld [vmem:[%s2470_s1 + $0x128] sm:$0xff]  ;;  %v1357_v34 = vpack.c.bf16 %v136_v31, %v135_v29  ;;  %v185_v37 = vld [vmem:[%s2470_s1 + $0x1b0] sm:$0xff]  ;;  %v1359_v39 = vpack.c.bf16 %v154_v36, %v153_v35 }
   0xa   :  { %1354 = vmatpush3.bf16.msra.mxu0 %v1353_v21  ;;  %v1389_v38 = vpack.c.bf16 %v168_v33, %v167_v32  ;;  %v186_v40 = vld [vmem:[%s2470_s1 + $0x1b8] sm:$0xff]  ;;  %v137_v41 = vld [vmem:[%s2470_s1 + $0x30] sm:$0xff]  ;;  %v155_v46 = vld [vmem:[%s2470_s1 + $0xc0] sm:$0xff] }
   0xb   :  { %1386 = vmatpush3.bf16.msra.mxu1 %v1385_v25  ;;  %1356 = vmatprep.subr.bf16.mxu0 %v1355_v26  ;;  %v138_v42 = vld [vmem:[%s2470_s1 + $0x38] sm:$0xff]  ;;  %v1391_v43 = vpack.c.bf16 %v186_v40, %v185_v37  ;;  %v169_v44 = vld [vmem:[%s2470_s1 + $0x130] sm:$0xff]  ;;  %v156_v47 = vld [vmem:[%s2470_s1 + $0xc8] sm:$0xff] }
   0xc   :  { %1388 = vmatprep.subr.bf16.mxu1 %v1387_v30  ;;  %v170_v45 = vld [vmem:[%s2470_s1 + $0x138] sm:$0xff]  ;;  %v187_v48 = vld [vmem:[%s2470_s1 + $0x1c0] sm:$0xff]  ;;  %v188_v49 = vld [vmem:[%s2470_s1 + $0x1c8] sm:$0xff]  ;;  %v1361_v50 = vpack.c.bf16 %v138_v42, %v137_v41  ;;  %v1363_v52 = vpack.c.bf16 %v156_v47, %v155_v46 }
   0xd   :  { %v1393_v51 = vpack.c.bf16 %v170_v45, %v169_v44  ;;  %v139_v53 = vld [vmem:[%s2470_s1 + $0x40] sm:$0xff]  ;;  %v140_v54 = vld [vmem:[%s2470_s1 + $0x48] sm:$0xff]  ;;  %v1395_v56 = vpack.c.bf16 %v188_v49, %v187_v48  ;;  %v157_v58 = vld [vmem:[%s2470_s1 + $0xd0] sm:$0xff] }
   0xe   :  { %1358 = vmatpush3.bf16.msra.mxu0 %v1357_v34  ;;  %v171_v55 = vld [vmem:[%s2470_s1 + $0x140] sm:$0xff]  ;;  %v172_v57 = vld [vmem:[%s2470_s1 + $0x148] sm:$0xff]  ;;  %v158_v59 = vld [vmem:[%s2470_s1 + $0xd8] sm:$0xff]  ;;  %v1365_v62 = vpack.c.bf16 %v140_v54, %v139_v53 }
   0xf   :  { %1390 = vmatpush3.bf16.msra.mxu1 %v1389_v38  ;;  %1360 = vmatprep.subr.bf16.mxu0 %v1359_v39  ;;  %v189_v60 = vld [vmem:[%s2470_s1 + $0x1d0] sm:$0xff]  ;;  %v190_v61 = vld [vmem:[%s2470_s1 + $0x1d8] sm:$0xff]  ;;  %v1397_v63 = vpack.c.bf16 %v172_v57, %v171_v55  ;;  %v1367_v0 = vpack.c.bf16 %v158_v59, %v157_v58  ;;  %v159_v6 = vld [vmem:[%s2470_s1 + $0xe0] sm:$0xff] }
  0x10   :  { %1392 = vmatprep.subr.bf16.mxu1 %v1391_v43  ;;  %v141_v1 = vld [vmem:[%s2470_s1 + $0x50] sm:$0xff]  ;;  %v142_v2 = vld [vmem:[%s2470_s1 + $0x58] sm:$0xff]  ;;  %v1399_v4 = vpack.c.bf16 %v190_v61, %v189_v60  ;;  %v160_v7 = vld [vmem:[%s2470_s1 + $0xe8] sm:$0xff] }
  0x11   :  { %v173_v3 = vld [vmem:[%s2470_s1 + $0x150] sm:$0xff]  ;;  %v174_v5 = vld [vmem:[%s2470_s1 + $0x158] sm:$0xff]  ;;  %v191_v8 = vld [vmem:[%s2470_s1 + $0x1e0] sm:$0xff]  ;;  %v1369_v10 = vpack.c.bf16 %v142_v2, %v141_v1  ;;  %v1371_v14 = vpack.c.bf16 %v160_v7, %v159_v6 }
  0x12   :  { %1362 = vmatpush3.bf16.msra.mxu0 %v1361_v50  ;;  %v192_v9 = vld [vmem:[%s2470_s1 + $0x1e8] sm:$0xff]  ;;  %v143_v11 = vld [vmem:[%s2470_s1 + $0x60] sm:$0xff]  ;;  %v1401_v13 = vpack.c.bf16 %v174_v5, %v173_v3  ;;  %v17_v17 = vld [vmem:[%s2471_s0 + $0x18] sm:$0xff] }
  0x13   :  { %1394 = vmatpush3.bf16.msra.mxu1 %v1393_v51  ;;  %1364 = vmatprep.subr.bf16.mxu0 %v1363_v52  ;;  %v144_v12 = vld [vmem:[%s2470_s1 + $0x68] sm:$0xff]  ;;  %v175_v15 = vld [vmem:[%s2470_s1 + $0x160] sm:$0xff]  ;;  %v1403_v18 = vpack.c.bf16 %v192_v9, %v191_v8  ;;  %v161_v20 = vld [vmem:[%s2470_s1 + $0xf0] sm:$0xff] }
  0x14   :  { %1396 = vmatprep.subr.bf16.mxu1 %v1395_v56  ;;  %v15_v16 = vld [vmem:[%s2471_s0 + $0x8] sm:$0xff]  ;;  %v162_v21 = vld [vmem:[%s2470_s1 + $0xf8] sm:$0xff]  ;;  %v193_v22 = vld [vmem:[%s2470_s1 + $0x1f0] sm:$0xff]  ;;  %476 = vmatprep.mubr.f32.mxu1 %v17_v17  ;;  %v1373_v24 = vpack.c.bf16 %v144_v12, %v143_v11 }
  0x15   :  { %v176_v19 = vld [vmem:[%s2470_s1 + $0x168] sm:$0xff]  ;;  %346 = vmatprep.mubr.f32.mxu0 %v15_v16  ;;  %v194_v23 = vld [vmem:[%s2470_s1 + $0x1f8] sm:$0xff]  ;;  %v1375_v26 = vpack.c.bf16 %v162_v21, %v161_v20  ;;  %v145_v27 = vld [vmem:[%s2470_s1 + $0x70] sm:$0xff] }
  0x16   :  { %1366 = vmatpush3.bf16.msra.mxu0 %v1365_v62  ;;  %v1405_v25 = vpack.c.bf16 %v176_v19, %v175_v15  ;;  %v146_v28 = vld [vmem:[%s2470_s1 + $0x78] sm:$0xff]  ;;  %v177_v29 = vld [vmem:[%s2470_s1 + $0x170] sm:$0xff]  ;;  %v1407_v30 = vpack.c.bf16 %v194_v23, %v193_v22  ;;  %v211_v32 = vld [vmem:[%s2470_s1 + $0x280] sm:$0xff] }
  0x17   :  { %1398 = vmatpush3.bf16.msra.mxu1 %v1397_v63  ;;  %1368 = vmatprep.subr.bf16.mxu0 %v1367_v0  ;;  %v178_v31 = vld [vmem:[%s2470_s1 + $0x178] sm:$0xff]  ;;  %v212_v33 = vld [vmem:[%s2470_s1 + $0x288] sm:$0xff]  ;;  %v243_v34 = vld [vmem:[%s2470_s1 + $0x380] sm:$0xff]  ;;  %v1377_v36 = vpack.c.bf16 %v146_v28, %v145_v27 }
  0x18   :  { %1400 = vmatprep.subr.bf16.mxu1 %v1399_v4  ;;  %v244_v35 = vld [vmem:[%s2470_s1 + $0x388] sm:$0xff]  ;;  %v1409_v37 = vpack.c.bf16 %v178_v31, %v177_v29  ;;  %v1411_v38 = vpack.c.bf16 %v212_v33, %v211_v32  ;;  %v195_v39 = vld [vmem:[%s2470_s1 + $0x200] sm:$0xff]  ;;  %v213_v44 = vld [vmem:[%s2470_s1 + $0x290] sm:$0xff] }
  0x19   :  { %v196_v40 = vld [vmem:[%s2470_s1 + $0x208] sm:$0xff]  ;;  %v1443_v41 = vpack.c.bf16 %v244_v35, %v243_v34  ;;  %v227_v42 = vld [vmem:[%s2470_s1 + $0x300] sm:$0xff]  ;;  %v214_v45 = vld [vmem:[%s2470_s1 + $0x298] sm:$0xff] }
  0x1a   :  { %1370 = vmatpush3.bf16.msra.mxu0 %v1369_v10  ;;  %v228_v43 = vld [vmem:[%s2470_s1 + $0x308] sm:$0xff]  ;;  %v14_v46 = vld [vmem:[%s2471_s0] sm:$0xff]  ;;  %v1413_v47 = vpack.c.bf16 %v196_v40, %v195_v39  ;;  %v245_v48 = vld [vmem:[%s2470_s1 + $0x390] sm:$0xff]  ;;  %v1415_v54 = vpack.c.bf16 %v214_v45, %v213_v44 }
  0x1b   :  { %1402 = vmatpush3.bf16.msra.mxu1 %v1401_v13  ;;  %1372 = vmatprep.subr.bf16.mxu0 %v1371_v14  ;;  %v246_v49 = vld [vmem:[%s2470_s1 + $0x398] sm:$0xff]  ;;  %v16_v50 = vld [vmem:[%s2471_s0 + $0x10] sm:$0xff]  ;;  %v26_v52 = vld [vmem:[%s2471_s0 + $0x60] sm:$0xff]  ;;  %v1445_v53 = vpack.c.bf16 %v228_v43, %v227_v42 }
  0x1c   :  { %1404 = vmatprep.subr.bf16.mxu1 %v1403_v18  ;;  %v24_v51 = vld [vmem:[%s2471_s0 + $0x50] sm:$0xff]  ;;  %v198_v56 = vld [vmem:[%s2470_s1 + $0x218] sm:$0xff]  ;;  %v1447_v58 = vpack.c.bf16 %v246_v49, %v245_v48  ;;  %v215_v60 = vld [vmem:[%s2470_s1 + $0x2a0] sm:$0xff] }
  0x1d   :  { %v197_v55 = vld [vmem:[%s2470_s1 + $0x210] sm:$0xff]  ;;  %v230_v59 = vld [vmem:[%s2470_s1 + $0x318] sm:$0xff]  ;;  %v216_v61 = vld [vmem:[%s2470_s1 + $0x2a8] sm:$0xff] }
  0x1e   :  { %1374 = vmatpush3.bf16.msra.mxu0 %v1373_v24  ;;  %v229_v57 = vld [vmem:[%s2470_s1 + $0x310] sm:$0xff]  ;;  %v23_v62 = vld [vmem:[%s2471_s0 + $0x48] sm:$0xff]  ;;  %v247_v63 = vld [vmem:[%s2470_s1 + $0x3a0] sm:$0xff]  ;;  %v1417_v4 = vpack.c.bf16 %v198_v56, %v197_v55  ;;  %v1419_v6 = vpack.c.bf16 %v216_v61, %v215_v60 }
  0x1f   :  { %1406 = vmatpush3.bf16.msra.mxu1 %v1405_v25  ;;  %1376 = vmatprep.subr.bf16.mxu0 %v1375_v26  ;;  %v248_v0 = vld [vmem:[%s2470_s1 + $0x3a8] sm:$0xff]  ;;  %v25_v1 = vld [vmem:[%s2471_s0 + $0x58] sm:$0xff]  ;;  %v1449_v5 = vpack.c.bf16 %v230_v59, %v229_v57  ;;  %v199_v7 = vld [vmem:[%s2470_s1 + $0x220] sm:$0xff] }
  0x20   :  { %1408 = vmatprep.subr.bf16.mxu1 %v1407_v30  ;;  %v33_v2 = vld [vmem:[%s2471_s0 + $0x98] sm:$0xff]  ;;  %v35_v3 = vld [vmem:[%s2471_s0 + $0xa8] sm:$0xff]  ;;  %v231_v9 = vld [vmem:[%s2470_s1 + $0x320] sm:$0xff]  ;;  %v1451_v10 = vpack.c.bf16 %v248_v0, %v247_v63 }
  0x21   :  { %v200_v8 = vld [vmem:[%s2470_s1 + $0x228] sm:$0xff]  ;;  %v217_v12 = vld [vmem:[%s2470_s1 + $0x2b0] sm:$0xff]  ;;  %v218_v13 = vld [vmem:[%s2470_s1 + $0x2b8] sm:$0xff] }
  0x22   :  { %1378 = vmatpush3.bf16.msra.mxu0 %v1377_v36  ;;  %v232_v11 = vld [vmem:[%s2470_s1 + $0x328] sm:$0xff]  ;;  %v32_v14 = vld [vmem:[%s2471_s0 + $0x90] sm:$0xff]  ;;  %v250_v16 = vld [vmem:[%s2470_s1 + $0x3b8] sm:$0xff]  ;;  %v1421_v20 = vpack.c.bf16 %v200_v8, %v199_v7  ;;  %v1423_v22 = vpack.c.bf16 %v218_v13, %v217_v12 }
  0x23   :  { %1410 = vmatpush3.bf16.msra.mxu1 %v1409_v37  ;;  %1412 = vmatprep.subr.bf16.mxu0 %v1411_v38  ;;  %v249_v15 = vld [vmem:[%s2470_s1 + $0x3b0] sm:$0xff]  ;;  %v34_v17 = vld [vmem:[%s2471_s0 + $0xa0] sm:$0xff]  ;;  %v1453_v21 = vpack.c.bf16 %v232_v11, %v231_v9  ;;  %v202_v24 = vld [vmem:[%s2470_s1 + $0x238] sm:$0xff] }
  0x24   :  { %1444 = vmatprep.subr.bf16.mxu1 %v1443_v41  ;;  %v42_v18 = vld [vmem:[%s2471_s0 + $0xe0] sm:$0xff]  ;;  %v44_v19 = vld [vmem:[%s2471_s0 + $0xf0] sm:$0xff]  ;;  %v1455_v26 = vpack.c.bf16 %v250_v16, %v249_v15  ;;  %v234_v27 = vld [vmem:[%s2470_s1 + $0x338] sm:$0xff] }
  0x25   :  { %347 = vmatmul.mubr.f32.vlgmr.msra.gmra.mrb[0].mxu0 %v14_v46  ;;  %v201_v23 = vld [vmem:[%s2470_s1 + $0x230] sm:$0xff]  ;;  %v219_v28 = vld [vmem:[%s2470_s1 + $0x2c0] sm:$0xff]  ;;  %v220_v29 = vld [vmem:[%s2470_s1 + $0x2c8] sm:$0xff] }
  0x26   :  { %477 = vmatmul.mubr.f32.vlgmr.msra.gmra.mrb[0].mxu1 %v16_v50  ;;  %1414 = vmatpush3.bf16.msra.mxu0 %v1413_v47  ;;  %v233_v25 = vld [vmem:[%s2470_s1 + $0x330] sm:$0xff]  ;;  %v41_v30 = vld [vmem:[%s2471_s0 + $0xd8] sm:$0xff]  ;;  %v251_v31 = vld [vmem:[%s2470_s1 + $0x3c0] sm:$0xff]  ;;  %v1425_v36 = vpack.c.bf16 %v202_v24, %v201_v23  ;;  %v1427_v38 = vpack.c.bf16 %v220_v29, %v219_v28 }
  0x27   :  { %351 = vmatprep.mubr.f32.mxu0 %v24_v51  ;;  %481 = vmatprep.mubr.f32.mxu1 %v26_v52  ;;  %v252_v32 = vld [vmem:[%s2470_s1 + $0x3c8] sm:$0xff]  ;;  %v53_v35 = vld [vmem:[%s2471_s0 + $0x138] sm:$0xff]  ;;  %v1457_v37 = vpack.c.bf16 %v234_v27, %v233_v25  ;;  %v203_v39 = vld [vmem:[%s2470_s1 + $0x240] sm:$0xff] }
  0x28   :  { %1446 = vmatpush3.bf16.msra.mxu1 %v1445_v53  ;;  %1416 = vmatprep.subr.bf16.mxu0 %v1415_v54  ;;  %v43_v33 = vld [vmem:[%s2471_s0 + $0xe8] sm:$0xff]  ;;  %v235_v41 = vld [vmem:[%s2470_s1 + $0x340] sm:$0xff]  ;;  %v1459_v42 = vpack.c.bf16 %v252_v32, %v251_v31  ;;  %v221_v44 = vld [vmem:[%s2470_s1 + $0x2d0] sm:$0xff] }
  0x29   :  { %352 = vmatmul.mubr.f32.gmra.mrb[2].mxu0 %v23_v62  ;;  %1448 = vmatprep.subr.bf16.mxu1 %v1447_v58  ;;  %v51_v34 = vld [vmem:[%s2471_s0 + $0x128] sm:$0xff]  ;;  %v222_v45 = vld [vmem:[%s2470_s1 + $0x2d8] sm:$0xff]  ;;  %v50_v46 = vld [vmem:[%s2471_s0 + $0x120] sm:$0xff] }
  0x2a   :  { %482 = vmatmul.mubr.f32.gmra.mrb[2].mxu1 %v25_v1  ;;  %356 = vmatprep.mubr.f32.mxu0 %v33_v2  ;;  %v204_v40 = vld [vmem:[%s2470_s1 + $0x248] sm:$0xff]  ;;  %v52_v47 = vld [vmem:[%s2471_s0 + $0x130] sm:$0xff]  ;;  %v62_v49 = vld [vmem:[%s2471_s0 + $0x180] sm:$0xff]  ;;  %v1431_v54 = vpack.c.bf16 %v222_v45, %v221_v44 }
  0x2b   :  { %486 = vmatprep.mubr.f32.mxu1 %v35_v3  ;;  %1418 = vmatpush3.bf16.msra.mxu0 %v1417_v4  ;;  %v236_v43 = vld [vmem:[%s2470_s1 + $0x348] sm:$0xff]  ;;  %v60_v48 = vld [vmem:[%s2471_s0 + $0x170] sm:$0xff]  ;;  %v1429_v50 = vpack.c.bf16 %v204_v40, %v203_v39  ;;  %v254_v52 = vld [vmem:[%s2470_s1 + $0x3d8] sm:$0xff] }
  0x2c   :  { %1450 = vmatpush3.bf16.msra.mxu1 %v1449_v5  ;;  %1420 = vmatprep.subr.bf16.mxu0 %v1419_v6  ;;  %v253_v51 = vld [vmem:[%s2470_s1 + $0x3d0] sm:$0xff]  ;;  %v1461_v53 = vpack.c.bf16 %v236_v43, %v235_v41  ;;  %v206_v56 = vld [vmem:[%s2470_s1 + $0x258] sm:$0xff]  ;;  %v223_v60 = vld [vmem:[%s2470_s1 + $0x2e0] sm:$0xff] }
  0x2d   :  { %357 = vmatmul.mubr.f32.gmra.mrb[4].mxu0 %v32_v14  ;;  %1452 = vmatprep.subr.bf16.mxu1 %v1451_v10  ;;  %v205_v55 = vld [vmem:[%s2470_s1 + $0x250] sm:$0xff]  ;;  %v1463_v58 = vpack.c.bf16 %v254_v52, %v253_v51  ;;  %v238_v59 = vld [vmem:[%s2470_s1 + $0x358] sm:$0xff]  ;;  %v224_v61 = vld [vmem:[%s2470_s1 + $0x2e8] sm:$0xff] }
  0x2e   :  { %487 = vmatmul.mubr.f32.gmra.mrb[4].mxu1 %v34_v17  ;;  %361 = vmatprep.mubr.f32.mxu0 %v42_v18  ;;  %v237_v57 = vld [vmem:[%s2470_s1 + $0x350] sm:$0xff]  ;;  %v59_v62 = vld [vmem:[%s2471_s0 + $0x168] sm:$0xff]  ;;  %v61_v63 = vld [vmem:[%s2471_s0 + $0x178] sm:$0xff]  ;;  %v1433_v2 = vpack.c.bf16 %v206_v56, %v205_v55  ;;  %v1435_v5 = vpack.c.bf16 %v224_v61, %v223_v60 }
  0x2f   :  { %491 = vmatprep.mubr.f32.mxu1 %v44_v19  ;;  %1422 = vmatpush3.bf16.msra.mxu0 %v1421_v20  ;;  %v69_v0 = vld [vmem:[%s2471_s0 + $0x1b8] sm:$0xff]  ;;  %v71_v1 = vld [vmem:[%s2471_s0 + $0x1c8] sm:$0xff]  ;;  %v207_v3 = vld [vmem:[%s2470_s1 + $0x260] sm:$0xff]  ;;  %v1465_v4 = vpack.c.bf16 %v238_v59, %v237_v57 }
  0x30   :  { %1454 = vmatpush3.bf16.msra.mxu1 %v1453_v21  ;;  %1424 = vmatprep.subr.bf16.mxu0 %v1423_v22  ;;  %v208_v6 = vld [vmem:[%s2470_s1 + $0x268] sm:$0xff]  ;;  %v255_v7 = vld [vmem:[%s2470_s1 + $0x3e0] sm:$0xff]  ;;  %v68_v12 = vld [vmem:[%s2471_s0 + $0x1b0] sm:$0xff] }
  0x31   :  { %362 = vmatmul.mubr.f32.gmra.mrb[6].mxu0 %v41_v30  ;;  %1456 = vmatprep.subr.bf16.mxu1 %v1455_v26  ;;  %v256_v8 = vld [vmem:[%s2470_s1 + $0x3e8] sm:$0xff]  ;;  %v239_v10 = vld [vmem:[%s2470_s1 + $0x360] sm:$0xff]  ;;  %v225_v13 = vld [vmem:[%s2470_s1 + $0x2f0] sm:$0xff]  ;;  %v1437_v18 = vpack.c.bf16 %v208_v6, %v207_v3 }
  0x32   :  { %492 = vmatmul.mubr.f32.gmra.mrb[6].mxu1 %v43_v33  ;;  %366 = vmatprep.mubr.f32.mxu0 %v51_v34  ;;  %v1467_v9 = vpack.c.bf16 %v256_v8, %v255_v7  ;;  %v240_v11 = vld [vmem:[%s2470_s1 + $0x368] sm:$0xff]  ;;  %v226_v14 = vld [vmem:[%s2470_s1 + $0x2f8] sm:$0xff]  ;;  %v70_v15 = vld [vmem:[%s2471_s0 + $0x1c0] sm:$0xff] }
  0x33   :  { %496 = vmatprep.mubr.f32.mxu1 %v53_v35  ;;  %1426 = vmatpush3.bf16.msra.mxu0 %v1425_v36  ;;  %v78_v16 = vld [vmem:[%s2471_s0 + $0x200] sm:$0xff]  ;;  %v80_v17 = vld [vmem:[%s2471_s0 + $0x210] sm:$0xff]  ;;  %v1469_v19 = vpack.c.bf16 %v240_v11, %v239_v10  ;;  %v1439_v20 = vpack.c.bf16 %v226_v14, %v225_v13  ;;  %v210_v22 = vld [vmem:[%s2470_s1 + $0x278] sm:$0xff] }
  0x34   :  { %1458 = vmatpush3.bf16.msra.mxu1 %v1457_v37  ;;  %1428 = vmatprep.subr.bf16.mxu0 %v1427_v38  ;;  %v209_v21 = vld [vmem:[%s2470_s1 + $0x270] sm:$0xff]  ;;  %v258_v24 = vld [vmem:[%s2470_s1 + $0x3f8] sm:$0xff]  ;;  %v79_v29 = vld [vmem:[%s2471_s0 + $0x208] sm:$0xff]  ;;  %v1518_v38 = vmov 0.0|0.0  }
  0x35   :  { %367 = vmatmul.mubr.f32.gmra.mrb[8].mxu0 %v50_v46  ;;  %1460 = vmatprep.subr.bf16.mxu1 %v1459_v42  ;;  %v257_v23 = vld [vmem:[%s2470_s1 + $0x3f0] sm:$0xff]  ;;  %v242_v26 = vld [vmem:[%s2470_s1 + $0x378] sm:$0xff]  ;;  %v87_v30 = vld [vmem:[%s2471_s0 + $0x248] sm:$0xff]  ;;  %v1441_v31 = vpack.c.bf16 %v210_v22, %v209_v21 }
  0x36   :  { %497 = vmatmul.mubr.f32.gmra.mrb[8].mxu1 %v52_v47  ;;  %371 = vmatprep.mubr.f32.mxu0 %v60_v48  ;;  %v241_v25 = vld [vmem:[%s2470_s1 + $0x370] sm:$0xff]  ;;  %v77_v27 = vld [vmem:[%s2471_s0 + $0x1f8] sm:$0xff]  ;;  %v1471_v28 = vpack.c.bf16 %v258_v24, %v257_v23  ;;  %v86_v34 = vld [vmem:[%s2471_s0 + $0x240] sm:$0xff] }
  0x37   :  { %501 = vmatprep.mubr.f32.mxu1 %v62_v49  ;;  %1430 = vmatpush3.bf16.msra.mxu0 %v1429_v50  ;;  %v89_v32 = vld [vmem:[%s2471_s0 + $0x258] sm:$0xff]  ;;  %v1473_v33 = vpack.c.bf16 %v242_v26, %v241_v25  ;;  %v88_v35 = vld [vmem:[%s2471_s0 + $0x250] sm:$0xff]  ;;  %v98_v37 = vld [vmem:[%s2471_s0 + $0x2a0] sm:$0xff] }
  0x38   :  { %1462 = vmatpush3.bf16.msra.mxu1 %v1461_v53  ;;  %1432 = vmatprep.subr.bf16.mxu0 %v1431_v54  ;;  %v96_v36 = vld [vmem:[%s2471_s0 + $0x290] sm:$0xff]  ;;  %v95_v39 = vld [vmem:[%s2471_s0 + $0x288] sm:$0xff]  ;;  %v97_v40 = vld [vmem:[%s2471_s0 + $0x298] sm:$0xff] }
  0x39   :  { %372 = vmatmul.mubr.f32.gmra.mrb[10].mxu0 %v59_v62  ;;  %1464 = vmatprep.subr.bf16.mxu1 %v1463_v58  ;;  %v105_v41 = vld [vmem:[%s2471_s0 + $0x2d8] sm:$0xff]  ;;  %v107_v42 = vld [vmem:[%s2471_s0 + $0x2e8] sm:$0xff]  ;;  %v104_v43 = vld [vmem:[%s2471_s0 + $0x2d0] sm:$0xff] }
  0x3a   :  { %502 = vmatmul.mubr.f32.gmra.mrb[10].mxu1 %v61_v63  ;;  %376 = vmatprep.mubr.f32.mxu0 %v69_v0  ;;  %v106_v44 = vld [vmem:[%s2471_s0 + $0x2e0] sm:$0xff]  ;;  %v116_v46 = vld [vmem:[%s2471_s0 + $0x330] sm:$0xff]  ;;  %v113_v47 = vld [vmem:[%s2471_s0 + $0x318] sm:$0xff] }
  0x3b   :  { %506 = vmatprep.mubr.f32.mxu1 %v71_v1  ;;  %1434 = vmatpush3.bf16.msra.mxu0 %v1433_v2  ;;  %v114_v45 = vld [vmem:[%s2471_s0 + $0x320] sm:$0xff]  ;;  %v115_v48 = vld [vmem:[%s2471_s0 + $0x328] sm:$0xff]  ;;  %v125_v50 = vld [vmem:[%s2471_s0 + $0x378] sm:$0xff] }
  0x3c   :  { %1466 = vmatpush3.bf16.msra.mxu1 %v1465_v4  ;;  %1436 = vmatprep.subr.bf16.mxu0 %v1435_v5  ;;  %v123_v49 = vld [vmem:[%s2471_s0 + $0x368] sm:$0xff]  ;;  %v122_v51 = vld [vmem:[%s2471_s0 + $0x360] sm:$0xff]  ;;  %v124_v52 = vld [vmem:[%s2471_s0 + $0x370] sm:$0xff] }
  0x3d   :  { %377 = vmatmul.mubr.f32.gmra.mrb[12].mxu0 %v68_v12  ;;  %1468 = vmatprep.subr.bf16.mxu1 %v1467_v9  ;;  %v19_v53 = vld [vmem:[%s2471_s0 + $0x28] sm:$0xff]  ;;  %v259_v54 = vld [vmem:[%s2470_s1 + $0x400] sm:$0xff]  ;;  %v21_v56 = vld [vmem:[%s2471_s0 + $0x38] sm:$0xff] }
  0x3e   :  { %507 = vmatmul.mubr.f32.gmra.mrb[12].mxu1 %v70_v15  ;;  %381 = vmatprep.mubr.f32.mxu0 %v78_v16  ;;  %v260_v55 = vld [vmem:[%s2470_s1 + $0x408] sm:$0xff]  ;;  %v18_v57 = vld [vmem:[%s2471_s0 + $0x20] sm:$0xff]  ;;  %v20_v59 = vld [vmem:[%s2471_s0 + $0x30] sm:$0xff] }
  0x3f   :  { %511 = vmatprep.mubr.f32.mxu1 %v80_v17  ;;  %1438 = vmatpush3.bf16.msra.mxu0 %v1437_v18  ;;  %v1476_v58 = vpack.c.bf16 %v260_v55, %v259_v54  ;;  %v28_v60 = vld [vmem:[%s2471_s0 + $0x70] sm:$0xff]  ;;  %v30_v61 = vld [vmem:[%s2471_s0 + $0x80] sm:$0xff]  ;;  %v262_v63 = vld [vmem:[%s2470_s1 + $0x418] sm:$0xff] }
  0x40   :  { %1470 = vmatpush3.bf16.msra.mxu1 %v1469_v19  ;;  %1440 = vmatprep.subr.bf16.mxu0 %v1439_v20  ;;  %v261_v62 = vld [vmem:[%s2470_s1 + $0x410] sm:$0xff]  ;;  %v27_v0 = vld [vmem:[%s2471_s0 + $0x68] sm:$0xff]  ;;  %v29_v1 = vld [vmem:[%s2471_s0 + $0x78] sm:$0xff] }
  0x41   :  { %382 = vmatmul.mubr.f32.gmra.mrb[14].mxu0 %v77_v27  ;;  %1472 = vmatprep.subr.bf16.mxu1 %v1471_v28  ;;  %v37_v2 = vld [vmem:[%s2471_s0 + $0xb8] sm:$0xff]  ;;  %v1479_v3 = vpack.c.bf16 %v262_v63, %v261_v62  ;;  %v39_v4 = vld [vmem:[%s2471_s0 + $0xc8] sm:$0xff]  ;;  %v263_v5 = vld [vmem:[%s2470_s1 + $0x420] sm:$0xff] }
  0x42   :  { %512 = vmatmul.mubr.f32.gmra.mrb[14].mxu1 %v79_v29  ;;  %386 = vmatprep.mubr.f32.mxu0 %v87_v30  ;;  %v264_v6 = vld [vmem:[%s2470_s1 + $0x428] sm:$0xff]  ;;  %v36_v7 = vld [vmem:[%s2471_s0 + $0xb0] sm:$0xff]  ;;  %v38_v8 = vld [vmem:[%s2471_s0 + $0xc0] sm:$0xff] }
  0x43   :  { %516 = vmatprep.mubr.f32.mxu1 %v89_v32  ;;  %1442 = vmatpush3.bf16.msra.mxu0 %v1441_v31  ;;  %v46_v9 = vld [vmem:[%s2471_s0 + $0x100] sm:$0xff]  ;;  %v1482_v10 = vpack.c.bf16 %v264_v6, %v263_v5  ;;  %v48_v11 = vld [vmem:[%s2471_s0 + $0x110] sm:$0xff]  ;;  %v266_v13 = vld [vmem:[%s2470_s1 + $0x438] sm:$0xff] }
  0x44   :  { %1474 = vmatpush3.bf16.msra.mxu1 %v1473_v33  ;;  %1475 = vmatprep.subr.bf16.mxu0 %v1518_v38  ;;  %v265_v12 = vld [vmem:[%s2470_s1 + $0x430] sm:$0xff]  ;;  %v45_v14 = vld [vmem:[%s2471_s0 + $0xf8] sm:$0xff]  ;;  %v47_v15 = vld [vmem:[%s2471_s0 + $0x108] sm:$0xff] }
  0x45   :  { %387 = vmatmul.mubr.f32.gmra.mrb[16].mxu0 %v86_v34  ;;  %1499 = vmatprep.subr.bf16.mxu1 %v1518_v38  ;;  %v55_v16 = vld [vmem:[%s2471_s0 + $0x148] sm:$0xff]  ;;  %v1485_v17 = vpack.c.bf16 %v266_v13, %v265_v12  ;;  %v57_v18 = vld [vmem:[%s2471_s0 + $0x158] sm:$0xff]  ;;  %v267_v19 = vld [vmem:[%s2470_s1 + $0x440] sm:$0xff] }
  0x46   :  { %517 = vmatmul.mubr.f32.gmra.mrb[16].mxu1 %v88_v35  ;;  %391 = vmatprep.mubr.f32.mxu0 %v96_v36  ;;  %v268_v20 = vld [vmem:[%s2470_s1 + $0x448] sm:$0xff]  ;;  %v54_v21 = vld [vmem:[%s2471_s0 + $0x140] sm:$0xff]  ;;  %v56_v22 = vld [vmem:[%s2471_s0 + $0x150] sm:$0xff] }
  0x47   :  { %521 = vmatprep.mubr.f32.mxu1 %v98_v37  ;;  %v64_v23 = vld [vmem:[%s2471_s0 + $0x190] sm:$0xff]  ;;  %v1488_v24 = vpack.c.bf16 %v268_v20, %v267_v19  ;;  %v66_v25 = vld [vmem:[%s2471_s0 + $0x1a0] sm:$0xff]  ;;  %v270_v27 = vld [vmem:[%s2470_s1 + $0x458] sm:$0xff] }
  0x48   :  { %v269_v26 = vld [vmem:[%s2470_s1 + $0x450] sm:$0xff]  ;;  %v63_v28 = vld [vmem:[%s2471_s0 + $0x188] sm:$0xff]  ;;  %v65_v29 = vld [vmem:[%s2471_s0 + $0x198] sm:$0xff] }
  0x49   :  { %392 = vmatmul.mubr.f32.gmra.mrb[18].mxu0 %v95_v39  ;;  %v73_v30 = vld [vmem:[%s2471_s0 + $0x1d8] sm:$0xff]  ;;  %v1491_v31 = vpack.c.bf16 %v270_v27, %v269_v26  ;;  %v75_v32 = vld [vmem:[%s2471_s0 + $0x1e8] sm:$0xff]  ;;  %v271_v33 = vld [vmem:[%s2470_s1 + $0x460] sm:$0xff] }
  0x4a   :  { %522 = vmatmul.mubr.f32.gmra.mrb[18].mxu1 %v97_v40  ;;  %396 = vmatprep.mubr.f32.mxu0 %v105_v41  ;;  %v272_v34 = vld [vmem:[%s2470_s1 + $0x468] sm:$0xff]  ;;  %v72_v35 = vld [vmem:[%s2471_s0 + $0x1d0] sm:$0xff]  ;;  %v74_v36 = vld [vmem:[%s2471_s0 + $0x1e0] sm:$0xff] }
  0x4b   :  { %526 = vmatprep.mubr.f32.mxu1 %v107_v42  ;;  %v82_v37 = vld [vmem:[%s2471_s0 + $0x220] sm:$0xff]  ;;  %v1494_v39 = vpack.c.bf16 %v272_v34, %v271_v33  ;;  %v84_v40 = vld [vmem:[%s2471_s0 + $0x230] sm:$0xff]  ;;  %v274_v42 = vld [vmem:[%s2470_s1 + $0x478] sm:$0xff] }
  0x4c   :  { %v273_v41 = vld [vmem:[%s2470_s1 + $0x470] sm:$0xff]  ;;  %v111_v54 = vld [vmem:[%s2471_s0 + $0x308] sm:$0xff]  ;;  %v129_v62 = vld [vmem:[%s2471_s0 + $0x398] sm:$0xff] }
  0x4d   :  { %397 = vmatmul.mubr.f32.gmra.mrb[20].mxu0 %v104_v43  ;;  %v81_v43 = vld [vmem:[%s2471_s0 + $0x218] sm:$0xff]  ;;  %v108_v55 = vld [vmem:[%s2471_s0 + $0x2f0] sm:$0xff]  ;;  %v126_v63 = vld [vmem:[%s2471_s0 + $0x380] sm:$0xff] }
  0x4e   :  { %527 = vmatmul.mubr.f32.gmra.mrb[20].mxu1 %v106_v44  ;;  %401 = vmatprep.mubr.f32.mxu0 %v114_v45  ;;  %v83_v44 = vld [vmem:[%s2471_s0 + $0x228] sm:$0xff]  ;;  %v94_v5 = vld [vmem:[%s2471_s0 + $0x280] sm:$0xff]  ;;  %v40_v6 = vld [vmem:[%s2471_s0 + $0xd0] sm:$0xff] }
  0x4f   :  { %531 = vmatprep.mubr.f32.mxu1 %v116_v46  ;;  %v91_v45 = vld [vmem:[%s2471_s0 + $0x268] sm:$0xff]  ;;  %v1497_v46 = vpack.c.bf16 %v274_v42, %v273_v41  ;;  %v130_v13 = vld [vmem:[%s2471_s0 + $0x3a0] sm:$0xff] }
  0x50   :  { %v67_v12 = vld [vmem:[%s2471_s0 + $0x1a8] sm:$0xff] }
  0x51   :  { %402 = vmatmul.mubr.f32.gmra.mrb[22].mxu0 %v113_v47  ;;  %v93_v47 = vld [vmem:[%s2471_s0 + $0x278] sm:$0xff] }
  0x52   :  { %532 = vmatmul.mubr.f32.gmra.mrb[22].mxu1 %v115_v48  ;;  %406 = vmatprep.mubr.f32.mxu0 %v123_v49  ;;  %v90_v48 = vld [vmem:[%s2471_s0 + $0x260] sm:$0xff]  ;;  %v92_v49 = vld [vmem:[%s2471_s0 + $0x270] sm:$0xff] }
  0x53   :  { %536 = vmatprep.mubr.f32.mxu1 %v125_v50  ;;  %v100_v50 = vld [vmem:[%s2471_s0 + $0x2b0] sm:$0xff] }
  0x55   :  { %407 = vmatmul.mubr.f32.gmra.mrb[24].mxu0 %v122_v51  ;;  %v99_v51 = vld [vmem:[%s2471_s0 + $0x2a8] sm:$0xff] }
  0x56   :  { %537 = vmatmul.mubr.f32.gmra.mrb[24].mxu1 %v124_v52  ;;  %606 = vmatprep.mubr.f32.mxu0 %v19_v53  ;;  %v101_v52 = vld [vmem:[%s2471_s0 + $0x2b8] sm:$0xff] }
  0x57   :  { %736 = vmatprep.mubr.f32.mxu1 %v21_v56  ;;  %v109_v53 = vld [vmem:[%s2471_s0 + $0x2f8] sm:$0xff]  ;;  %v110_v56 = vld [vmem:[%s2471_s0 + $0x300] sm:$0xff] }
  0x59   :  { %607 = vmatmul.mubr.f32.vlgmr.msra.gmra.mrb[26].mxu0 %v18_v57  ;;  %v118_v57 = vld [vmem:[%s2471_s0 + $0x340] sm:$0xff] }
  0x5a   :  { %737 = vmatmul.mubr.f32.vlgmr.msra.gmra.mrb[26].mxu1 %v20_v59  ;;  %1477 = vmatpush3.bf16.msra.mxu0 %v1476_v58  ;;  %v117_v59 = vld [vmem:[%s2471_s0 + $0x338] sm:$0xff] }
  0x5b   :  { %611 = vmatprep.mubr.f32.mxu0 %v28_v60  ;;  %741 = vmatprep.mubr.f32.mxu1 %v30_v61  ;;  %v119_v60 = vld [vmem:[%s2471_s0 + $0x348] sm:$0xff] }
  0x5c   :  { %1507 = vmatpush3.bf16.msra.mxu1 %v1476_v58  ;;  %1478 = vmatprep.subr.bf16.mxu0 %v1518_v38  ;;  %v120_v58 = vld [vmem:[%s2471_s0 + $0x350] sm:$0xff]  ;;  %v127_v61 = vld [vmem:[%s2471_s0 + $0x388] sm:$0xff] }
  0x5d   :  { %612 = vmatmul.mubr.f32.gmra.mrb[28].mxu0 %v27_v0  ;;  %1500 = vmatprep.subr.bf16.mxu1 %v1518_v38  ;;  %v128_v0 = vld [vmem:[%s2471_s0 + $0x390] sm:$0xff] }
  0x5e   :  { %742 = vmatmul.mubr.f32.gmra.mrb[28].mxu1 %v29_v1  ;;  %616 = vmatprep.mubr.f32.mxu0 %v37_v2  ;;  %v1520_v1 = vmov 0.0   ;;  %v22_v2 = vld [vmem:[%s2471_s0 + $0x40] sm:$0xff] }
  0x5f   :  { %746 = vmatprep.mubr.f32.mxu1 %v39_v4  ;;  %1480 = vmatpush3.bf16.msra.mxu0 %v1479_v3  ;;  %v31_v4 = vld [vmem:[%s2471_s0 + $0x88] sm:$0xff] }
  0x60   :  { %1508 = vmatpush3.bf16.msra.mxu1 %v1479_v3  ;;  %1481 = vmatprep.subr.bf16.mxu0 %v1518_v38  ;;  %v85_v3 = vld [vmem:[%s2471_s0 + $0x238] sm:$0xff] }
  0x61   :  { %617 = vmatmul.mubr.f32.gmra.mrb[30].mxu0 %v36_v7  ;;  %1501 = vmatprep.subr.bf16.mxu1 %v1518_v38  ;;  %v103_v7 = vld [vmem:[%s2471_s0 + $0x2c8] sm:$0xff] }
  0x62   :  { %747 = vmatmul.mubr.f32.gmra.mrb[30].mxu1 %v38_v8  ;;  %621 = vmatprep.mubr.f32.mxu0 %v46_v9  ;;  %v49_v8 = vld [vmem:[%s2471_s0 + $0x118] sm:$0xff]  ;;  %v112_v9 = vld [vmem:[%s2471_s0 + $0x310] sm:$0xff] }
  0x63   :  { %751 = vmatprep.mubr.f32.mxu1 %v48_v11  ;;  %1483 = vmatpush3.bf16.msra.mxu0 %v1482_v10  ;;  %v121_v11 = vld [vmem:[%s2471_s0 + $0x358] sm:$0xff] }
  0x64   :  { %1509 = vmatpush3.bf16.msra.mxu1 %v1482_v10  ;;  %1484 = vmatprep.subr.bf16.mxu0 %v1518_v38  ;;  %v58_v10 = vld [vmem:[%s2471_s0 + $0x160] sm:$0xff] }
  0x65   :  { %622 = vmatmul.mubr.f32.gmra.mrb[32].mxu0 %v45_v14  ;;  %1502 = vmatprep.subr.bf16.mxu1 %v1518_v38  ;;  %v76_v14 = vld [vmem:[%s2471_s0 + $0x1f0] sm:$0xff] }
  0x66   :  { %752 = vmatmul.mubr.f32.gmra.mrb[32].mxu1 %v47_v15  ;;  %626 = vmatprep.mubr.f32.mxu0 %v55_v16  ;;  %v2356_v16 = vld [vmem:[%s2472_s2] ss:$0 sm:$0xff] }
  0x67   :  { %756 = vmatprep.mubr.f32.mxu1 %v57_v18  ;;  %1486 = vmatpush3.bf16.msra.mxu0 %v1485_v17 }
  0x68   :  { %1510 = vmatpush3.bf16.msra.mxu1 %v1485_v17  ;;  %1487 = vmatprep.subr.bf16.mxu0 %v1518_v38 }
  0x69   :  { %627 = vmatmul.mubr.f32.gmra.mrb[34].mxu0 %v54_v21  ;;  %1503 = vmatprep.subr.bf16.mxu1 %v1518_v38 }
  0x6a   :  { %757 = vmatmul.mubr.f32.gmra.mrb[34].mxu1 %v56_v22  ;;  %631 = vmatprep.mubr.f32.mxu0 %v64_v23 }
  0x6b   :  { %761 = vmatprep.mubr.f32.mxu1 %v66_v25  ;;  %1489 = vmatpush3.bf16.msra.mxu0 %v1488_v24 }
  0x6c   :  { %1511 = vmatpush3.bf16.msra.mxu1 %v1488_v24  ;;  %1490 = vmatprep.subr.bf16.mxu0 %v1518_v38 }
  0x6d   :  { %632 = vmatmul.mubr.f32.gmra.mrb[36].mxu0 %v63_v28  ;;  %1504 = vmatprep.subr.bf16.mxu1 %v1518_v38 }
  0x6e   :  { %762 = vmatmul.mubr.f32.gmra.mrb[36].mxu1 %v65_v29  ;;  %636 = vmatprep.mubr.f32.mxu0 %v73_v30 }
  0x6f   :  { %766 = vmatprep.mubr.f32.mxu1 %v75_v32  ;;  %1492 = vmatpush3.bf16.msra.mxu0 %v1491_v31 }
  0x70   :  { %1512 = vmatpush3.bf16.msra.mxu1 %v1491_v31  ;;  %1493 = vmatprep.subr.bf16.mxu0 %v1518_v38 }
  0x71   :  { %637 = vmatmul.mubr.f32.gmra.mrb[38].mxu0 %v72_v35  ;;  %1505 = vmatprep.subr.bf16.mxu1 %v1518_v38 }
  0x72   :  { %767 = vmatmul.mubr.f32.gmra.mrb[38].mxu1 %v74_v36  ;;  %641 = vmatprep.mubr.f32.mxu0 %v82_v37 }
  0x73   :  { %771 = vmatprep.mubr.f32.mxu1 %v84_v40  ;;  %1495 = vmatpush3.bf16.msra.mxu0 %v1494_v39 }
  0x74   :  { %1513 = vmatpush3.bf16.msra.mxu1 %v1494_v39  ;;  %1496 = vmatprep.subr.bf16.mxu0 %v1518_v38 }
  0x75   :  { %642 = vmatmul.mubr.f32.gmra.mrb[40].mxu0 %v81_v43  ;;  %1506 = vmatprep.subr.bf16.mxu1 %v1518_v38  ;;  %v102_v38 = vld [vmem:[%s2471_s0 + $0x2c0] sm:$0xff] }
  0x76   :  { %772 = vmatmul.mubr.f32.gmra.mrb[40].mxu1 %v83_v44  ;;  %646 = vmatprep.mubr.f32.mxu0 %v91_v45 }
  0x77   :  { %776 = vmatprep.mubr.f32.mxu1 %v93_v47  ;;  %1498 = vmatpush3.bf16.msra.mxu0 %v1497_v46 }
  0x78   :  { %1514 = vmatpush3.bf16.msra.mxu1 %v1497_v46 }
  0x79   :  { %647 = vmatmul.mubr.f32.gmra.mrb[42].mxu0 %v90_v48 }
  0x7a   :  { %777 = vmatmul.mubr.f32.gmra.mrb[42].mxu1 %v92_v49  ;;  %651 = vmatprep.mubr.f32.mxu0 %v100_v50 }
  0x7b   :  { %781 = vmatprep.mubr.f32.mxu1 %v102_v38 }
  0x7d   :  { %652 = vmatmul.mubr.f32.gmra.mrb[44].mxu0 %v99_v51 }
  0x7e   :  { %782 = vmatmul.mubr.f32.gmra.mrb[44].mxu1 %v101_v52  ;;  %656 = vmatprep.mubr.f32.mxu0 %v109_v53 }
  0x7f   :  { %786 = vmatprep.mubr.f32.mxu1 %v111_v54 }
  0x81   :  { %657 = vmatmul.mubr.f32.gmra.mrb[46].mxu0 %v108_v55 }
  0x82   :  { %787 = vmatmul.mubr.f32.gmra.mrb[46].mxu1 %v110_v56  ;;  %661 = vmatprep.mubr.f32.mxu0 %v118_v57 }
  0x83   :  { %791 = vmatprep.mubr.f32.mxu1 %v120_v58 }
  0x85   :  { %662 = vmatmul.mubr.f32.gmra.mrb[48].mxu0 %v117_v59 }
  0x86   :  { %792 = vmatmul.mubr.f32.gmra.mrb[48].mxu1 %v119_v60  ;;  %666 = vmatprep.mubr.f32.mxu0 %v127_v61 }
  0x87   :  { %796 = vmatprep.mubr.f32.mxu1 %v129_v62 }
  0x89   :  { %667 = vmatmul.mubr.f32.gmra.mrb[50].mxu0 %v126_v63 }
  0x8a   :  { %797 = vmatmul.mubr.f32.gmra.mrb[50].mxu1 %v128_v0  ;;  %1308 = vmatprep.mubr.msk.f32.mxu0 %vm1519_vm0, %v1520_v1 }
  0x8b   :  { %1329 = vmatprep.mubr.msk.f32.mxu1 %vm1519_vm0, %v1520_v1 }
  0x8d   :  { %1309 = vmatmul.mubr.f32.vlgmr.msra.gmra.mrb[52].mxu0 %v22_v2 }
  0x8e   :  { %1330 = vmatmul.mubr.f32.vlgmr.msra.gmra.mrb[52].mxu1 %v85_v3  ;;  %1311 = vmatprep.mubr.msk.f32.mxu0 %vm1519_vm0, %v1520_v1 }
  0x8f   :  { %1332 = vmatprep.mubr.msk.f32.mxu1 %vm1519_vm0, %v1520_v1 }
  0x91   :  { %1312 = vmatmul.mubr.f32.gmra.mrb[54].mxu0 %v31_v4 }
  0x92   :  { %1333 = vmatmul.mubr.f32.gmra.mrb[54].mxu1 %v94_v5  ;;  %1314 = vmatprep.mubr.msk.f32.mxu0 %vm1519_vm0, %v1520_v1 }
  0x93   :  { %1335 = vmatprep.mubr.msk.f32.mxu1 %vm1519_vm0, %v1520_v1 }
  0x95   :  { %1315 = vmatmul.mubr.f32.gmra.mrb[56].mxu0 %v40_v6 }
  0x96   :  { %1336 = vmatmul.mubr.f32.gmra.mrb[56].mxu1 %v103_v7  ;;  %1317 = vmatprep.mubr.msk.f32.mxu0 %vm1519_vm0, %v1520_v1 }
  0x97   :  { %1338 = vmatprep.mubr.msk.f32.mxu1 %vm1519_vm0, %v1520_v1 }
  0x99   :  { %1318 = vmatmul.mubr.f32.gmra.mrb[58].mxu0 %v49_v8 }
  0x9a   :  { %1339 = vmatmul.mubr.f32.gmra.mrb[58].mxu1 %v112_v9  ;;  %1320 = vmatprep.mubr.msk.f32.mxu0 %vm1519_vm0, %v1520_v1 }
  0x9b   :  { %1341 = vmatprep.mubr.msk.f32.mxu1 %vm1519_vm0, %v1520_v1 }
  0x9d   :  { %1321 = vmatmul.mubr.f32.gmra.mrb[60].mxu0 %v58_v10 }
  0x9e   :  { %1342 = vmatmul.mubr.f32.gmra.mrb[60].mxu1 %v121_v11  ;;  %1323 = vmatprep.mubr.msk.f32.mxu0 %vm1519_vm0, %v1520_v1 }
  0x9f   :  { %1344 = vmatprep.mubr.msk.f32.mxu1 %vm1519_vm0, %v1520_v1 }
  0xa1   :  { %1324 = vmatmul.mubr.f32.gmra.mrb[62].mxu0 %v67_v12 }
  0xa2   :  { %1345 = vmatmul.mubr.f32.gmra.mrb[62].mxu1 %v130_v13  ;;  %1326 = vmatprep.mubr.msk.f32.mxu0 %vm1519_vm0, %v1520_v1 }
  0xa5   :  { %1327 = vmatmul.mubr.f32.gmra.mrb[64].mxu0 %v76_v14 }
  0xf8   :  { %v995_v15 = vpop.f32.mrb[0].mxu0 }
  0xf9   :  { %v996_v17 = vpop.f32.mrb[1].mxu0  ;;  %v1066_v18 = vpop.f32.mrb[0].mxu1 }
  0xfa   :  { %v997_v19 = vadd.f32 %v996_v17, %v995_v15  ;;  %v1067_v20 = vpop.f32.mrb[1].mxu1 }
  0xfb   :  { %v1068_v21 = vadd.f32 %v1067_v20, %v1066_v18 }
  0xfc   :  { %v349_v22 = vadd.f32 %v997_v19, %v2356_v16  ;;  %v998_v23 = vpop.f32.mrb[2].mxu0 }
  0xfd   :  { %v999_v24 = vpop.f32.mrb[3].mxu0  ;;  %v1069_v25 = vpop.f32.mrb[2].mxu1 }
  0xfe   :  { %v2359_v26 = vadd.f32 %v1068_v21, %v349_v22  ;;  %v1000_v27 = vadd.f32 %v999_v24, %v998_v23  ;;  %v1070_v28 = vpop.f32.mrb[3].mxu1 }
  0xff   :  { %v1071_v29 = vadd.f32 %v1070_v28, %v1069_v25 }
 0x100   :  { %v354_v30 = vadd.f32 %v1000_v27, %v2356_v16  ;;  %v1001_v31 = vpop.f32.mrb[4].mxu0 }
 0x101   :  { %v1002_v32 = vpop.f32.mrb[5].mxu0  ;;  %v1072_v33 = vpop.f32.mrb[4].mxu1 }
 0x102   :  { %v2362_v34 = vadd.f32 %v1071_v29, %v354_v30  ;;  %v1003_v35 = vadd.f32 %v1002_v32, %v1001_v31  ;;  %v1073_v36 = vpop.f32.mrb[5].mxu1 }
 0x103   :  { %v1074_v37 = vadd.f32 %v1073_v36, %v1072_v33 }
 0x104   :  { %v359_v39 = vadd.f32 %v1003_v35, %v2356_v16  ;;  %v1004_v40 = vpop.f32.mrb[6].mxu0 }
 0x105   :  { %v1005_v41 = vpop.f32.mrb[7].mxu0  ;;  %v1075_v42 = vpop.f32.mrb[6].mxu1 }
 0x106   :  { %v2365_v43 = vadd.f32 %v1074_v37, %v359_v39  ;;  %v1006_v44 = vadd.f32 %v1005_v41, %v1004_v40  ;;  %v1076_v45 = vpop.f32.mrb[7].mxu1 }
 0x107   :  { %v1077_v46 = vadd.f32 %v1076_v45, %v1075_v42 }
 0x108   :  { %v364_v47 = vadd.f32 %v1006_v44, %v2356_v16  ;;  %v1007_v48 = vpop.f32.mrb[8].mxu0 }
 0x109   :  { %v1008_v49 = vpop.f32.mrb[9].mxu0  ;;  %v1078_v50 = vpop.f32.mrb[8].mxu1 }
 0x10a   :  { %v2368_v38 = vadd.f32 %v1077_v46, %v364_v47  ;;  %v1009_v51 = vadd.f32 %v1008_v49, %v1007_v48  ;;  %v1079_v52 = vpop.f32.mrb[9].mxu1 }
 0x10b   :  { %v1080_v53 = vadd.f32 %v1079_v52, %v1078_v50 }
 0x10c   :  { %v369_v54 = vadd.f32 %v1009_v51, %v2356_v16  ;;  %v1010_v55 = vpop.f32.mrb[10].mxu0 }
 0x10d   :  { %v1011_v56 = vpop.f32.mrb[11].mxu0  ;;  %v1081_v57 = vpop.f32.mrb[10].mxu1 }
 0x10e   :  { %v2371_v58 = vadd.f32 %v1080_v53, %v369_v54  ;;  %v1012_v59 = vadd.f32 %v1011_v56, %v1010_v55  ;;  %v1082_v60 = vpop.f32.mrb[11].mxu1 }
 0x10f   :  { %v1083_v61 = vadd.f32 %v1082_v60, %v1081_v57 }
 0x110   :  { %v374_v62 = vadd.f32 %v1012_v59, %v2356_v16  ;;  %v1013_v63 = vpop.f32.mrb[12].mxu0 }
 0x111   :  { %v1014_v0 = vpop.f32.mrb[13].mxu0  ;;  %v1084_v1 = vpop.f32.mrb[12].mxu1 }
 0x112   :  { %v2374_v2 = vadd.f32 %v1083_v61, %v374_v62  ;;  %v1015_v3 = vadd.f32 %v1014_v0, %v1013_v63  ;;  %v1085_v4 = vpop.f32.mrb[13].mxu1 }
 0x113   :  { %v1086_v5 = vadd.f32 %v1085_v4, %v1084_v1 }
 0x114   :  { %v379_v6 = vadd.f32 %v1015_v3, %v2356_v16  ;;  %v1016_v7 = vpop.f32.mrb[14].mxu0 }
 0x115   :  { %v1017_v8 = vpop.f32.mrb[15].mxu0  ;;  %v1087_v9 = vpop.f32.mrb[14].mxu1 }
 0x116   :  { %v2377_v10 = vadd.f32 %v1086_v5, %v379_v6  ;;  %v1018_v11 = vadd.f32 %v1017_v8, %v1016_v7  ;;  %v1088_v12 = vpop.f32.mrb[15].mxu1 }
 0x117   :  { %v1089_v13 = vadd.f32 %v1088_v12, %v1087_v9 }
 0x118   :  { %v384_v14 = vadd.f32 %v1018_v11, %v2356_v16  ;;  %v1019_v15 = vpop.f32.mrb[16].mxu0 }
 0x119   :  { %v1020_v17 = vpop.f32.mrb[17].mxu0  ;;  %v1090_v18 = vpop.f32.mrb[16].mxu1 }
 0x11a   :  { %v2380_v19 = vadd.f32 %v1089_v13, %v384_v14  ;;  %v1021_v20 = vadd.f32 %v1020_v17, %v1019_v15  ;;  %v1091_v21 = vpop.f32.mrb[17].mxu1 }
 0x11b   :  { %v1092_v22 = vadd.f32 %v1091_v21, %v1090_v18 }
 0x11c   :  { %v389_v23 = vadd.f32 %v1021_v20, %v2356_v16  ;;  %v1022_v24 = vpop.f32.mrb[18].mxu0 }
 0x11d   :  { %v1023_v25 = vpop.f32.mrb[19].mxu0  ;;  %v1093_v27 = vpop.f32.mrb[18].mxu1 }
 0x11e   :  { %v2383_v28 = vadd.f32 %v1092_v22, %v389_v23  ;;  %v1024_v29 = vadd.f32 %v1023_v25, %v1022_v24  ;;  %v1094_v30 = vpop.f32.mrb[19].mxu1 }
 0x11f   :  { %v1095_v31 = vadd.f32 %v1094_v30, %v1093_v27 }
 0x120   :  { %v394_v32 = vadd.f32 %v1024_v29, %v2356_v16  ;;  %v1025_v33 = vpop.f32.mrb[20].mxu0 }
 0x121   :  { %v1026_v35 = vpop.f32.mrb[21].mxu0  ;;  %v1096_v36 = vpop.f32.mrb[20].mxu1 }
 0x122   :  { %v2386_v37 = vadd.f32 %v1095_v31, %v394_v32  ;;  %v1027_v39 = vadd.f32 %v1026_v35, %v1025_v33  ;;  %v1097_v40 = vpop.f32.mrb[21].mxu1 }
 0x123   :  { %v1098_v41 = vadd.f32 %v1097_v40, %v1096_v36 }
 0x124   :  { %v399_v42 = vadd.f32 %v1027_v39, %v2356_v16  ;;  %v1028_v44 = vpop.f32.mrb[22].mxu0 }
 0x125   :  { %v1029_v45 = vpop.f32.mrb[23].mxu0  ;;  %v1099_v46 = vpop.f32.mrb[22].mxu1 }
 0x126   :  { %v2389_v47 = vadd.f32 %v1098_v41, %v399_v42  ;;  %v1030_v48 = vadd.f32 %v1029_v45, %v1028_v44  ;;  %v1100_v49 = vpop.f32.mrb[23].mxu1 }
 0x127   :  { %v1101_v50 = vadd.f32 %v1100_v49, %v1099_v46 }
 0x128   :  { %v404_v51 = vadd.f32 %v1030_v48, %v2356_v16  ;;  %v1031_v52 = vpop.f32.mrb[24].mxu0 }
 0x129   :  { %v1032_v53 = vpop.f32.mrb[25].mxu0  ;;  %v1102_v54 = vpop.f32.mrb[24].mxu1 }
 0x12a   :  { %v2392_v55 = vadd.f32 %v1101_v50, %v404_v51  ;;  %v1033_v56 = vadd.f32 %v1032_v53, %v1031_v52  ;;  %v1103_v57 = vpop.f32.mrb[25].mxu1 }
 0x12b   :  { %v1104_v59 = vadd.f32 %v1103_v57, %v1102_v54 }
 0x12c   :  { %v409_v60 = vadd.f32 %v1033_v56, %v2356_v16  ;;  %v1137_v61 = vpop.f32.mrb[26].mxu0 }
 0x12d   :  { %v1138_v62 = vpop.f32.mrb[27].mxu0  ;;  %v1208_v63 = vpop.f32.mrb[26].mxu1 }
 0x12e   :  { %v2395_v0 = vadd.f32 %v1104_v59, %v409_v60  ;;  %v1139_v1 = vadd.f32 %v1138_v62, %v1137_v61  ;;  %v1209_v3 = vpop.f32.mrb[27].mxu1 }
 0x12f   :  { %v1210_v4 = vadd.f32 %v1209_v3, %v1208_v63 }
 0x130   :  { %v609_v5 = vadd.f32 %v1139_v1, %v2359_v26  ;;  %v1140_v6 = vpop.f32.mrb[28].mxu0 }
 0x131   :  { %v1141_v7 = vpop.f32.mrb[29].mxu0  ;;  %v1211_v8 = vpop.f32.mrb[28].mxu1 }
 0x132   :  { %v1142_v9 = vadd.f32 %v1141_v7, %v1140_v6  ;;  %v1212_v11 = vpop.f32.mrb[29].mxu1  ;;  %v2398_v12 = vadd.f32 %v1210_v4, %v609_v5 }
 0x133   :  { %v1213_v13 = vadd.f32 %v1212_v11, %v1211_v8 }
 0x134   :  { %v614_v16 = vadd.f32 %v1142_v9, %v2362_v34  ;;  %v1143_v14 = vpop.f32.mrb[30].mxu0 }
 0x135   :  { %v1144_v15 = vpop.f32.mrb[31].mxu0  ;;  %v1214_v17 = vpop.f32.mrb[30].mxu1 }
 0x136   :  { %v1145_v18 = vadd.f32 %v1144_v15, %v1143_v14  ;;  %v1215_v20 = vpop.f32.mrb[31].mxu1  ;;  %v2401_v21 = vadd.f32 %v1213_v13, %v614_v16 }
 0x137   :  { %v1216_v22 = vadd.f32 %v1215_v20, %v1214_v17 }
 0x138   :  { %v619_v26 = vadd.f32 %v1145_v18, %v2365_v43  ;;  %v1146_v23 = vpop.f32.mrb[32].mxu0 }
 0x139   :  { %v1147_v24 = vpop.f32.mrb[33].mxu0  ;;  %v1217_v25 = vpop.f32.mrb[32].mxu1 }
 0x13a   :  { %v1148_v27 = vadd.f32 %v1147_v24, %v1146_v23  ;;  %v1218_v29 = vpop.f32.mrb[33].mxu1  ;;  %v2404_v30 = vadd.f32 %v1216_v22, %v619_v26 }
 0x13b   :  { %v1219_v31 = vadd.f32 %v1218_v29, %v1217_v25 }
 0x13c   :  { %v624_v34 = vadd.f32 %v1148_v27, %v2368_v38  ;;  %v1149_v32 = vpop.f32.mrb[34].mxu0 }
 0x13d   :  { %v1150_v33 = vpop.f32.mrb[35].mxu0  ;;  %v1220_v35 = vpop.f32.mrb[34].mxu1 }
 0x13e   :  { %v1151_v36 = vadd.f32 %v1150_v33, %v1149_v32  ;;  %v1221_v39 = vpop.f32.mrb[35].mxu1  ;;  %v2407_v40 = vadd.f32 %v1219_v31, %v624_v34 }
 0x13f   :  { %v1222_v41 = vadd.f32 %v1221_v39, %v1220_v35 }
 0x140   :  { %v629_v43 = vadd.f32 %v1151_v36, %v2371_v58  ;;  %v1152_v42 = vpop.f32.mrb[36].mxu0 }
 0x141   :  { %v1153_v44 = vpop.f32.mrb[37].mxu0  ;;  %v1223_v45 = vpop.f32.mrb[36].mxu1 }
 0x142   :  { %v1154_v46 = vadd.f32 %v1153_v44, %v1152_v42  ;;  %v1224_v48 = vpop.f32.mrb[37].mxu1  ;;  %v2410_v49 = vadd.f32 %v1222_v41, %v629_v43 }
 0x143   :  { %v1225_v50 = vadd.f32 %v1224_v48, %v1223_v45 }
 0x144   :  { %v634_v38 = vadd.f32 %v1154_v46, %v2374_v2  ;;  %v1155_v51 = vpop.f32.mrb[38].mxu0 }
 0x145   :  { %v1156_v52 = vpop.f32.mrb[39].mxu0  ;;  %v1226_v53 = vpop.f32.mrb[38].mxu1 }
 0x146   :  { %v1157_v54 = vadd.f32 %v1156_v52, %v1155_v51  ;;  %v1227_v56 = vpop.f32.mrb[39].mxu1  ;;  %v2413_v57 = vadd.f32 %v1225_v50, %v634_v38 }
 0x147   :  { %v1228_v59 = vadd.f32 %v1227_v56, %v1226_v53 }
 0x148   :  { %v639_v58 = vadd.f32 %v1157_v54, %v2377_v10  ;;  %v1158_v60 = vpop.f32.mrb[40].mxu0 }
 0x149   :  { %v1159_v61 = vpop.f32.mrb[41].mxu0  ;;  %v1229_v62 = vpop.f32.mrb[40].mxu1 }
 0x14a   :  { %v1160_v63 = vadd.f32 %v1159_v61, %v1158_v60  ;;  %v1230_v1 = vpop.f32.mrb[41].mxu1  ;;  %v2416_v3 = vadd.f32 %v1228_v59, %v639_v58 }
 0x14b   :  { %v1231_v4 = vadd.f32 %v1230_v1, %v1229_v62 }
 0x14c   :  { %v644_v2 = vadd.f32 %v1160_v63, %v2380_v19  ;;  %v1161_v5 = vpop.f32.mrb[42].mxu0 }
 0x14d   :  { %v1162_v6 = vpop.f32.mrb[43].mxu0  ;;  %v1232_v7 = vpop.f32.mrb[42].mxu1 }
 0x14e   :  { %v1163_v8 = vadd.f32 %v1162_v6, %v1161_v5  ;;  %v1233_v9 = vpop.f32.mrb[43].mxu1  ;;  %v774_v11 = vadd.f32 %v1231_v4, %v644_v2 }
 0x14f   :  { %v1234_v13 = vadd.f32 %v1233_v9, %v1232_v7 }
 0x150   :  { %v649_v16 = vadd.f32 %v1163_v8, %v2383_v28  ;;  %v1164_v10 = vpop.f32.mrb[44].mxu0 }
 0x151   :  { %v1165_v14 = vpop.f32.mrb[45].mxu0  ;;  %v1235_v15 = vpop.f32.mrb[44].mxu1 }
 0x152   :  { %v1166_v17 = vadd.f32 %v1165_v14, %v1164_v10  ;;  %v1236_v18 = vpop.f32.mrb[45].mxu1  ;;  %v779_v20 = vadd.f32 %v1234_v13, %v649_v16 }
 0x153   :  { %v1237_v22 = vadd.f32 %v1236_v18, %v1235_v15 }
 0x154   :  { %v654_v26 = vadd.f32 %v1166_v17, %v2386_v37  ;;  %v1167_v23 = vpop.f32.mrb[46].mxu0 }
 0x155   :  { %v1168_v19 = vpop.f32.mrb[47].mxu0  ;;  %v1238_v24 = vpop.f32.mrb[46].mxu1 }
 0x156   :  { %v1169_v25 = vadd.f32 %v1168_v19, %v1167_v23  ;;  %v1239_v27 = vpop.f32.mrb[47].mxu1  ;;  %v784_v29 = vadd.f32 %v1237_v22, %v654_v26 }
 0x157   :  { %v1240_v31 = vadd.f32 %v1239_v27, %v1238_v24 }
 0x158   :  { %v659_v34 = vadd.f32 %v1169_v25, %v2389_v47  ;;  %v1170_v32 = vpop.f32.mrb[48].mxu0 }
 0x159   :  { %v1171_v28 = vpop.f32.mrb[49].mxu0  ;;  %v1241_v33 = vpop.f32.mrb[48].mxu1 }
 0x15a   :  { %v1172_v35 = vadd.f32 %v1171_v28, %v1170_v32  ;;  %v1242_v36 = vpop.f32.mrb[49].mxu1  ;;  %v789_v39 = vadd.f32 %v1240_v31, %v659_v34 }
 0x15b   :  { %v1243_v41 = vadd.f32 %v1242_v36, %v1241_v33 }
 0x15c   :  { %v664_v43 = vadd.f32 %v1172_v35, %v2392_v55  ;;  %v1173_v42 = vpop.f32.mrb[50].mxu0 }
 0x15d   :  { %v1174_v37 = vpop.f32.mrb[51].mxu0  ;;  %v1244_v44 = vpop.f32.mrb[50].mxu1 }
 0x15e   :  { %v1175_v45 = vadd.f32 %v1174_v37, %v1173_v42  ;;  %v1245_v46 = vpop.f32.mrb[51].mxu1  ;;  %v794_v48 = vadd.f32 %v1243_v41, %v664_v43 }
 0x15f   :  { %v1246_v50 = vadd.f32 %v1245_v46, %v1244_v44 }
 0x160   :  { %v669_v38 = vadd.f32 %v1175_v45, %v2395_v0  ;;  %v868_v51 = vpop.f32.mrb[52].mxu0 }
 0x161   :  { %v869_v47 = vadd.f32 %v868_v51, %v2398_v12  ;;  %v903_v52 = vpop.f32.mrb[52].mxu1  ;;  %v1310_v53 = vpop.f32.mrb[53].mxu0 }
 0x162   :  { %v904_v54 = vadd.f32 %v903_v52, %v774_v11  ;;  %v1331_v56 = vpop.f32.mrb[53].mxu1  ;;  %v799_v59 = vadd.f32 %v1246_v50, %v669_v38 }
 0x163   :  { %v932_v58 = vmax.f32 %v869_v47, 0.0 }
 0x164   :  { %v939_v60 = vmax.f32 %v904_v54, 0.0  ;;  %v873_v55 = vpop.f32.mrb[54].mxu0 }
 0x165   :  { %945 = vst [vmem:[%s2473_s3] sm:$0xff] %v932_v58  ;;  %v874_v61 = vadd.f32 %v873_v55, %v2401_v21  ;;  %v908_v62 = vpop.f32.mrb[54].mxu1  ;;  %v1313_v63 = vpop.f32.mrb[55].mxu0 }
 0x166   :  { %952 = vst [vmem:[%s2473_s3 + $0x38] sm:$0xff] %v939_v60  ;;  %v909_v0 = vadd.f32 %v908_v62, %v779_v20  ;;  %v1334_v12 = vpop.f32.mrb[55].mxu1 }
 0x167   :  { %v933_v1 = vmax.f32 %v874_v61, 0.0 }
 0x168   :  { %v940_v4 = vmax.f32 %v909_v0, 0.0  ;;  %v878_v2 = vpop.f32.mrb[56].mxu0 }
 0x169   :  { %946 = vst [vmem:[%s2473_s3 + $0x8] sm:$0xff] %v933_v1  ;;  %v879_v5 = vadd.f32 %v878_v2, %v2404_v30  ;;  %v913_v6 = vpop.f32.mrb[56].mxu1  ;;  %v1316_v7 = vpop.f32.mrb[57].mxu0 }
 0x16a   :  { %953 = vst [vmem:[%s2473_s3 + $0x40] sm:$0xff] %v940_v4  ;;  %v914_v21 = vadd.f32 %v913_v6, %v784_v29  ;;  %v1337_v8 = vpop.f32.mrb[57].mxu1 }
 0x16b   :  { %v934_v9 = vmax.f32 %v879_v5, 0.0 }
 0x16c   :  { %v941_v11 = vmax.f32 %v914_v21, 0.0  ;;  %v883_v13 = vpop.f32.mrb[58].mxu0 }
 0x16d   :  { %947 = vst [vmem:[%s2473_s3 + $0x10] sm:$0xff] %v934_v9  ;;  %v884_v16 = vadd.f32 %v883_v13, %v2407_v40  ;;  %v918_v10 = vpop.f32.mrb[58].mxu1  ;;  %v1319_v14 = vpop.f32.mrb[59].mxu0 }
 0x16e   :  { %954 = vst [vmem:[%s2473_s3 + $0x48] sm:$0xff] %v941_v11  ;;  %v919_v30 = vadd.f32 %v918_v10, %v789_v39  ;;  %v1340_v15 = vpop.f32.mrb[59].mxu1 }
 0x16f   :  { %v935_v17 = vmax.f32 %v884_v16, 0.0 }
 0x170   :  { %v942_v18 = vmax.f32 %v919_v30, 0.0  ;;  %v888_v20 = vpop.f32.mrb[60].mxu0 }
 0x171   :  { %948 = vst [vmem:[%s2473_s3 + $0x18] sm:$0xff] %v935_v17  ;;  %v889_v22 = vadd.f32 %v888_v20, %v2410_v49  ;;  %v923_v26 = vpop.f32.mrb[60].mxu1  ;;  %v1322_v23 = vpop.f32.mrb[61].mxu0 }
 0x172   :  { %955 = vst [vmem:[%s2473_s3 + $0x50] sm:$0xff] %v942_v18  ;;  %v924_v40 = vadd.f32 %v923_v26, %v794_v48  ;;  %v1343_v19 = vpop.f32.mrb[61].mxu1 }
 0x173   :  { %v936_v24 = vmax.f32 %v889_v22, 0.0 }
 0x174   :  { %v943_v25 = vmax.f32 %v924_v40, 0.0  ;;  %v893_v27 = vpop.f32.mrb[62].mxu0 }
 0x175   :  { %949 = vst [vmem:[%s2473_s3 + $0x20] sm:$0xff] %v936_v24  ;;  %v894_v29 = vadd.f32 %v893_v27, %v2413_v57  ;;  %v928_v31 = vpop.f32.mrb[62].mxu1  ;;  %v1325_v34 = vpop.f32.mrb[63].mxu0 }
 0x176   :  { %956 = vst [vmem:[%s2473_s3 + $0x58] sm:$0xff] %v943_v25  ;;  %v929_v49 = vadd.f32 %v928_v31, %v799_v59  ;;  %v1346_v32 = vpop.f32.mrb[63].mxu1 }
 0x177   :  { %v937_v28 = vmax.f32 %v894_v29, 0.0 }
 0x178   :  { %v944_v33 = vmax.f32 %v929_v49, 0.0  ;;  %v898_v35 = vpop.f32.mrb[64].mxu0 }
 0x179   :  { %950 = vst [vmem:[%s2473_s3 + $0x28] sm:$0xff] %v937_v28  ;;  %v899_v36 = vadd.f32 %v898_v35, %v2416_v3  ;;  %v1328_v39 = vpop.f32.mrb[65].mxu0 }
 0x17a   :  { %957 = vst [vmem:[%s2473_s3 + $0x60] sm:$0xff] %v944_v33 }
 0x17b   :  { %v938_v57 = vmax.f32 %v899_v36, 0.0 }
 0x17d   :  { %951 = vst [vmem:[%s2473_s3 + $0x30] sm:$0xff] %v938_v57 }

// kernel: dqn_cnn_forward.6
= control target key start
LH: loop header
LB: loop body
LE: loop exit
PB: predicated region body
PF: predicated region fallthrough
CT: control target
= control target key end

     0   :  { %s1353_s1 = inlined_call_operand.vmem [shape: f32[1024,128], index: 1, kind: input, shape index: {}]   ;;  %s1354_s0 = inlined_call_operand.vmem [shape: f32[32,1024], index: 0, kind: input, shape index: {}]   ;;  %s1355_s2 = inlined_call_operand.vmem [shape: f32[1,128], index: 2, kind: input, shape index: {}]   ;;  %s1356_s3 = inlined_call_operand.vmem [shape: f32[32,128], index: 3, kind: output, shape index: {}]  }
   0x1   :  { %v62_v0 = vld [vmem:[%s1353_s1 + $0x80] sm:$0xff]  ;;  %v63_v1 = vld [vmem:[%s1353_s1 + $0x88] sm:$0xff]  ;;  %v64_v11 = vld [vmem:[%s1353_s1 + $0x90] sm:$0xff] }
   0x2   :  { %v46_v2 = vld [vmem:[%s1353_s1] sm:$0xff]  ;;  %v710_v3 = vpack.c.bf16 %v63_v1, %v62_v0  ;;  %v47_v4 = vld [vmem:[%s1353_s1 + $0x8] sm:$0xff]  ;;  %v65_v13 = vld [vmem:[%s1353_s1 + $0x98] sm:$0xff] }
   0x3   :  { %v94_v5 = vld [vmem:[%s1353_s1 + $0x180] sm:$0xff]  ;;  %v95_v6 = vld [vmem:[%s1353_s1 + $0x188] sm:$0xff]  ;;  %v712_v7 = vpack.c.bf16 %v47_v4, %v46_v2  ;;  %v48_v14 = vld [vmem:[%s1353_s1 + $0x10] sm:$0xff]  ;;  %v714_v16 = vpack.c.bf16 %v65_v13, %v64_v11 }
   0x4   :  { %v742_v8 = vpack.c.bf16 %v95_v6, %v94_v5  ;;  %v78_v9 = vld [vmem:[%s1353_s1 + $0x100] sm:$0xff]  ;;  %v79_v10 = vld [vmem:[%s1353_s1 + $0x108] sm:$0xff]  ;;  %711 = vmatprep.subr.bf16.mxu0 %v710_v3  ;;  %v49_v15 = vld [vmem:[%s1353_s1 + $0x18] sm:$0xff] }
   0x5   :  { %v744_v12 = vpack.c.bf16 %v79_v10, %v78_v9  ;;  %713 = vmatpush3.bf16.msra.mxu0 %v712_v7  ;;  %v716_v17 = vpack.c.bf16 %v49_v15, %v48_v14  ;;  %v96_v18 = vld [vmem:[%s1353_s1 + $0x190] sm:$0xff]  ;;  %v97_v19 = vld [vmem:[%s1353_s1 + $0x198] sm:$0xff]  ;;  %v66_v23 = vld [vmem:[%s1353_s1 + $0xa0] sm:$0xff] }
   0x6   :  { %743 = vmatprep.subr.bf16.mxu1 %v742_v8  ;;  %v80_v20 = vld [vmem:[%s1353_s1 + $0x110] sm:$0xff]  ;;  %v746_v21 = vpack.c.bf16 %v97_v19, %v96_v18  ;;  %v81_v22 = vld [vmem:[%s1353_s1 + $0x118] sm:$0xff]  ;;  %v67_v24 = vld [vmem:[%s1353_s1 + $0xa8] sm:$0xff]  ;;  %715 = vmatprep.subr.bf16.mxu0 %v714_v16 }
   0x7   :  { %745 = vmatpush3.bf16.msra.mxu1 %v744_v12  ;;  %v748_v25 = vpack.c.bf16 %v81_v22, %v80_v20  ;;  %v718_v26 = vpack.c.bf16 %v67_v24, %v66_v23  ;;  %v50_v27 = vld [vmem:[%s1353_s1 + $0x20] sm:$0xff]  ;;  %v51_v28 = vld [vmem:[%s1353_s1 + $0x28] sm:$0xff]  ;;  %v68_v35 = vld [vmem:[%s1353_s1 + $0xb0] sm:$0xff] }
   0x8   :  { %v98_v29 = vld [vmem:[%s1353_s1 + $0x1a0] sm:$0xff]  ;;  %747 = vmatprep.subr.bf16.mxu1 %v746_v21  ;;  %v99_v30 = vld [vmem:[%s1353_s1 + $0x1a8] sm:$0xff]  ;;  %v720_v33 = vpack.c.bf16 %v51_v28, %v50_v27  ;;  %v69_v36 = vld [vmem:[%s1353_s1 + $0xb8] sm:$0xff] }
   0x9   :  { %v82_v31 = vld [vmem:[%s1353_s1 + $0x120] sm:$0xff]  ;;  %v83_v32 = vld [vmem:[%s1353_s1 + $0x128] sm:$0xff]  ;;  %717 = vmatpush3.bf16.msra.mxu0 %v716_v17  ;;  %v750_v34 = vpack.c.bf16 %v99_v30, %v98_v29  ;;  %v52_v37 = vld [vmem:[%s1353_s1 + $0x30] sm:$0xff]  ;;  %v722_v39 = vpack.c.bf16 %v69_v36, %v68_v35 }
   0xa   :  { %719 = vmatprep.subr.bf16.mxu0 %v718_v26  ;;  %v752_v38 = vpack.c.bf16 %v83_v32, %v82_v31  ;;  %v53_v40 = vld [vmem:[%s1353_s1 + $0x38] sm:$0xff]  ;;  %v100_v41 = vld [vmem:[%s1353_s1 + $0x1b0] sm:$0xff]  ;;  %v70_v46 = vld [vmem:[%s1353_s1 + $0xc0] sm:$0xff] }
   0xb   :  { %749 = vmatpush3.bf16.msra.mxu1 %v748_v25  ;;  %v101_v42 = vld [vmem:[%s1353_s1 + $0x1b8] sm:$0xff]  ;;  %v84_v44 = vld [vmem:[%s1353_s1 + $0x130] sm:$0xff]  ;;  %v71_v47 = vld [vmem:[%s1353_s1 + $0xc8] sm:$0xff]  ;;  %v724_v48 = vpack.c.bf16 %v53_v40, %v52_v37 }
   0xc   :  { %751 = vmatprep.subr.bf16.mxu1 %v750_v34  ;;  %v754_v43 = vpack.c.bf16 %v101_v42, %v100_v41  ;;  %v85_v45 = vld [vmem:[%s1353_s1 + $0x138] sm:$0xff]  ;;  %v102_v49 = vld [vmem:[%s1353_s1 + $0x1c0] sm:$0xff]  ;;  %v103_v50 = vld [vmem:[%s1353_s1 + $0x1c8] sm:$0xff]  ;;  %v726_v52 = vpack.c.bf16 %v71_v47, %v70_v46 }
   0xd   :  { %721 = vmatpush3.bf16.msra.mxu0 %v720_v33  ;;  %v756_v51 = vpack.c.bf16 %v85_v45, %v84_v44  ;;  %v54_v53 = vld [vmem:[%s1353_s1 + $0x40] sm:$0xff]  ;;  %v55_v54 = vld [vmem:[%s1353_s1 + $0x48] sm:$0xff]  ;;  %v758_v56 = vpack.c.bf16 %v103_v50, %v102_v49  ;;  %v72_v58 = vld [vmem:[%s1353_s1 + $0xd0] sm:$0xff] }
   0xe   :  { %723 = vmatprep.subr.bf16.mxu0 %v722_v39  ;;  %v86_v55 = vld [vmem:[%s1353_s1 + $0x140] sm:$0xff]  ;;  %v87_v57 = vld [vmem:[%s1353_s1 + $0x148] sm:$0xff]  ;;  %v73_v59 = vld [vmem:[%s1353_s1 + $0xd8] sm:$0xff]  ;;  %v728_v62 = vpack.c.bf16 %v55_v54, %v54_v53 }
   0xf   :  { %753 = vmatpush3.bf16.msra.mxu1 %v752_v38  ;;  %v104_v60 = vld [vmem:[%s1353_s1 + $0x1d0] sm:$0xff]  ;;  %v105_v61 = vld [vmem:[%s1353_s1 + $0x1d8] sm:$0xff]  ;;  %v760_v63 = vpack.c.bf16 %v87_v57, %v86_v55  ;;  %v730_v0 = vpack.c.bf16 %v73_v59, %v72_v58  ;;  %v74_v6 = vld [vmem:[%s1353_s1 + $0xe0] sm:$0xff] }
  0x10   :  { %755 = vmatprep.subr.bf16.mxu1 %v754_v43  ;;  %v56_v1 = vld [vmem:[%s1353_s1 + $0x50] sm:$0xff]  ;;  %v57_v2 = vld [vmem:[%s1353_s1 + $0x58] sm:$0xff]  ;;  %v762_v4 = vpack.c.bf16 %v105_v61, %v104_v60  ;;  %v75_v7 = vld [vmem:[%s1353_s1 + $0xe8] sm:$0xff] }
  0x11   :  { %725 = vmatpush3.bf16.msra.mxu0 %v724_v48  ;;  %v88_v3 = vld [vmem:[%s1353_s1 + $0x150] sm:$0xff]  ;;  %v89_v5 = vld [vmem:[%s1353_s1 + $0x158] sm:$0xff]  ;;  %v106_v8 = vld [vmem:[%s1353_s1 + $0x1e0] sm:$0xff]  ;;  %v732_v10 = vpack.c.bf16 %v57_v2, %v56_v1  ;;  %v734_v14 = vpack.c.bf16 %v75_v7, %v74_v6 }
  0x12   :  { %727 = vmatprep.subr.bf16.mxu0 %v726_v52  ;;  %v107_v9 = vld [vmem:[%s1353_s1 + $0x1e8] sm:$0xff]  ;;  %v58_v11 = vld [vmem:[%s1353_s1 + $0x60] sm:$0xff]  ;;  %v764_v13 = vpack.c.bf16 %v89_v5, %v88_v3  ;;  %v76_v19 = vld [vmem:[%s1353_s1 + $0xf0] sm:$0xff] }
  0x13   :  { %757 = vmatpush3.bf16.msra.mxu1 %v756_v51  ;;  %v59_v12 = vld [vmem:[%s1353_s1 + $0x68] sm:$0xff]  ;;  %v90_v15 = vld [vmem:[%s1353_s1 + $0x160] sm:$0xff]  ;;  %v766_v18 = vpack.c.bf16 %v107_v9, %v106_v8  ;;  %v77_v20 = vld [vmem:[%s1353_s1 + $0xf8] sm:$0xff] }
  0x14   :  { %759 = vmatprep.subr.bf16.mxu1 %v758_v56  ;;  %v91_v16 = vld [vmem:[%s1353_s1 + $0x168] sm:$0xff]  ;;  %v17_v21 = vld [vmem:[%s1354_s0 + $0x18] sm:$0xff]  ;;  %v108_v22 = vld [vmem:[%s1353_s1 + $0x1f0] sm:$0xff]  ;;  %v736_v24 = vpack.c.bf16 %v59_v12, %v58_v11  ;;  %v738_v26 = vpack.c.bf16 %v77_v20, %v76_v19 }
  0x15   :  { %729 = vmatpush3.bf16.msra.mxu0 %v728_v62  ;;  %v15_v17 = vld [vmem:[%s1354_s0 + $0x8] sm:$0xff]  ;;  %v109_v23 = vld [vmem:[%s1353_s1 + $0x1f8] sm:$0xff]  ;;  %330 = vmatprep.mubr.f32.mxu1 %v17_v21  ;;  %v768_v25 = vpack.c.bf16 %v91_v16, %v90_v15  ;;  %v60_v27 = vld [vmem:[%s1353_s1 + $0x70] sm:$0xff] }
  0x16   :  { %731 = vmatprep.subr.bf16.mxu0 %v730_v0  ;;  %245 = vmatprep.mubr.f32.mxu0 %v15_v17  ;;  %v61_v28 = vld [vmem:[%s1353_s1 + $0x78] sm:$0xff]  ;;  %v92_v29 = vld [vmem:[%s1353_s1 + $0x170] sm:$0xff]  ;;  %v770_v30 = vpack.c.bf16 %v109_v23, %v108_v22  ;;  %v126_v32 = vld [vmem:[%s1353_s1 + $0x280] sm:$0xff] }
  0x17   :  { %761 = vmatpush3.bf16.msra.mxu1 %v760_v63  ;;  %v93_v31 = vld [vmem:[%s1353_s1 + $0x178] sm:$0xff]  ;;  %v127_v33 = vld [vmem:[%s1353_s1 + $0x288] sm:$0xff]  ;;  %v158_v34 = vld [vmem:[%s1353_s1 + $0x380] sm:$0xff]  ;;  %v740_v36 = vpack.c.bf16 %v61_v28, %v60_v27 }
  0x18   :  { %763 = vmatprep.subr.bf16.mxu1 %v762_v4  ;;  %v159_v35 = vld [vmem:[%s1353_s1 + $0x388] sm:$0xff]  ;;  %v772_v37 = vpack.c.bf16 %v93_v31, %v92_v29  ;;  %v774_v38 = vpack.c.bf16 %v127_v33, %v126_v32  ;;  %v110_v39 = vld [vmem:[%s1353_s1 + $0x200] sm:$0xff]  ;;  %v128_v44 = vld [vmem:[%s1353_s1 + $0x290] sm:$0xff] }
  0x19   :  { %733 = vmatpush3.bf16.msra.mxu0 %v732_v10  ;;  %v111_v40 = vld [vmem:[%s1353_s1 + $0x208] sm:$0xff]  ;;  %v142_v41 = vld [vmem:[%s1353_s1 + $0x300] sm:$0xff]  ;;  %v806_v42 = vpack.c.bf16 %v159_v35, %v158_v34  ;;  %v129_v45 = vld [vmem:[%s1353_s1 + $0x298] sm:$0xff] }
  0x1a   :  { %735 = vmatprep.subr.bf16.mxu0 %v734_v14  ;;  %v143_v43 = vld [vmem:[%s1353_s1 + $0x308] sm:$0xff]  ;;  %v160_v46 = vld [vmem:[%s1353_s1 + $0x390] sm:$0xff]  ;;  %v161_v47 = vld [vmem:[%s1353_s1 + $0x398] sm:$0xff]  ;;  %v776_v49 = vpack.c.bf16 %v111_v40, %v110_v39  ;;  %v778_v52 = vpack.c.bf16 %v129_v45, %v128_v44 }
  0x1b   :  { %765 = vmatpush3.bf16.msra.mxu1 %v764_v13  ;;  %v14_v48 = vld [vmem:[%s1354_s0] sm:$0xff]  ;;  %v16_v50 = vld [vmem:[%s1354_s0 + $0x10] sm:$0xff]  ;;  %v808_v51 = vpack.c.bf16 %v143_v43, %v142_v41  ;;  %v113_v54 = vld [vmem:[%s1353_s1 + $0x218] sm:$0xff]  ;;  %v810_v56 = vpack.c.bf16 %v161_v47, %v160_v46 }
  0x1c   :  { %767 = vmatprep.subr.bf16.mxu1 %v766_v18  ;;  %v112_v53 = vld [vmem:[%s1353_s1 + $0x210] sm:$0xff]  ;;  %v145_v57 = vld [vmem:[%s1353_s1 + $0x318] sm:$0xff]  ;;  %v130_v58 = vld [vmem:[%s1353_s1 + $0x2a0] sm:$0xff] }
  0x1d   :  { %737 = vmatpush3.bf16.msra.mxu0 %v736_v24  ;;  %v144_v55 = vld [vmem:[%s1353_s1 + $0x310] sm:$0xff]  ;;  %v131_v59 = vld [vmem:[%s1353_s1 + $0x2a8] sm:$0xff]  ;;  %v162_v60 = vld [vmem:[%s1353_s1 + $0x3a0] sm:$0xff]  ;;  %v780_v63 = vpack.c.bf16 %v113_v54, %v112_v53 }
  0x1e   :  { %739 = vmatprep.subr.bf16.mxu0 %v738_v26  ;;  %v163_v61 = vld [vmem:[%s1353_s1 + $0x3a8] sm:$0xff]  ;;  %v114_v0 = vld [vmem:[%s1353_s1 + $0x220] sm:$0xff]  ;;  %v25_v2 = vld [vmem:[%s1354_s0 + $0x58] sm:$0xff]  ;;  %v812_v3 = vpack.c.bf16 %v145_v57, %v144_v55  ;;  %v782_v4 = vpack.c.bf16 %v131_v59, %v130_v58 }
  0x1f   :  { %769 = vmatpush3.bf16.msra.mxu1 %v768_v25  ;;  %v23_v62 = vld [vmem:[%s1354_s0 + $0x48] sm:$0xff]  ;;  %v22_v1 = vld [vmem:[%s1354_s0 + $0x40] sm:$0xff]  ;;  %v24_v7 = vld [vmem:[%s1354_s0 + $0x50] sm:$0xff]  ;;  %v814_v8 = vpack.c.bf16 %v163_v61, %v162_v60 }
  0x20   :  { %771 = vmatprep.subr.bf16.mxu1 %v770_v30  ;;  %v115_v5 = vld [vmem:[%s1353_s1 + $0x228] sm:$0xff]  ;;  %v146_v6 = vld [vmem:[%s1353_s1 + $0x320] sm:$0xff]  ;;  %v132_v10 = vld [vmem:[%s1353_s1 + $0x2b0] sm:$0xff] }
  0x21   :  { %741 = vmatpush3.bf16.msra.mxu0 %v740_v36  ;;  %v147_v9 = vld [vmem:[%s1353_s1 + $0x328] sm:$0xff]  ;;  %v133_v11 = vld [vmem:[%s1353_s1 + $0x2b8] sm:$0xff]  ;;  %v164_v12 = vld [vmem:[%s1353_s1 + $0x3b0] sm:$0xff]  ;;  %v784_v15 = vpack.c.bf16 %v115_v5, %v114_v0 }
  0x22   :  { %775 = vmatprep.subr.bf16.mxu0 %v774_v38  ;;  %v165_v13 = vld [vmem:[%s1353_s1 + $0x3b8] sm:$0xff]  ;;  %v31_v14 = vld [vmem:[%s1354_s0 + $0x88] sm:$0xff]  ;;  %v116_v16 = vld [vmem:[%s1353_s1 + $0x230] sm:$0xff]  ;;  %v816_v19 = vpack.c.bf16 %v147_v9, %v146_v6  ;;  %v786_v20 = vpack.c.bf16 %v133_v11, %v132_v10 }
  0x23   :  { %773 = vmatpush3.bf16.msra.mxu1 %v772_v37  ;;  %v30_v17 = vld [vmem:[%s1354_s0 + $0x80] sm:$0xff]  ;;  %v33_v18 = vld [vmem:[%s1354_s0 + $0x98] sm:$0xff]  ;;  %v148_v22 = vld [vmem:[%s1353_s1 + $0x330] sm:$0xff]  ;;  %v818_v24 = vpack.c.bf16 %v165_v13, %v164_v12 }
  0x24   :  { %807 = vmatprep.subr.bf16.mxu1 %v806_v42  ;;  %246 = vmatmul.mubr.f32.vlgmr.msra.gmra.mrb[0].mxu0 %v14_v48  ;;  %v117_v21 = vld [vmem:[%s1353_s1 + $0x238] sm:$0xff]  ;;  %v32_v23 = vld [vmem:[%s1354_s0 + $0x90] sm:$0xff]  ;;  %v134_v26 = vld [vmem:[%s1353_s1 + $0x2c0] sm:$0xff] }
  0x25   :  { %777 = vmatpush3.bf16.msra.mxu0 %v776_v49  ;;  %250 = vmatprep.mubr.f32.mxu0 %v23_v62  ;;  %v149_v25 = vld [vmem:[%s1353_s1 + $0x338] sm:$0xff]  ;;  %v135_v27 = vld [vmem:[%s1353_s1 + $0x2c8] sm:$0xff]  ;;  %v166_v28 = vld [vmem:[%s1353_s1 + $0x3c0] sm:$0xff]  ;;  %v788_v31 = vpack.c.bf16 %v117_v21, %v116_v16 }
  0x26   :  { %331 = vmatmul.mubr.f32.vlgmr.msra.gmra.mrb[0].mxu1 %v16_v50  ;;  %779 = vmatprep.subr.bf16.mxu0 %v778_v52  ;;  %v167_v29 = vld [vmem:[%s1353_s1 + $0x3c8] sm:$0xff]  ;;  %v118_v32 = vld [vmem:[%s1353_s1 + $0x240] sm:$0xff]  ;;  %v41_v34 = vld [vmem:[%s1354_s0 + $0xd8] sm:$0xff]  ;;  %v820_v35 = vpack.c.bf16 %v149_v25, %v148_v22  ;;  %v790_v36 = vpack.c.bf16 %v135_v27, %v134_v26 }
  0x27   :  { %809 = vmatpush3.bf16.msra.mxu1 %v808_v51  ;;  %335 = vmatprep.mubr.f32.mxu1 %v25_v2  ;;  %v39_v30 = vld [vmem:[%s1354_s0 + $0xc8] sm:$0xff]  ;;  %v38_v33 = vld [vmem:[%s1354_s0 + $0xc0] sm:$0xff]  ;;  %v40_v39 = vld [vmem:[%s1354_s0 + $0xd0] sm:$0xff]  ;;  %v822_v40 = vpack.c.bf16 %v167_v29, %v166_v28 }
  0x28   :  { %811 = vmatprep.subr.bf16.mxu1 %v810_v56  ;;  %251 = vmatmul.mubr.f32.gmra.mrb[2].mxu0 %v22_v1  ;;  %v119_v37 = vld [vmem:[%s1353_s1 + $0x248] sm:$0xff]  ;;  %v150_v38 = vld [vmem:[%s1353_s1 + $0x340] sm:$0xff]  ;;  %v136_v42 = vld [vmem:[%s1353_s1 + $0x2d0] sm:$0xff] }
  0x29   :  { %781 = vmatpush3.bf16.msra.mxu0 %v780_v63  ;;  %255 = vmatprep.mubr.f32.mxu0 %v31_v14  ;;  %v151_v41 = vld [vmem:[%s1353_s1 + $0x348] sm:$0xff]  ;;  %v137_v43 = vld [vmem:[%s1353_s1 + $0x2d8] sm:$0xff]  ;;  %v168_v44 = vld [vmem:[%s1353_s1 + $0x3d0] sm:$0xff]  ;;  %v792_v46 = vpack.c.bf16 %v119_v37, %v118_v32 }
  0x2a   :  { %336 = vmatmul.mubr.f32.gmra.mrb[2].mxu1 %v24_v7  ;;  %783 = vmatprep.subr.bf16.mxu0 %v782_v4  ;;  %v169_v45 = vld [vmem:[%s1353_s1 + $0x3d8] sm:$0xff]  ;;  %v19_v47 = vld [vmem:[%s1354_s0 + $0x28] sm:$0xff]  ;;  %v824_v49 = vpack.c.bf16 %v151_v41, %v150_v38  ;;  %v794_v50 = vpack.c.bf16 %v137_v43, %v136_v42  ;;  %v120_v51 = vld [vmem:[%s1353_s1 + $0x250] sm:$0xff] }
  0x2b   :  { %813 = vmatpush3.bf16.msra.mxu1 %v812_v3  ;;  %340 = vmatprep.mubr.f32.mxu1 %v33_v18  ;;  %v21_v48 = vld [vmem:[%s1354_s0 + $0x38] sm:$0xff]  ;;  %v152_v53 = vld [vmem:[%s1353_s1 + $0x350] sm:$0xff]  ;;  %v826_v54 = vpack.c.bf16 %v169_v45, %v168_v44  ;;  %v138_v56 = vld [vmem:[%s1353_s1 + $0x2e0] sm:$0xff] }
  0x2c   :  { %815 = vmatprep.subr.bf16.mxu1 %v814_v8  ;;  %256 = vmatmul.mubr.f32.gmra.mrb[4].mxu0 %v30_v17  ;;  %v121_v52 = vld [vmem:[%s1353_s1 + $0x258] sm:$0xff]  ;;  %v139_v57 = vld [vmem:[%s1353_s1 + $0x2e8] sm:$0xff]  ;;  %v170_v58 = vld [vmem:[%s1353_s1 + $0x3e0] sm:$0xff] }
  0x2d   :  { %785 = vmatpush3.bf16.msra.mxu0 %v784_v15  ;;  %260 = vmatprep.mubr.f32.mxu0 %v39_v30  ;;  %v153_v55 = vld [vmem:[%s1353_s1 + $0x358] sm:$0xff]  ;;  %v171_v59 = vld [vmem:[%s1353_s1 + $0x3e8] sm:$0xff]  ;;  %v796_v60 = vpack.c.bf16 %v121_v52, %v120_v51  ;;  %v798_v62 = vpack.c.bf16 %v139_v57, %v138_v56  ;;  %v122_v63 = vld [vmem:[%s1353_s1 + $0x260] sm:$0xff] }
  0x2e   :  { %341 = vmatmul.mubr.f32.gmra.mrb[4].mxu1 %v32_v23  ;;  %787 = vmatprep.subr.bf16.mxu0 %v786_v20  ;;  %v828_v61 = vpack.c.bf16 %v153_v55, %v152_v53  ;;  %v123_v0 = vld [vmem:[%s1353_s1 + $0x268] sm:$0xff]  ;;  %v154_v1 = vld [vmem:[%s1353_s1 + $0x360] sm:$0xff]  ;;  %v830_v2 = vpack.c.bf16 %v171_v59, %v170_v58  ;;  %v140_v4 = vld [vmem:[%s1353_s1 + $0x2f0] sm:$0xff] }
  0x2f   :  { %817 = vmatpush3.bf16.msra.mxu1 %v816_v19  ;;  %345 = vmatprep.mubr.f32.mxu1 %v41_v34  ;;  %v155_v3 = vld [vmem:[%s1353_s1 + $0x368] sm:$0xff]  ;;  %v141_v5 = vld [vmem:[%s1353_s1 + $0x2f8] sm:$0xff]  ;;  %v172_v6 = vld [vmem:[%s1353_s1 + $0x3f0] sm:$0xff]  ;;  %v800_v8 = vpack.c.bf16 %v123_v0, %v122_v63 }
  0x30   :  { %819 = vmatprep.subr.bf16.mxu1 %v818_v24  ;;  %261 = vmatmul.mubr.f32.gmra.mrb[6].mxu0 %v38_v33  ;;  %v173_v7 = vld [vmem:[%s1353_s1 + $0x3f8] sm:$0xff]  ;;  %v832_v9 = vpack.c.bf16 %v155_v3, %v154_v1  ;;  %v802_v10 = vpack.c.bf16 %v141_v5, %v140_v4  ;;  %v124_v11 = vld [vmem:[%s1353_s1 + $0x270] sm:$0xff]  ;;  %v18_v18 = vld [vmem:[%s1354_s0 + $0x20] sm:$0xff] }
  0x31   :  { %789 = vmatpush3.bf16.msra.mxu0 %v788_v31  ;;  %415 = vmatprep.mubr.f32.mxu0 %v19_v47  ;;  %v125_v12 = vld [vmem:[%s1353_s1 + $0x278] sm:$0xff]  ;;  %v834_v13 = vpack.c.bf16 %v173_v7, %v172_v6  ;;  %v156_v14 = vld [vmem:[%s1353_s1 + $0x370] sm:$0xff]  ;;  %v27_v20 = vld [vmem:[%s1354_s0 + $0x68] sm:$0xff] }
  0x32   :  { %346 = vmatmul.mubr.f32.gmra.mrb[6].mxu1 %v40_v39  ;;  %791 = vmatprep.subr.bf16.mxu0 %v790_v36  ;;  %v157_v15 = vld [vmem:[%s1353_s1 + $0x378] sm:$0xff]  ;;  %v804_v16 = vpack.c.bf16 %v125_v12, %v124_v11  ;;  %v20_v19 = vld [vmem:[%s1354_s0 + $0x30] sm:$0xff]  ;;  %v26_v22 = vld [vmem:[%s1354_s0 + $0x60] sm:$0xff] }
  0x33   :  { %821 = vmatpush3.bf16.msra.mxu1 %v820_v35  ;;  %500 = vmatprep.mubr.f32.mxu1 %v21_v48  ;;  %v836_v17 = vpack.c.bf16 %v157_v15, %v156_v14  ;;  %v29_v21 = vld [vmem:[%s1354_s0 + $0x78] sm:$0xff]  ;;  %v28_v23 = vld [vmem:[%s1354_s0 + $0x70] sm:$0xff]  ;;  %v35_v24 = vld [vmem:[%s1354_s0 + $0xa8] sm:$0xff] }
  0x34   :  { %823 = vmatprep.subr.bf16.mxu1 %v822_v40  ;;  %v37_v25 = vld [vmem:[%s1354_s0 + $0xb8] sm:$0xff]  ;;  %v34_v26 = vld [vmem:[%s1354_s0 + $0xa0] sm:$0xff]  ;;  %v36_v27 = vld [vmem:[%s1354_s0 + $0xb0] sm:$0xff] }
  0x35   :  { %793 = vmatpush3.bf16.msra.mxu0 %v792_v46  ;;  %v43_v28 = vld [vmem:[%s1354_s0 + $0xe8] sm:$0xff]  ;;  %v45_v29 = vld [vmem:[%s1354_s0 + $0xf8] sm:$0xff]  ;;  %v42_v30 = vld [vmem:[%s1354_s0 + $0xe0] sm:$0xff] }
  0x36   :  { %795 = vmatprep.subr.bf16.mxu0 %v794_v50  ;;  %v44_v31 = vld [vmem:[%s1354_s0 + $0xf0] sm:$0xff]  ;;  %v533_v33 = vld [vmem:[%s1355_s2] ss:$0 sm:$0xff] }
  0x37   :  { %825 = vmatpush3.bf16.msra.mxu1 %v824_v49 }
  0x38   :  { %827 = vmatprep.subr.bf16.mxu1 %v826_v54 }
  0x39   :  { %797 = vmatpush3.bf16.msra.mxu0 %v796_v60 }
  0x3a   :  { %799 = vmatprep.subr.bf16.mxu0 %v798_v62 }
  0x3b   :  { %829 = vmatpush3.bf16.msra.mxu1 %v828_v61 }
  0x3c   :  { %831 = vmatprep.subr.bf16.mxu1 %v830_v2 }
  0x3d   :  { %801 = vmatpush3.bf16.msra.mxu0 %v800_v8 }
  0x3e   :  { %803 = vmatprep.subr.bf16.mxu0 %v802_v10 }
  0x3f   :  { %833 = vmatpush3.bf16.msra.mxu1 %v832_v9 }
  0x40   :  { %835 = vmatprep.subr.bf16.mxu1 %v834_v13 }
  0x41   :  { %805 = vmatpush3.bf16.msra.mxu0 %v804_v16 }
  0x43   :  { %837 = vmatpush3.bf16.msra.mxu1 %v836_v17 }
  0x44   :  { %416 = vmatmul.mubr.f32.vlgmr.msra.gmra.mrb[8].mxu0 %v18_v18 }
  0x45   :  { %420 = vmatprep.mubr.f32.mxu0 %v27_v20 }
  0x46   :  { %501 = vmatmul.mubr.f32.vlgmr.msra.gmra.mrb[8].mxu1 %v20_v19 }
  0x47   :  { %505 = vmatprep.mubr.f32.mxu1 %v29_v21 }
  0x48   :  { %421 = vmatmul.mubr.f32.gmra.mrb[10].mxu0 %v26_v22 }
  0x49   :  { %425 = vmatprep.mubr.f32.mxu0 %v35_v24 }
  0x4a   :  { %506 = vmatmul.mubr.f32.gmra.mrb[10].mxu1 %v28_v23 }
  0x4b   :  { %510 = vmatprep.mubr.f32.mxu1 %v37_v25 }
  0x4c   :  { %426 = vmatmul.mubr.f32.gmra.mrb[12].mxu0 %v34_v26 }
  0x4d   :  { %430 = vmatprep.mubr.f32.mxu0 %v43_v28 }
  0x4e   :  { %511 = vmatmul.mubr.f32.gmra.mrb[12].mxu1 %v36_v27 }
  0x4f   :  { %515 = vmatprep.mubr.f32.mxu1 %v45_v29 }
  0x50   :  { %431 = vmatmul.mubr.f32.gmra.mrb[14].mxu0 %v42_v30 }
  0x52   :  { %516 = vmatmul.mubr.f32.gmra.mrb[14].mxu1 %v44_v31 }
  0xf7   :  { %v566_v32 = vpop.f32.mrb[0].mxu0 }
  0xf8   :  { %v567_v34 = vpop.f32.mrb[1].mxu0 }
  0xf9   :  { %v610_v35 = vpop.f32.mrb[0].mxu1  ;;  %v568_v36 = vadd.f32 %v567_v34, %v566_v32 }
  0xfa   :  { %v611_v37 = vpop.f32.mrb[1].mxu1 }
  0xfb   :  { %v612_v38 = vadd.f32 %v611_v37, %v610_v35  ;;  %v248_v39 = vadd.f32 %v568_v36, %v533_v33  ;;  %v569_v40 = vpop.f32.mrb[2].mxu0 }
  0xfc   :  { %v570_v41 = vpop.f32.mrb[3].mxu0 }
  0xfd   :  { %v613_v42 = vpop.f32.mrb[2].mxu1  ;;  %v333_v43 = vadd.f32 %v612_v38, %v248_v39  ;;  %v571_v44 = vadd.f32 %v570_v41, %v569_v40 }
  0xfe   :  { %v614_v45 = vpop.f32.mrb[3].mxu1 }
  0xff   :  { %v615_v46 = vadd.f32 %v614_v45, %v613_v42  ;;  %v253_v47 = vadd.f32 %v571_v44, %v533_v33  ;;  %v572_v48 = vpop.f32.mrb[4].mxu0 }
 0x100   :  { %v573_v49 = vpop.f32.mrb[5].mxu0 }
 0x101   :  { %v616_v50 = vpop.f32.mrb[4].mxu1  ;;  %v338_v51 = vadd.f32 %v615_v46, %v253_v47  ;;  %v574_v52 = vadd.f32 %v573_v49, %v572_v48 }
 0x102   :  { %v617_v53 = vpop.f32.mrb[5].mxu1 }
 0x103   :  { %v618_v54 = vadd.f32 %v617_v53, %v616_v50  ;;  %v258_v55 = vadd.f32 %v574_v52, %v533_v33  ;;  %v575_v56 = vpop.f32.mrb[6].mxu0 }
 0x104   :  { %v576_v57 = vpop.f32.mrb[7].mxu0 }
 0x105   :  { %v619_v58 = vpop.f32.mrb[6].mxu1  ;;  %v343_v59 = vadd.f32 %v618_v54, %v258_v55  ;;  %v577_v60 = vadd.f32 %v576_v57, %v575_v56 }
 0x106   :  { %v620_v61 = vpop.f32.mrb[7].mxu1 }
 0x107   :  { %v621_v62 = vadd.f32 %v620_v61, %v619_v58  ;;  %v263_v63 = vadd.f32 %v577_v60, %v533_v33 }
 0x109   :  { %v348_v0 = vadd.f32 %v621_v62, %v263_v63 }
 0x117   :  { %v654_v1 = vpop.f32.mrb[8].mxu0 }
 0x118   :  { %v655_v2 = vpop.f32.mrb[9].mxu0 }
 0x119   :  { %v698_v3 = vpop.f32.mrb[8].mxu1  ;;  %v656_v4 = vadd.f32 %v655_v2, %v654_v1 }
 0x11a   :  { %v699_v5 = vpop.f32.mrb[9].mxu1 }
 0x11b   :  { %v700_v6 = vadd.f32 %v699_v5, %v698_v3  ;;  %v418_v7 = vadd.f32 %v656_v4, %v333_v43  ;;  %v657_v8 = vpop.f32.mrb[10].mxu0 }
 0x11c   :  { %v658_v9 = vpop.f32.mrb[11].mxu0 }
 0x11d   :  { %v701_v10 = vpop.f32.mrb[10].mxu1  ;;  %v503_v11 = vadd.f32 %v700_v6, %v418_v7  ;;  %v659_v12 = vadd.f32 %v658_v9, %v657_v8 }
 0x11e   :  { %v702_v13 = vpop.f32.mrb[11].mxu1 }
 0x11f   :  { %v703_v14 = vadd.f32 %v702_v13, %v701_v10  ;;  %v521_v15 = vmax.f32 %v503_v11, 0.0  ;;  %v423_v16 = vadd.f32 %v659_v12, %v338_v51  ;;  %v660_v17 = vpop.f32.mrb[12].mxu0 }
 0x120   :  { %v661_v18 = vpop.f32.mrb[13].mxu0 }
 0x121   :  { %v704_v19 = vpop.f32.mrb[12].mxu1  ;;  %525 = vst [vmem:[%s1356_s3] sm:$0xff] %v521_v15  ;;  %v508_v20 = vadd.f32 %v703_v14, %v423_v16  ;;  %v662_v21 = vadd.f32 %v661_v18, %v660_v17 }
 0x122   :  { %v705_v22 = vpop.f32.mrb[13].mxu1 }
 0x123   :  { %v706_v23 = vadd.f32 %v705_v22, %v704_v19  ;;  %v522_v24 = vmax.f32 %v508_v20, 0.0  ;;  %v428_v25 = vadd.f32 %v662_v21, %v343_v59  ;;  %v663_v26 = vpop.f32.mrb[14].mxu0 }
 0x124   :  { %v664_v27 = vpop.f32.mrb[15].mxu0 }
 0x125   :  { %v707_v28 = vpop.f32.mrb[14].mxu1  ;;  %526 = vst [vmem:[%s1356_s3 + $0x8] sm:$0xff] %v522_v24  ;;  %v513_v29 = vadd.f32 %v706_v23, %v428_v25  ;;  %v665_v30 = vadd.f32 %v664_v27, %v663_v26 }
 0x126   :  { %v708_v31 = vpop.f32.mrb[15].mxu1 }
 0x127   :  { %v709_v32 = vadd.f32 %v708_v31, %v707_v28  ;;  %v523_v33 = vmax.f32 %v513_v29, 0.0  ;;  %v433_v34 = vadd.f32 %v665_v30, %v348_v0 }
 0x129   :  { %527 = vst [vmem:[%s1356_s3 + $0x10] sm:$0xff] %v523_v33  ;;  %v518_v35 = vadd.f32 %v709_v32, %v433_v34 }
 0x12b   :  { %v524_v36 = vmax.f32 %v518_v35, 0.0 }
 0x12d   :  { %528 = vst [vmem:[%s1356_s3 + $0x18] sm:$0xff] %v524_v36 }

// kernel: dqn_cnn_forward.7
= control target key start
LH: loop header
LB: loop body
LE: loop exit
PB: predicated region body
PF: predicated region fallthrough
CT: control target
= control target key end

     0   :  { %v370_v0 = vmov 0.0|0.0   ;;  %vm371_vm0 = vmmov 0   ;;  %v372_v4 = vmov 0.0   ;;  %s527_s1 = inlined_call_operand.vmem [shape: f32[128,128], index: 1, kind: input, shape index: {}]   ;;  %s528_s3 = inlined_call_operand.vmem [shape: f32[128,128], index: 3, kind: input, shape index: {}]   ;;  %s529_s0 = inlined_call_operand.vmem [shape: f32[8,128], index: 0, kind: input, shape index: {}]   ;;  %s530_s2 = inlined_call_operand.vmem [shape: f32[1,128], index: 2, kind: input, shape index: {}]   ;;  %s531_s4 = inlined_call_operand.vmem [shape: f32[1,128], index: 4, kind: input, shape index: {}]   ;;  %s532_s5 = inlined_call_operand.vmem [shape: f32[8,128], index: 5, kind: output, shape index: {}]  }
   0x1   :  { %319 = vmatprep.subr.bf16.mxu0 %v370_v0  ;;  %v21_v1 = vld [vmem:[%s527_s1] sm:$0xff]  ;;  %v22_v2 = vld [vmem:[%s527_s1 + $0x8] sm:$0xff]  ;;  %v23_v3 = vld [vmem:[%s527_s1 + $0x10] sm:$0xff]  ;;  %281 = vmatprep.mubr.msk.f32.mxu0 %vm371_vm0, %v372_v4 }
   0x2   :  { %v320_v5 = vpack.c.bf16 %v22_v2, %v21_v1  ;;  %v24_v6 = vld [vmem:[%s527_s1 + $0x18] sm:$0xff]  ;;  %343 = vmatprep.subr.bf16.mxu1 %v370_v0  ;;  %316 = vmatprep.mubr.msk.f32.mxu1 %vm371_vm0, %v372_v4  ;;  %v25_v8 = vld [vmem:[%s527_s1 + $0x20] sm:$0xff]  ;;  %v26_v9 = vld [vmem:[%s527_s1 + $0x28] sm:$0xff] }
   0x3   :  { %v323_v7 = vpack.c.bf16 %v24_v6, %v23_v3  ;;  %v115_v10 = vld [vmem:[%s528_s3] sm:$0xff]  ;;  %v116_v11 = vld [vmem:[%s528_s3 + $0x8] sm:$0xff]  ;;  %v117_v12 = vld [vmem:[%s528_s3 + $0x10] sm:$0xff]  ;;  %v326_v14 = vpack.c.bf16 %v26_v9, %v25_v8 }
   0x4   :  { %321 = vmatpush3.bf16.msra.mxu0 %v320_v5  ;;  %v118_v13 = vld [vmem:[%s528_s3 + $0x18] sm:$0xff]  ;;  %v344_v15 = vpack.c.bf16 %v116_v11, %v115_v10  ;;  %v27_v16 = vld [vmem:[%s527_s1 + $0x30] sm:$0xff]  ;;  %v119_v19 = vld [vmem:[%s528_s3 + $0x20] sm:$0xff] }
   0x5   :  { %322 = vmatprep.subr.bf16.mxu0 %v370_v0  ;;  %v28_v17 = vld [vmem:[%s527_s1 + $0x38] sm:$0xff]  ;;  %v347_v18 = vpack.c.bf16 %v118_v13, %v117_v12  ;;  %v120_v20 = vld [vmem:[%s528_s3 + $0x28] sm:$0xff]  ;;  %v29_v22 = vld [vmem:[%s527_s1 + $0x40] sm:$0xff] }
   0x6   :  { %345 = vmatpush3.bf16.msra.mxu1 %v344_v15  ;;  %v329_v21 = vpack.c.bf16 %v28_v17, %v27_v16  ;;  %v30_v23 = vld [vmem:[%s527_s1 + $0x48] sm:$0xff]  ;;  %v350_v24 = vpack.c.bf16 %v120_v20, %v119_v19  ;;  %v121_v25 = vld [vmem:[%s528_s3 + $0x30] sm:$0xff]  ;;  %v122_v26 = vld [vmem:[%s528_s3 + $0x38] sm:$0xff] }
   0x7   :  { %346 = vmatprep.subr.bf16.mxu1 %v370_v0  ;;  %v332_v27 = vpack.c.bf16 %v30_v23, %v29_v22  ;;  %v31_v28 = vld [vmem:[%s527_s1 + $0x50] sm:$0xff]  ;;  %v32_v29 = vld [vmem:[%s527_s1 + $0x58] sm:$0xff]  ;;  %v353_v30 = vpack.c.bf16 %v122_v26, %v121_v25  ;;  %v123_v31 = vld [vmem:[%s528_s3 + $0x40] sm:$0xff] }
   0x8   :  { %324 = vmatpush3.bf16.msra.mxu0 %v323_v7  ;;  %v124_v32 = vld [vmem:[%s528_s3 + $0x48] sm:$0xff]  ;;  %v335_v33 = vpack.c.bf16 %v32_v29, %v31_v28  ;;  %v33_v34 = vld [vmem:[%s527_s1 + $0x60] sm:$0xff]  ;;  %v125_v37 = vld [vmem:[%s528_s3 + $0x50] sm:$0xff] }
   0x9   :  { %325 = vmatprep.subr.bf16.mxu0 %v370_v0  ;;  %v34_v35 = vld [vmem:[%s527_s1 + $0x68] sm:$0xff]  ;;  %v356_v36 = vpack.c.bf16 %v124_v32, %v123_v31  ;;  %v126_v38 = vld [vmem:[%s528_s3 + $0x58] sm:$0xff]  ;;  %v35_v40 = vld [vmem:[%s527_s1 + $0x70] sm:$0xff] }
   0xa   :  { %348 = vmatpush3.bf16.msra.mxu1 %v347_v18  ;;  %v338_v39 = vpack.c.bf16 %v34_v35, %v33_v34  ;;  %v36_v41 = vld [vmem:[%s527_s1 + $0x78] sm:$0xff]  ;;  %v359_v42 = vpack.c.bf16 %v126_v38, %v125_v37  ;;  %v127_v43 = vld [vmem:[%s528_s3 + $0x60] sm:$0xff]  ;;  %v128_v44 = vld [vmem:[%s528_s3 + $0x68] sm:$0xff] }
   0xb   :  { %349 = vmatprep.subr.bf16.mxu1 %v370_v0  ;;  %v341_v45 = vpack.c.bf16 %v36_v41, %v35_v40  ;;  %v362_v46 = vpack.c.bf16 %v128_v44, %v127_v43  ;;  %v20_v47 = vld [vmem:[%s529_s0] sm:$0xff]  ;;  %v129_v48 = vld [vmem:[%s528_s3 + $0x70] sm:$0xff]  ;;  %v130_v49 = vld [vmem:[%s528_s3 + $0x78] sm:$0xff] }
   0xc   :  { %327 = vmatpush3.bf16.msra.mxu0 %v326_v14  ;;  %v365_v50 = vpack.c.bf16 %v130_v49, %v129_v48  ;;  %v213_v51 = vld [vmem:[%s530_s2] ss:$0 sm:$0xff] }
   0xd   :  { %328 = vmatprep.subr.bf16.mxu0 %v370_v0  ;;  %v214_v56 = vld [vmem:[%s531_s4] ss:$0 sm:$0xff] }
   0xe   :  { %351 = vmatpush3.bf16.msra.mxu1 %v350_v24 }
   0xf   :  { %352 = vmatprep.subr.bf16.mxu1 %v370_v0 }
  0x10   :  { %330 = vmatpush3.bf16.msra.mxu0 %v329_v21 }
  0x11   :  { %331 = vmatprep.subr.bf16.mxu0 %v370_v0 }
  0x12   :  { %354 = vmatpush3.bf16.msra.mxu1 %v353_v30 }
  0x13   :  { %355 = vmatprep.subr.bf16.mxu1 %v370_v0 }
  0x14   :  { %333 = vmatpush3.bf16.msra.mxu0 %v332_v27 }
  0x15   :  { %334 = vmatprep.subr.bf16.mxu0 %v370_v0 }
  0x16   :  { %357 = vmatpush3.bf16.msra.mxu1 %v356_v36 }
  0x17   :  { %358 = vmatprep.subr.bf16.mxu1 %v370_v0 }
  0x18   :  { %336 = vmatpush3.bf16.msra.mxu0 %v335_v33 }
  0x19   :  { %337 = vmatprep.subr.bf16.mxu0 %v370_v0 }
  0x1a   :  { %360 = vmatpush3.bf16.msra.mxu1 %v359_v42 }
  0x1b   :  { %361 = vmatprep.subr.bf16.mxu1 %v370_v0 }
  0x1c   :  { %339 = vmatpush3.bf16.msra.mxu0 %v338_v39 }
  0x1d   :  { %340 = vmatprep.subr.bf16.mxu0 %v370_v0 }
  0x1e   :  { %363 = vmatpush3.bf16.msra.mxu1 %v362_v46 }
  0x1f   :  { %364 = vmatprep.subr.bf16.mxu1 %v370_v0 }
  0x20   :  { %342 = vmatpush3.bf16.msra.mxu0 %v341_v45 }
  0x22   :  { %366 = vmatpush3.bf16.msra.mxu1 %v365_v50 }
  0x23   :  { %282 = vmatmul.mubr.f32.vlgmr.msra.gmra.mrb[0].mxu0 %v20_v47 }
  0xf6   :  { %v110_v52 = vpop.f32.mrb[0].mxu0 }
  0xf7   :  { %v111_v53 = vadd.f32 %v213_v51, %v110_v52  ;;  %v283_v54 = vpop.f32.mrb[1].mxu0 }
  0xf9   :  { %v114_v55 = vmax.f32 %v111_v53, 0.0 }
  0xfb   :  { %317 = vmatmul.mubr.f32.vlgmr.msra.gmra.mrb[0].mxu1 %v114_v55 }
 0x1ce   :  { %v204_v57 = vpop.f32.mrb[0].mxu1 }
 0x1cf   :  { %v205_v58 = vadd.f32 %v214_v56, %v204_v57  ;;  %v318_v59 = vpop.f32.mrb[1].mxu1 }
 0x1d1   :  { %208 = vst [vmem:[%s532_s5] sm:$0xff] %v205_v58 }

</bundles_post_ra>
